<compile_context>
chip_gen: v5e
topology: v5e:2x2
jax: 0.10.0
libtpu: 0.0.40
codegen_flags: <defaults>
</compile_context>

<pallas_src>
import jax
import jax.numpy as jnp
from jax import lax
from jax.experimental import pallas as pl
from jax.experimental.pallas import tpu as pltpu

# ----------------------------- config (small, consistent with __init__) ------
LENGTH       = 8                    # N  (sequence length)
EMBED_DIM    = 32                   # D
LATENT_DIM   = 16                   # L
DEPTH        = 2
NUM_HEADS    = 2
DIM_HEAD     = EMBED_DIM * 2        # 64  (module passes dim_head = embed_dim*2)
DEC_EMBED    = 32
DEC_DEPTH    = 2
DEC_HEADS    = 2
DEC_DIM_HEAD = DEC_EMBED * 2        # 64
MLP_RATIO    = 0.8
MASK_RATIO   = 0.75

T       = LENGTH + 1                       # tokens incl. cls
INNER   = NUM_HEADS * DIM_HEAD             # 128 (same for encoder & decoder here)
HID     = int(EMBED_DIM * MLP_RATIO)       # 25 logical MLP hidden width
HID_PAD = 128                              # lane-dense zero-padding of HID (exact)
HALF    = EMBED_DIM * LENGTH // 2          # 128
FULL    = EMBED_DIM * LENGTH               # 256

# -------- per-transformer-block slab (column-packed, 32 rows = dim) ----------
#   cols [OFF_QKV, OFF_WO)  : wqkv            [dim, 3*inner]
#   cols [OFF_WO,  OFF_W1)  : wo^T            [dim, inner]
#   cols [OFF_W1,  OFF_W2)  : w1              [dim, HID_PAD]
#   cols [OFF_W2,  OFF_VEC) : w2^T            [dim, HID_PAD]
#   cols [OFF_VEC, SLAB_W)  : small vectors in rows 0..6 (see VR_* below)
OFF_QKV = 0
OFF_WO  = OFF_QKV + 3 * INNER              # 384
OFF_W1  = OFF_WO + INNER                   # 512
OFF_W2  = OFF_W1 + HID_PAD                 # 640
OFF_VEC = OFF_W2 + HID_PAD                 # 768
SLAB_W  = OFF_VEC + HID_PAD                # 896
VR_LN1G, VR_LN1B, VR_BO, VR_LN2G, VR_LN2B, VR_B2, VR_B1 = range(7)

# -------- encoder-tail slab: final LN + LSTM (width 4L) -----------------------
ET_NG   = 0
ET_NB   = 1
ET_WIH  = 2
ET_WHH  = ET_WIH + EMBED_DIM               # 34
ET_B    = ET_WHH + LATENT_DIM              # 50  (b_ih + b_hh fused)
ET_ROWS = ET_B + 1                         # 51
ET_W    = 4 * LATENT_DIM                   # 64

# -------- latent->decoder slab (width N*D) ------------------------------------
L2_W1   = 0
L2_B1   = LATENT_DIM                       # 16
L2_W2   = L2_B1 + 1                        # 17
L2_B2   = L2_W2 + HALF                     # 145
L2_ROWS = L2_B2 + 1                        # 146

# -------- decoder-misc slab (width DEC_EMBED) ---------------------------------
DM_DECW = 0
DM_DECB = DM_DECW + EMBED_DIM              # 32
DM_CLSW = DM_DECB + 1                      # 33
DM_CLSB = DM_CLSW + EMBED_DIM              # 65
DM_POS  = DM_CLSB + 1                      # 66
DM_NG   = DM_POS + T                       # 75
DM_NB   = DM_NG + 1                        # 76
DM_PW   = DM_NB + 1                        # 77
DM_PB   = DM_PW + DEC_EMBED                # 109
DM_ROWS = DM_PB + 1                        # 110


# ----------------------------- in-kernel helpers -----------------------------
def _gelu(x):
    # tanh-approx GELU (PyTorch nn.GELU defaults to exact erf; ~1e-3 deviation)
    return 0.5 * x * (1.0 + jnp.tanh(0.7978845608028654 * (x + 0.044715 * x * x * x)))


def _layernorm(x, g, b, eps=1e-5):
    mu = jnp.mean(x, axis=-1, keepdims=True)
    xc = x - mu
    var = jnp.mean(xc * xc, axis=-1, keepdims=True)
    return xc * lax.rsqrt(var + eps) * g + b


def _matmul_nt(a, b_t):
    """a [m,k] @ b_t[n,k]^T -> [m,n]  (weight stored transposed in the slab)."""
    return lax.dot_general(a, b_t, (((1,), (1,)), ((), ())),
                           preferred_element_type=jnp.float32)


def _block(x, slabs_ref, d, *, dim, heads, dim_head):
    """One pre-norm transformer block on one sample's tokens x: [T, dim].
    Weights are read lazily as static slices of slabs_ref[d] at point of use."""
    inner = heads * dim_head
    scale = dim_head ** -0.5
    vecs = slabs_ref[d, 0:8, OFF_VEC:OFF_VEC + HID_PAD]         # [8, HID_PAD] tiny
    # ---- attention (fused QKV projection, per-sample so no batch mask) ----
    xn = _layernorm(x, vecs[VR_LN1G:VR_LN1G + 1, 0:dim], vecs[VR_LN1B:VR_LN1B + 1, 0:dim])
    qkv = jnp.dot(xn, slabs_ref[d, :, OFF_QKV:OFF_QKV + 3 * inner],
                  preferred_element_type=jnp.float32)            # [T, 3*inner]
    outs = []
    for h in range(heads):                                       # static (heads=2)
        q = qkv[:, h * dim_head:(h + 1) * dim_head]
        k = qkv[:, inner + h * dim_head:inner + (h + 1) * dim_head]
        v = qkv[:, 2 * inner + h * dim_head:2 * inner + (h + 1) * dim_head]
        s = _matmul_nt(q, k) * scale                             # [T, T]
        s = s - jnp.max(s, axis=-1, keepdims=True)
        e = jnp.exp(s)
        a = e * pl.reciprocal(jnp.sum(e, axis=-1, keepdims=True), approx=True)
        outs.append(jnp.dot(a, v, preferred_element_type=jnp.float32))
    attn = jnp.concatenate(outs, axis=-1)                        # [T, inner]
    x = x + _matmul_nt(attn, slabs_ref[d, :, OFF_WO:OFF_WO + inner]) \
          + vecs[VR_BO:VR_BO + 1, 0:dim]
    # ---- MLP (hidden zero-padded to HID_PAD lanes; exact) ----
    xn2 = _layernorm(x, vecs[VR_LN2G:VR_LN2G + 1, 0:dim], vecs[VR_LN2B:VR_LN2B + 1, 0:dim])
    h1 = _gelu(jnp.dot(xn2, slabs_ref[d, :, OFF_W1:OFF_W1 + HID_PAD],
                       preferred_element_type=jnp.float32)
               + vecs[VR_B1:VR_B1 + 1, :])                       # [T, HID_PAD]
    h2 = _matmul_nt(h1, slabs_ref[d, :, OFF_W2:OFF_W2 + HID_PAD]) \
         + vecs[VR_B2:VR_B2 + 1, 0:dim]
    return x + h2


# ----------------------------- fused full-network kernel ---------------------
def _padded_ae_kernel(x_ref, enc_ref, dec_ref, tail_ref, l2d_ref, dm_ref,
                      pred_ref, lat_ref):
    D, L, DE, N = EMBED_DIM, LATENT_DIM, DEC_EMBED, LENGTH

    # ------------------ encoder: transformer blocks + final LN ------------------
    x = x_ref[...]                                               # [T, D] one sample
    for d in range(DEPTH):                                       # static unroll
        x = _block(x, enc_ref, d, dim=D, heads=NUM_HEADS, dim_head=DIM_HEAD)
    x = _layernorm(x, tail_ref[ET_NG:ET_NG + 1, 0:D], tail_ref[ET_NB:ET_NB + 1, 0:D])
    cls_enc = x[0:1, :]                                          # normed cls token [1, D]

    # ------------------ CompileSeq: reversed single-layer LSTM ------------------
    # TODO(synk): CompileSeq is not defined upstream; implemented as a reversed
    # single-layer LSTM whose final hidden state is the latent.  The fused bias
    # stands in for b_ih + b_hh of a real PyTorch LSTM.
    # Input contribution hoisted out of the serial loop (one [T,D]x[D,4L] matmul).
    gx = jnp.dot(x, tail_ref[ET_WIH:ET_WIH + D, :],
                 preferred_element_type=jnp.float32) + tail_ref[ET_B:ET_B + 1, :]   # [T, 4L]
    w_hh = tail_ref[ET_WHH:ET_WHH + L, :]                        # [L, 4L], loaded once
    h = jnp.zeros((1, L), jnp.float32)
    c = jnp.zeros((1, L), jnp.float32)
    for t in range(T):                                           # static, reversed
        rev = T - 1 - t
        g = gx[rev:rev + 1, :] + jnp.dot(h, w_hh, preferred_element_type=jnp.float32)
        ig = jax.nn.sigmoid(g[:, 0 * L:1 * L])
        fg = jax.nn.sigmoid(g[:, 1 * L:2 * L])
        gg = jnp.tanh(g[:, 2 * L:3 * L])
        og = jax.nn.sigmoid(g[:, 3 * L:4 * L])
        c = fg * c + ig * gg
        h = og * jnp.tanh(c)
    lat_ref[...] = h.astype(lat_ref.dtype)                       # [1, L]

    # ------------------ latent -> decoder tokens (Linear, GELU, Linear, ELU) ----
    h1 = _gelu(jnp.dot(h, l2d_ref[L2_W1:L2_W1 + L, 0:HALF],
                       preferred_element_type=jnp.float32)
               + l2d_ref[L2_B1:L2_B1 + 1, 0:HALF])               # [1, HALF]
    h2 = jnp.dot(h1, l2d_ref[L2_W2:L2_W2 + HALF, :],
                 preferred_element_type=jnp.float32) + l2d_ref[L2_B2:L2_B2 + 1, :]   # [1, N*D]
    rec = jnp.where(h2 > 0, h2, jnp.exp(jnp.minimum(h2, 0.0)) - 1.0)   # ELU(alpha=1)
    # Rearrange 'B (N D) -> B N D' for one sample: static lane slices -> [N, D].
    rec_nd = jnp.concatenate([rec[:, n * D:(n + 1) * D] for n in range(N)], axis=0)

    # ------------------ decoder embed + pos (cls embed only on the cls row) -----
    emb_tok = jnp.dot(rec_nd, dm_ref[DM_DECW:DM_DECW + D, :],
                      preferred_element_type=jnp.float32) + dm_ref[DM_DECB:DM_DECB + 1, :]
    emb_cls = jnp.dot(cls_enc, dm_ref[DM_CLSW:DM_CLSW + D, :],
                      preferred_element_type=jnp.float32) + dm_ref[DM_CLSB:DM_CLSB + 1, :]
    xd = jnp.concatenate([emb_cls, emb_tok], axis=0) + dm_ref[DM_POS:DM_POS + T, :]  # [T, DE]

    # ------------------ decoder blocks + LN + pred -------------------------------
    for d in range(DEC_DEPTH):                                   # static unroll
        xd = _block(xd, dec_ref, d, dim=DE, heads=DEC_HEADS, dim_head=DEC_DIM_HEAD)
    xd = _layernorm(xd, dm_ref[DM_NG:DM_NG + 1, :], dm_ref[DM_NB:DM_NB + 1, :])
    p = jnp.dot(xd, dm_ref[DM_PW:DM_PW + DE, :],
                preferred_element_type=jnp.float32) + dm_ref[DM_PB:DM_PB + 1, :]     # [T, D]
    pred_ref[...] = p[1:, :].astype(pred_ref.dtype)              # drop cls row


# ----------------------------- random masking (plain-JAX glue) ---------------
def random_masking(key, x, mask_ratio):
    # data-dependent shuffle (argsort/gather) stays in XLA; zeroing is elementwise glue
    B, L, D = x.shape
    len_keep = int(L * (1 - mask_ratio))
    noise = jax.random.uniform(key, (B, L))
    ids_shuffle = jnp.argsort(noise, axis=1)
    ids_restore = jnp.argsort(ids_shuffle, axis=1)
    mask = jnp.ones((B, L), jnp.float32).at[:, :len_keep].set(0.0)
    mask = jnp.take_along_axis(mask, ids_restore, axis=1).astype(bool)
    x_padded = jnp.where(mask[:, :, None], 0.0, x)
    return x_padded, mask


# ----------------------------- parameters ------------------------------------
def init_params(key):
    ks = iter(jax.random.split(key, 64))

    def nrm(shape, scale=0.02):
        return scale * jax.random.normal(next(ks), shape, jnp.float32)

    def block_params(dim):
        # MLP hidden (25) zero-padded to HID_PAD lanes/rows: padded h1 entries are
        # GELU(0)=0 and padded w2 rows are 0, so numerics are exactly preserved.
        w1 = jnp.zeros((dim, HID_PAD), jnp.float32).at[:, :HID].set(nrm((dim, HID)))
        w2 = jnp.zeros((HID_PAD, dim), jnp.float32).at[:HID, :].set(nrm((HID, dim)))
        return dict(
            ln1_g=jnp.ones((1, dim), jnp.float32), ln1_b=jnp.zeros((1, dim), jnp.float32),
            wqkv=nrm((dim, 3 * INNER)),                        # fused Q|K|V projection
            wo=nrm((INNER, dim)), bo=jnp.zeros((1, dim), jnp.float32),
            ln2_g=jnp.ones((1, dim), jnp.float32), ln2_b=jnp.zeros((1, dim), jnp.float32),
            w1=w1, b1=jnp.zeros((1, HID_PAD), jnp.float32),
            w2=w2, b2=jnp.zeros((1, dim), jnp.float32),
        )

    return dict(
        cls_token=jnp.zeros((1, 1, EMBED_DIM), jnp.float32),
        pos_embed=nrm((1, T, EMBED_DIM)),                      # fixed (requires_grad=False)
        enc_blocks=[block_params(EMBED_DIM) for _ in range(DEPTH)],
        norm_g=jnp.ones((1, EMBED_DIM), jnp.float32),
        norm_b=jnp.zeros((1, EMBED_DIM), jnp.float32),
        lstm_w_ih=nrm((EMBED_DIM, 4 * LATENT_DIM)),
        lstm_w_hh=nrm((LATENT_DIM, 4 * LATENT_DIM)),
        lstm_b=jnp.zeros((1, 4 * LATENT_DIM), jnp.float32),    # represents b_ih + b_hh
        l2d_w1=nrm((LATENT_DIM, HALF)), l2d_b1=jnp.zeros((1, HALF), jnp.float32),
        l2d_w2=nrm((HALF, FULL)), l2d_b2=jnp.zeros((1, FULL), jnp.float32),
        dec_embed_w=nrm((EMBED_DIM, DEC_EMBED)), dec_embed_b=jnp.zeros((1, DEC_EMBED), jnp.float32),
        cls_embed_w=nrm((EMBED_DIM, DEC_EMBED)), cls_embed_b=jnp.zeros((1, DEC_EMBED), jnp.float32),
        dec_pos_embed=nrm((1, T, DEC_EMBED)),
        dec_blocks=[block_params(DEC_EMBED) for _ in range(DEC_DEPTH)],
        dec_norm_g=jnp.ones((1, DEC_EMBED), jnp.float32),
        dec_norm_b=jnp.zeros((1, DEC_EMBED), jnp.float32),
        pred_w=nrm((DEC_EMBED, EMBED_DIM)), pred_b=jnp.zeros((1, EMBED_DIM), jnp.float32),
    )


# ----------------------------- weight packing into slabs ----------------------
def _pad_cols(a, width):
    return jnp.pad(a, ((0, 0), (0, width - a.shape[1])))


def _pack_block_slab(blk, dim):
    vec = jnp.zeros((dim, HID_PAD), jnp.float32)
    vec = vec.at[VR_LN1G, :dim].set(blk["ln1_g"][0])
    vec = vec.at[VR_LN1B, :dim].set(blk["ln1_b"][0])
    vec = vec.at[VR_BO,   :dim].set(blk["bo"][0])
    vec = vec.at[VR_LN2G, :dim].set(blk["ln2_g"][0])
    vec = vec.at[VR_LN2B, :dim].set(blk["ln2_b"][0])
    vec = vec.at[VR_B2,   :dim].set(blk["b2"][0])
    vec = vec.at[VR_B1,   :].set(blk["b1"][0])
    return jnp.concatenate([blk["wqkv"], blk["wo"].T, blk["w1"], blk["w2"].T, vec],
                           axis=1)                              # [dim, SLAB_W]


def pack_params(p):
    enc_slabs = jnp.stack([_pack_block_slab(b, EMBED_DIM) for b in p["enc_blocks"]])
    dec_slabs = jnp.stack([_pack_block_slab(b, DEC_EMBED) for b in p["dec_blocks"]])
    enc_tail = jnp.concatenate([
        _pad_cols(p["norm_g"], ET_W), _pad_cols(p["norm_b"], ET_W),
        p["lstm_w_ih"], p["lstm_w_hh"], p["lstm_b"]], axis=0)    # [51, 64]
    l2d = jnp.concatenate([
        _pad_cols(p["l2d_w1"], FULL), _pad_cols(p["l2d_b1"], FULL),
        p["l2d_w2"], p["l2d_b2"]], axis=0)                       # [146, 256]
    dec_misc = jnp.concatenate([
        p["dec_embed_w"], p["dec_embed_b"],
        p["cls_embed_w"], p["cls_embed_b"],
        p["dec_pos_embed"][0],
        p["dec_norm_g"], p["dec_norm_b"],
        p["pred_w"], p["pred_b"]], axis=0)                       # [110, 32]
    assert enc_tail.shape == (ET_ROWS, ET_W)
    assert l2d.shape == (L2_ROWS, FULL)
    assert dec_misc.shape == (DM_ROWS, DEC_EMBED)
    return dict(cls_token=p["cls_token"], pos_embed=p["pos_embed"],
                enc_slabs=enc_slabs, dec_slabs=dec_slabs,
                enc_tail=enc_tail, l2d=l2d, dec_misc=dec_misc)


# ----------------------------- full forward pass ------------------------------
def padded_ae_forward(packed, imgs, mask_key, mask_ratio=MASK_RATIO):
    B, N, D = imgs.shape

    # ---- forward_encoder input assembly (data-dependent masking stays in XLA) --
    x = imgs + packed["pos_embed"][:, 1:, :]
    x, _mask = random_masking(mask_key, x, mask_ratio)
    cls = packed["cls_token"] + packed["pos_embed"][:, :1, :]
    x_full = jnp.concatenate([jnp.broadcast_to(cls, (B, 1, D)), x], axis=1)   # [B, T, D]

    # weights: full-array blocks with constant index maps -> loaded once, VMEM-resident
    def resident(arr):
        nd = arr.ndim
        return pl.BlockSpec(arr.shape, lambda b, nd=nd: (0,) * nd)

    pred, latent = pl.pallas_call(
        _padded_ae_kernel,
        grid=(B,),
        in_specs=[
            pl.BlockSpec((None, T, D), lambda b: (b, 0, 0)),      # one sample per step
            resident(packed["enc_slabs"]),
            resident(packed["dec_slabs"]),
            resident(packed["enc_tail"]),
            resident(packed["l2d"]),
            resident(packed["dec_misc"]),
        ],
        out_specs=(
            pl.BlockSpec((None, LENGTH, D), lambda b: (b, 0, 0)),
            pl.BlockSpec((None, 1, LATENT_DIM), lambda b: (b, 0, 0)),
        ),
        out_shape=(
            jax.ShapeDtypeStruct((B, LENGTH, D), imgs.dtype),
            jax.ShapeDtypeStruct((B, 1, LATENT_DIM), imgs.dtype),
        ),
        compiler_params=pltpu.CompilerParams(
            dimension_semantics=("parallel",)),                   # megacore on v7x
    )(x_full, packed["enc_slabs"], packed["dec_slabs"],
      packed["enc_tail"], packed["l2d"], packed["dec_misc"])
    return pred, latent[:, 0, :]


# ----------------------------- demo -------------------------------------------
if __name__ == "__main__":
    key = jax.random.PRNGKey(0)
    pkey, xkey, mkey = jax.random.split(key, 3)
    params = init_params(pkey)
    packed = pack_params(params)
    imgs = jax.random.normal(xkey, (2, LENGTH, EMBED_DIM), jnp.float32)

    fwd = jax.jit(lambda pk, x, k: padded_ae_forward(pk, x, k, MASK_RATIO))
    pred, latent = fwd(packed, imgs, mkey)
    jax.block_until_ready((pred, latent))

    assert pred.shape == (2, LENGTH, EMBED_DIM), pred.shape
    assert latent.shape == (2, LATENT_DIM), latent.shape
    assert bool(jnp.all(jnp.isfinite(pred))) and bool(jnp.all(jnp.isfinite(latent)))
    print("KERNEL_OK")
</pallas_src>

<mosaic_0001>
module attributes {stable_mosaic.version = 11 : i64} {
  func.func @_padded_ae_kernel(%arg0: i32, %arg1: memref<1x9x32xf32, #tpu.memory_space<vmem>>, %arg2: memref<2x32x896xf32, #tpu.memory_space<vmem>>, %arg3: memref<2x32x896xf32, #tpu.memory_space<vmem>>, %arg4: memref<51x64xf32, #tpu.memory_space<vmem>>, %arg5: memref<146x256xf32, #tpu.memory_space<vmem>>, %arg6: memref<110x32xf32, #tpu.memory_space<vmem>>, %arg7: memref<1x8x32xf32, #tpu.memory_space<vmem>>, %arg8: memref<1x1x16xf32, #tpu.memory_space<vmem>>) attributes {dimension_semantics = [#tpu.dimension_semantics<parallel>], iteration_bounds = array<i64: 2>, scalar_prefetch = 0 : i64, scratch_operands = 0 : i64, tpu.core_type = #tpu.core_type<tc>, window_params = [{transform_indices = @transform_0, window_bounds = array<i64: 1, 9, 32>}, {pipeline_mode = #tpu.pipeline_mode<synchronous>, transform_indices = @transform_1, window_bounds = array<i64: 2, 32, 896>}, {pipeline_mode = #tpu.pipeline_mode<synchronous>, transform_indices = @transform_2, window_bounds = array<i64: 2, 32, 896>}, {pipeline_mode = #tpu.pipeline_mode<synchronous>, transform_indices = @transform_3, window_bounds = array<i64: 51, 64>}, {pipeline_mode = #tpu.pipeline_mode<synchronous>, transform_indices = @transform_4, window_bounds = array<i64: 146, 256>}, {pipeline_mode = #tpu.pipeline_mode<synchronous>, transform_indices = @transform_5, window_bounds = array<i64: 110, 32>}, {transform_indices = @transform_6, window_bounds = array<i64: 1, 8, 32>}, {transform_indices = @transform_7, window_bounds = array<i64: 1, 1, 16>}]} {
    %c0 = arith.constant 0 : index
    %c0_0 = arith.constant 0 : index
    %c0_1 = arith.constant 0 : index
    %0 = vector.load %arg1[%c0, %c0_0, %c0_1] : memref<1x9x32xf32, #tpu.memory_space<vmem>>, vector<1x9x32xf32>
    %1 = vector.shape_cast %0 : vector<1x9x32xf32> to vector<9x32xf32>
    %c0_2 = arith.constant 0 : index
    %c0_3 = arith.constant 0 : index
    %c768 = arith.constant 768 : index
    %2 = vector.load %arg2[%c0_2, %c0_3, %c768] : memref<2x32x896xf32, #tpu.memory_space<vmem>>, vector<1x8x128xf32>
    %3 = vector.shape_cast %2 : vector<1x8x128xf32> to vector<8x128xf32>
    %4 = vector.extract_strided_slice %3 {offsets = [0, 0], sizes = [1, 32], strides = [1, 1]} : vector<8x128xf32> to vector<1x32xf32>
    %5 = vector.extract_strided_slice %3 {offsets = [1, 0], sizes = [1, 32], strides = [1, 1]} : vector<8x128xf32> to vector<1x32xf32>
    %cst = arith.constant dense<0.000000e+00> : vector<9xf32>
    %6 = vector.multi_reduction <add>, %1, %cst [1] : vector<9x32xf32> to vector<9xf32>
    %7 = vector.shape_cast %6 : vector<9xf32> to vector<9x1xf32>
    %cst_4 = arith.constant 3.200000e+01 : f32
    %8 = vector.broadcast %cst_4 : f32 to vector<9x1xf32>
    %9 = arith.divf %7, %8 : vector<9x1xf32>
    %10 = vector.broadcast %9 : vector<9x1xf32> to vector<9x32xf32>
    %11 = arith.subf %1, %10 : vector<9x32xf32>
    %12 = arith.mulf %11, %11 : vector<9x32xf32>
    %cst_5 = arith.constant dense<0.000000e+00> : vector<9xf32>
    %13 = vector.multi_reduction <add>, %12, %cst_5 [1] : vector<9x32xf32> to vector<9xf32>
    %14 = vector.shape_cast %13 : vector<9xf32> to vector<9x1xf32>
    %cst_6 = arith.constant 3.200000e+01 : f32
    %15 = vector.broadcast %cst_6 : f32 to vector<9x1xf32>
    %16 = arith.divf %14, %15 : vector<9x1xf32>
    %cst_7 = arith.constant 9.99999974E-6 : f32
    %17 = vector.broadcast %cst_7 : f32 to vector<9x1xf32>
    %18 = arith.addf %16, %17 : vector<9x1xf32>
    %19 = math.rsqrt %18 : vector<9x1xf32>
    %20 = vector.broadcast %19 : vector<9x1xf32> to vector<9x32xf32>
    %21 = arith.mulf %11, %20 : vector<9x32xf32>
    %22 = vector.broadcast %4 : vector<1x32xf32> to vector<9x32xf32>
    %23 = arith.mulf %21, %22 : vector<9x32xf32>
    %24 = vector.broadcast %5 : vector<1x32xf32> to vector<9x32xf32>
    %25 = arith.addf %23, %24 : vector<9x32xf32>
    %c0_8 = arith.constant 0 : index
    %c0_9 = arith.constant 0 : index
    %c0_10 = arith.constant 0 : index
    %26 = vector.load %arg2[%c0_8, %c0_9, %c0_10] : memref<2x32x896xf32, #tpu.memory_space<vmem>>, vector<1x32x384xf32>
    %27 = vector.shape_cast %26 : vector<1x32x384xf32> to vector<32x384xf32>
    %cst_11 = arith.constant dense<0.000000e+00> : vector<9x384xf32>
    %28 = tpu.matmul %25, %27, %cst_11 {dimension_numbers = #tpu.dot_dimension_numbers<[1], [0], [0], [1], [0, 0, 1, 1], [], []>} : vector<9x32xf32>, vector<32x384xf32>, vector<9x384xf32> -> vector<9x384xf32>
    %29 = vector.extract_strided_slice %28 {offsets = [0, 0], sizes = [9, 64], strides = [1, 1]} : vector<9x384xf32> to vector<9x64xf32>
    %30 = vector.extract_strided_slice %28 {offsets = [0, 128], sizes = [9, 64], strides = [1, 1]} : vector<9x384xf32> to vector<9x64xf32>
    %31 = vector.extract_strided_slice %28 {offsets = [0, 256], sizes = [9, 64], strides = [1, 1]} : vector<9x384xf32> to vector<9x64xf32>
    %cst_12 = arith.constant dense<0.000000e+00> : vector<9x9xf32>
    %32 = tpu.matmul %29, %30, %cst_12 {dimension_numbers = #tpu.dot_dimension_numbers<[1], [1], [0], [0], [0, 0, 1, 0], [], []>} : vector<9x64xf32>, vector<9x64xf32>, vector<9x9xf32> -> vector<9x9xf32>
    %cst_13 = arith.constant 1.250000e-01 : f32
    %33 = vector.broadcast %cst_13 : f32 to vector<9x9xf32>
    %34 = arith.mulf %32, %33 : vector<9x9xf32>
    %cst_14 = arith.constant dense<0xFF800000> : vector<9xf32>
    %35 = vector.multi_reduction <maximumf>, %34, %cst_14 [1] : vector<9x9xf32> to vector<9xf32>
    %36 = vector.shape_cast %35 : vector<9xf32> to vector<9x1xf32>
    %37 = vector.broadcast %36 : vector<9x1xf32> to vector<9x9xf32>
    %38 = arith.subf %34, %37 : vector<9x9xf32>
    %39 = math.exp %38 : vector<9x9xf32>
    %cst_15 = arith.constant dense<0.000000e+00> : vector<9xf32>
    %40 = vector.multi_reduction <add>, %39, %cst_15 [1] : vector<9x9xf32> to vector<9xf32>
    %41 = vector.shape_cast %40 : vector<9xf32> to vector<9x1xf32>
    %42 = tpu.reciprocal %41 {approx = true} : vector<9x1xf32> -> vector<9x1xf32>
    %43 = vector.broadcast %42 : vector<9x1xf32> to vector<9x9xf32>
    %44 = arith.mulf %39, %43 : vector<9x9xf32>
    %cst_16 = arith.constant dense<0.000000e+00> : vector<9x64xf32>
    %45 = tpu.matmul %44, %31, %cst_16 {dimension_numbers = #tpu.dot_dimension_numbers<[1], [0], [0], [1], [0, 0, 1, 1], [], []>} : vector<9x9xf32>, vector<9x64xf32>, vector<9x64xf32> -> vector<9x64xf32>
    %46 = vector.extract_strided_slice %28 {offsets = [0, 64], sizes = [9, 64], strides = [1, 1]} : vector<9x384xf32> to vector<9x64xf32>
    %47 = vector.extract_strided_slice %28 {offsets = [0, 192], sizes = [9, 64], strides = [1, 1]} : vector<9x384xf32> to vector<9x64xf32>
    %48 = vector.extract_strided_slice %28 {offsets = [0, 320], sizes = [9, 64], strides = [1, 1]} : vector<9x384xf32> to vector<9x64xf32>
    %cst_17 = arith.constant dense<0.000000e+00> : vector<9x9xf32>
    %49 = tpu.matmul %46, %47, %cst_17 {dimension_numbers = #tpu.dot_dimension_numbers<[1], [1], [0], [0], [0, 0, 1, 0], [], []>} : vector<9x64xf32>, vector<9x64xf32>, vector<9x9xf32> -> vector<9x9xf32>
    %cst_18 = arith.constant 1.250000e-01 : f32
    %50 = vector.broadcast %cst_18 : f32 to vector<9x9xf32>
    %51 = arith.mulf %49, %50 : vector<9x9xf32>
    %cst_19 = arith.constant dense<0xFF800000> : vector<9xf32>
    %52 = vector.multi_reduction <maximumf>, %51, %cst_19 [1] : vector<9x9xf32> to vector<9xf32>
    %53 = vector.shape_cast %52 : vector<9xf32> to vector<9x1xf32>
    %54 = vector.broadcast %53 : vector<9x1xf32> to vector<9x9xf32>
    %55 = arith.subf %51, %54 : vector<9x9xf32>
    %56 = math.exp %55 : vector<9x9xf32>
    %cst_20 = arith.constant dense<0.000000e+00> : vector<9xf32>
    %57 = vector.multi_reduction <add>, %56, %cst_20 [1] : vector<9x9xf32> to vector<9xf32>
    %58 = vector.shape_cast %57 : vector<9xf32> to vector<9x1xf32>
    %59 = tpu.reciprocal %58 {approx = true} : vector<9x1xf32> -> vector<9x1xf32>
    %60 = vector.broadcast %59 : vector<9x1xf32> to vector<9x9xf32>
    %61 = arith.mulf %56, %60 : vector<9x9xf32>
    %cst_21 = arith.constant dense<0.000000e+00> : vector<9x64xf32>
    %62 = tpu.matmul %61, %48, %cst_21 {dimension_numbers = #tpu.dot_dimension_numbers<[1], [0], [0], [1], [0, 0, 1, 1], [], []>} : vector<9x9xf32>, vector<9x64xf32>, vector<9x64xf32> -> vector<9x64xf32>
    %63 = tpu.concatenate %45, %62 in 1 : vector<9x64xf32>, vector<9x64xf32> -> vector<9x128xf32>
    %c0_22 = arith.constant 0 : index
    %c0_23 = arith.constant 0 : index
    %c384 = arith.constant 384 : index
    %64 = vector.load %arg2[%c0_22, %c0_23, %c384] : memref<2x32x896xf32, #tpu.memory_space<vmem>>, vector<1x32x128xf32>
    %65 = vector.shape_cast %64 : vector<1x32x128xf32> to vector<32x128xf32>
    %cst_24 = arith.constant dense<0.000000e+00> : vector<9x32xf32>
    %66 = tpu.matmul %63, %65, %cst_24 {dimension_numbers = #tpu.dot_dimension_numbers<[1], [1], [0], [0], [0, 0, 1, 0], [], []>} : vector<9x128xf32>, vector<32x128xf32>, vector<9x32xf32> -> vector<9x32xf32>
    %67 = arith.addf %1, %66 : vector<9x32xf32>
    %68 = vector.extract_strided_slice %3 {offsets = [2, 0], sizes = [1, 32], strides = [1, 1]} : vector<8x128xf32> to vector<1x32xf32>
    %69 = vector.broadcast %68 : vector<1x32xf32> to vector<9x32xf32>
    %70 = arith.addf %67, %69 : vector<9x32xf32>
    %71 = vector.extract_strided_slice %3 {offsets = [3, 0], sizes = [1, 32], strides = [1, 1]} : vector<8x128xf32> to vector<1x32xf32>
    %72 = vector.extract_strided_slice %3 {offsets = [4, 0], sizes = [1, 32], strides = [1, 1]} : vector<8x128xf32> to vector<1x32xf32>
    %cst_25 = arith.constant dense<0.000000e+00> : vector<9xf32>
    %73 = vector.multi_reduction <add>, %70, %cst_25 [1] : vector<9x32xf32> to vector<9xf32>
    %74 = vector.shape_cast %73 : vector<9xf32> to vector<9x1xf32>
    %cst_26 = arith.constant 3.200000e+01 : f32
    %75 = vector.broadcast %cst_26 : f32 to vector<9x1xf32>
    %76 = arith.divf %74, %75 : vector<9x1xf32>
    %77 = vector.broadcast %76 : vector<9x1xf32> to vector<9x32xf32>
    %78 = arith.subf %70, %77 : vector<9x32xf32>
    %79 = arith.mulf %78, %78 : vector<9x32xf32>
    %cst_27 = arith.constant dense<0.000000e+00> : vector<9xf32>
    %80 = vector.multi_reduction <add>, %79, %cst_27 [1] : vector<9x32xf32> to vector<9xf32>
    %81 = vector.shape_cast %80 : vector<9xf32> to vector<9x1xf32>
    %cst_28 = arith.constant 3.200000e+01 : f32
    %82 = vector.broadcast %cst_28 : f32 to vector<9x1xf32>
    %83 = arith.divf %81, %82 : vector<9x1xf32>
    %cst_29 = arith.constant 9.99999974E-6 : f32
    %84 = vector.broadcast %cst_29 : f32 to vector<9x1xf32>
    %85 = arith.addf %83, %84 : vector<9x1xf32>
    %86 = math.rsqrt %85 : vector<9x1xf32>
    %87 = vector.broadcast %86 : vector<9x1xf32> to vector<9x32xf32>
    %88 = arith.mulf %78, %87 : vector<9x32xf32>
    %89 = vector.broadcast %71 : vector<1x32xf32> to vector<9x32xf32>
    %90 = arith.mulf %88, %89 : vector<9x32xf32>
    %91 = vector.broadcast %72 : vector<1x32xf32> to vector<9x32xf32>
    %92 = arith.addf %90, %91 : vector<9x32xf32>
    %c0_30 = arith.constant 0 : index
    %c0_31 = arith.constant 0 : index
    %c512 = arith.constant 512 : index
    %93 = vector.load %arg2[%c0_30, %c0_31, %c512] : memref<2x32x896xf32, #tpu.memory_space<vmem>>, vector<1x32x128xf32>
    %94 = vector.shape_cast %93 : vector<1x32x128xf32> to vector<32x128xf32>
    %cst_32 = arith.constant dense<0.000000e+00> : vector<9x128xf32>
    %95 = tpu.matmul %92, %94, %cst_32 {dimension_numbers = #tpu.dot_dimension_numbers<[1], [0], [0], [1], [0, 0, 1, 1], [], []>} : vector<9x32xf32>, vector<32x128xf32>, vector<9x128xf32> -> vector<9x128xf32>
    %96 = vector.extract_strided_slice %3 {offsets = [6, 0], sizes = [1, 128], strides = [1, 1]} : vector<8x128xf32> to vector<1x128xf32>
    %97 = vector.broadcast %96 : vector<1x128xf32> to vector<9x128xf32>
    %98 = arith.addf %95, %97 : vector<9x128xf32>
    %cst_33 = arith.constant 5.000000e-01 : f32
    %99 = vector.broadcast %cst_33 : f32 to vector<9x128xf32>
    %100 = arith.mulf %99, %98 : vector<9x128xf32>
    %cst_34 = arith.constant 4.471500e-02 : f32
    %101 = vector.broadcast %cst_34 : f32 to vector<9x128xf32>
    %102 = arith.mulf %101, %98 : vector<9x128xf32>
    %103 = arith.mulf %102, %98 : vector<9x128xf32>
    %104 = arith.mulf %103, %98 : vector<9x128xf32>
    %105 = arith.addf %98, %104 : vector<9x128xf32>
    %cst_35 = arith.constant 0.797884583 : f32
    %106 = vector.broadcast %cst_35 : f32 to vector<9x128xf32>
    %107 = arith.mulf %106, %105 : vector<9x128xf32>
    %108 = math.tanh %107 : vector<9x128xf32>
    %cst_36 = arith.constant 1.000000e+00 : f32
    %109 = vector.broadcast %cst_36 : f32 to vector<9x128xf32>
    %110 = arith.addf %109, %108 : vector<9x128xf32>
    %111 = arith.mulf %100, %110 : vector<9x128xf32>
    %c0_37 = arith.constant 0 : index
    %c0_38 = arith.constant 0 : index
    %c640 = arith.constant 640 : index
    %112 = vector.load %arg2[%c0_37, %c0_38, %c640] : memref<2x32x896xf32, #tpu.memory_space<vmem>>, vector<1x32x128xf32>
    %113 = vector.shape_cast %112 : vector<1x32x128xf32> to vector<32x128xf32>
    %cst_39 = arith.constant dense<0.000000e+00> : vector<9x32xf32>
    %114 = tpu.matmul %111, %113, %cst_39 {dimension_numbers = #tpu.dot_dimension_numbers<[1], [1], [0], [0], [0, 0, 1, 0], [], []>} : vector<9x128xf32>, vector<32x128xf32>, vector<9x32xf32> -> vector<9x32xf32>
    %115 = vector.extract_strided_slice %3 {offsets = [5, 0], sizes = [1, 32], strides = [1, 1]} : vector<8x128xf32> to vector<1x32xf32>
    %116 = vector.broadcast %115 : vector<1x32xf32> to vector<9x32xf32>
    %117 = arith.addf %114, %116 : vector<9x32xf32>
    %118 = arith.addf %70, %117 : vector<9x32xf32>
    %c1 = arith.constant 1 : index
    %c0_40 = arith.constant 0 : index
    %c768_41 = arith.constant 768 : index
    %119 = vector.load %arg2[%c1, %c0_40, %c768_41] : memref<2x32x896xf32, #tpu.memory_space<vmem>>, vector<1x8x128xf32>
    %120 = vector.shape_cast %119 : vector<1x8x128xf32> to vector<8x128xf32>
    %121 = vector.extract_strided_slice %120 {offsets = [0, 0], sizes = [1, 32], strides = [1, 1]} : vector<8x128xf32> to vector<1x32xf32>
    %122 = vector.extract_strided_slice %120 {offsets = [1, 0], sizes = [1, 32], strides = [1, 1]} : vector<8x128xf32> to vector<1x32xf32>
    %cst_42 = arith.constant dense<0.000000e+00> : vector<9xf32>
    %123 = vector.multi_reduction <add>, %118, %cst_42 [1] : vector<9x32xf32> to vector<9xf32>
    %124 = vector.shape_cast %123 : vector<9xf32> to vector<9x1xf32>
    %cst_43 = arith.constant 3.200000e+01 : f32
    %125 = vector.broadcast %cst_43 : f32 to vector<9x1xf32>
    %126 = arith.divf %124, %125 : vector<9x1xf32>
    %127 = vector.broadcast %126 : vector<9x1xf32> to vector<9x32xf32>
    %128 = arith.subf %118, %127 : vector<9x32xf32>
    %129 = arith.mulf %128, %128 : vector<9x32xf32>
    %cst_44 = arith.constant dense<0.000000e+00> : vector<9xf32>
    %130 = vector.multi_reduction <add>, %129, %cst_44 [1] : vector<9x32xf32> to vector<9xf32>
    %131 = vector.shape_cast %130 : vector<9xf32> to vector<9x1xf32>
    %cst_45 = arith.constant 3.200000e+01 : f32
    %132 = vector.broadcast %cst_45 : f32 to vector<9x1xf32>
    %133 = arith.divf %131, %132 : vector<9x1xf32>
    %cst_46 = arith.constant 9.99999974E-6 : f32
    %134 = vector.broadcast %cst_46 : f32 to vector<9x1xf32>
    %135 = arith.addf %133, %134 : vector<9x1xf32>
    %136 = math.rsqrt %135 : vector<9x1xf32>
    %137 = vector.broadcast %136 : vector<9x1xf32> to vector<9x32xf32>
    %138 = arith.mulf %128, %137 : vector<9x32xf32>
    %139 = vector.broadcast %121 : vector<1x32xf32> to vector<9x32xf32>
    %140 = arith.mulf %138, %139 : vector<9x32xf32>
    %141 = vector.broadcast %122 : vector<1x32xf32> to vector<9x32xf32>
    %142 = arith.addf %140, %141 : vector<9x32xf32>
    %c1_47 = arith.constant 1 : index
    %c0_48 = arith.constant 0 : index
    %c0_49 = arith.constant 0 : index
    %143 = vector.load %arg2[%c1_47, %c0_48, %c0_49] : memref<2x32x896xf32, #tpu.memory_space<vmem>>, vector<1x32x384xf32>
    %144 = vector.shape_cast %143 : vector<1x32x384xf32> to vector<32x384xf32>
    %cst_50 = arith.constant dense<0.000000e+00> : vector<9x384xf32>
    %145 = tpu.matmul %142, %144, %cst_50 {dimension_numbers = #tpu.dot_dimension_numbers<[1], [0], [0], [1], [0, 0, 1, 1], [], []>} : vector<9x32xf32>, vector<32x384xf32>, vector<9x384xf32> -> vector<9x384xf32>
    %146 = vector.extract_strided_slice %145 {offsets = [0, 0], sizes = [9, 64], strides = [1, 1]} : vector<9x384xf32> to vector<9x64xf32>
    %147 = vector.extract_strided_slice %145 {offsets = [0, 128], sizes = [9, 64], strides = [1, 1]} : vector<9x384xf32> to vector<9x64xf32>
    %148 = vector.extract_strided_slice %145 {offsets = [0, 256], sizes = [9, 64], strides = [1, 1]} : vector<9x384xf32> to vector<9x64xf32>
    %cst_51 = arith.constant dense<0.000000e+00> : vector<9x9xf32>
    %149 = tpu.matmul %146, %147, %cst_51 {dimension_numbers = #tpu.dot_dimension_numbers<[1], [1], [0], [0], [0, 0, 1, 0], [], []>} : vector<9x64xf32>, vector<9x64xf32>, vector<9x9xf32> -> vector<9x9xf32>
    %cst_52 = arith.constant 1.250000e-01 : f32
    %150 = vector.broadcast %cst_52 : f32 to vector<9x9xf32>
    %151 = arith.mulf %149, %150 : vector<9x9xf32>
    %cst_53 = arith.constant dense<0xFF800000> : vector<9xf32>
    %152 = vector.multi_reduction <maximumf>, %151, %cst_53 [1] : vector<9x9xf32> to vector<9xf32>
    %153 = vector.shape_cast %152 : vector<9xf32> to vector<9x1xf32>
    %154 = vector.broadcast %153 : vector<9x1xf32> to vector<9x9xf32>
    %155 = arith.subf %151, %154 : vector<9x9xf32>
    %156 = math.exp %155 : vector<9x9xf32>
    %cst_54 = arith.constant dense<0.000000e+00> : vector<9xf32>
    %157 = vector.multi_reduction <add>, %156, %cst_54 [1] : vector<9x9xf32> to vector<9xf32>
    %158 = vector.shape_cast %157 : vector<9xf32> to vector<9x1xf32>
    %159 = tpu.reciprocal %158 {approx = true} : vector<9x1xf32> -> vector<9x1xf32>
    %160 = vector.broadcast %159 : vector<9x1xf32> to vector<9x9xf32>
    %161 = arith.mulf %156, %160 : vector<9x9xf32>
    %cst_55 = arith.constant dense<0.000000e+00> : vector<9x64xf32>
    %162 = tpu.matmul %161, %148, %cst_55 {dimension_numbers = #tpu.dot_dimension_numbers<[1], [0], [0], [1], [0, 0, 1, 1], [], []>} : vector<9x9xf32>, vector<9x64xf32>, vector<9x64xf32> -> vector<9x64xf32>
    %163 = vector.extract_strided_slice %145 {offsets = [0, 64], sizes = [9, 64], strides = [1, 1]} : vector<9x384xf32> to vector<9x64xf32>
    %164 = vector.extract_strided_slice %145 {offsets = [0, 192], sizes = [9, 64], strides = [1, 1]} : vector<9x384xf32> to vector<9x64xf32>
    %165 = vector.extract_strided_slice %145 {offsets = [0, 320], sizes = [9, 64], strides = [1, 1]} : vector<9x384xf32> to vector<9x64xf32>
    %cst_56 = arith.constant dense<0.000000e+00> : vector<9x9xf32>
    %166 = tpu.matmul %163, %164, %cst_56 {dimension_numbers = #tpu.dot_dimension_numbers<[1], [1], [0], [0], [0, 0, 1, 0], [], []>} : vector<9x64xf32>, vector<9x64xf32>, vector<9x9xf32> -> vector<9x9xf32>
    %cst_57 = arith.constant 1.250000e-01 : f32
    %167 = vector.broadcast %cst_57 : f32 to vector<9x9xf32>
    %168 = arith.mulf %166, %167 : vector<9x9xf32>
    %cst_58 = arith.constant dense<0xFF800000> : vector<9xf32>
    %169 = vector.multi_reduction <maximumf>, %168, %cst_58 [1] : vector<9x9xf32> to vector<9xf32>
    %170 = vector.shape_cast %169 : vector<9xf32> to vector<9x1xf32>
    %171 = vector.broadcast %170 : vector<9x1xf32> to vector<9x9xf32>
    %172 = arith.subf %168, %171 : vector<9x9xf32>
    %173 = math.exp %172 : vector<9x9xf32>
    %cst_59 = arith.constant dense<0.000000e+00> : vector<9xf32>
    %174 = vector.multi_reduction <add>, %173, %cst_59 [1] : vector<9x9xf32> to vector<9xf32>
    %175 = vector.shape_cast %174 : vector<9xf32> to vector<9x1xf32>
    %176 = tpu.reciprocal %175 {approx = true} : vector<9x1xf32> -> vector<9x1xf32>
    %177 = vector.broadcast %176 : vector<9x1xf32> to vector<9x9xf32>
    %178 = arith.mulf %173, %177 : vector<9x9xf32>
    %cst_60 = arith.constant dense<0.000000e+00> : vector<9x64xf32>
    %179 = tpu.matmul %178, %165, %cst_60 {dimension_numbers = #tpu.dot_dimension_numbers<[1], [0], [0], [1], [0, 0, 1, 1], [], []>} : vector<9x9xf32>, vector<9x64xf32>, vector<9x64xf32> -> vector<9x64xf32>
    %180 = tpu.concatenate %162, %179 in 1 : vector<9x64xf32>, vector<9x64xf32> -> vector<9x128xf32>
    %c1_61 = arith.constant 1 : index
    %c0_62 = arith.constant 0 : index
    %c384_63 = arith.constant 384 : index
    %181 = vector.load %arg2[%c1_61, %c0_62, %c384_63] : memref<2x32x896xf32, #tpu.memory_space<vmem>>, vector<1x32x128xf32>
    %182 = vector.shape_cast %181 : vector<1x32x128xf32> to vector<32x128xf32>
    %cst_64 = arith.constant dense<0.000000e+00> : vector<9x32xf32>
    %183 = tpu.matmul %180, %182, %cst_64 {dimension_numbers = #tpu.dot_dimension_numbers<[1], [1], [0], [0], [0, 0, 1, 0], [], []>} : vector<9x128xf32>, vector<32x128xf32>, vector<9x32xf32> -> vector<9x32xf32>
    %184 = arith.addf %118, %183 : vector<9x32xf32>
    %185 = vector.extract_strided_slice %120 {offsets = [2, 0], sizes = [1, 32], strides = [1, 1]} : vector<8x128xf32> to vector<1x32xf32>
    %186 = vector.broadcast %185 : vector<1x32xf32> to vector<9x32xf32>
    %187 = arith.addf %184, %186 : vector<9x32xf32>
    %188 = vector.extract_strided_slice %120 {offsets = [3, 0], sizes = [1, 32], strides = [1, 1]} : vector<8x128xf32> to vector<1x32xf32>
    %189 = vector.extract_strided_slice %120 {offsets = [4, 0], sizes = [1, 32], strides = [1, 1]} : vector<8x128xf32> to vector<1x32xf32>
    %cst_65 = arith.constant dense<0.000000e+00> : vector<9xf32>
    %190 = vector.multi_reduction <add>, %187, %cst_65 [1] : vector<9x32xf32> to vector<9xf32>
    %191 = vector.shape_cast %190 : vector<9xf32> to vector<9x1xf32>
    %cst_66 = arith.constant 3.200000e+01 : f32
    %192 = vector.broadcast %cst_66 : f32 to vector<9x1xf32>
    %193 = arith.divf %191, %192 : vector<9x1xf32>
    %194 = vector.broadcast %193 : vector<9x1xf32> to vector<9x32xf32>
    %195 = arith.subf %187, %194 : vector<9x32xf32>
    %196 = arith.mulf %195, %195 : vector<9x32xf32>
    %cst_67 = arith.constant dense<0.000000e+00> : vector<9xf32>
    %197 = vector.multi_reduction <add>, %196, %cst_67 [1] : vector<9x32xf32> to vector<9xf32>
    %198 = vector.shape_cast %197 : vector<9xf32> to vector<9x1xf32>
    %cst_68 = arith.constant 3.200000e+01 : f32
    %199 = vector.broadcast %cst_68 : f32 to vector<9x1xf32>
    %200 = arith.divf %198, %199 : vector<9x1xf32>
    %cst_69 = arith.constant 9.99999974E-6 : f32
    %201 = vector.broadcast %cst_69 : f32 to vector<9x1xf32>
    %202 = arith.addf %200, %201 : vector<9x1xf32>
    %203 = math.rsqrt %202 : vector<9x1xf32>
    %204 = vector.broadcast %203 : vector<9x1xf32> to vector<9x32xf32>
    %205 = arith.mulf %195, %204 : vector<9x32xf32>
    %206 = vector.broadcast %188 : vector<1x32xf32> to vector<9x32xf32>
    %207 = arith.mulf %205, %206 : vector<9x32xf32>
    %208 = vector.broadcast %189 : vector<1x32xf32> to vector<9x32xf32>
    %209 = arith.addf %207, %208 : vector<9x32xf32>
    %c1_70 = arith.constant 1 : index
    %c0_71 = arith.constant 0 : index
    %c512_72 = arith.constant 512 : index
    %210 = vector.load %arg2[%c1_70, %c0_71, %c512_72] : memref<2x32x896xf32, #tpu.memory_space<vmem>>, vector<1x32x128xf32>
    %211 = vector.shape_cast %210 : vector<1x32x128xf32> to vector<32x128xf32>
    %cst_73 = arith.constant dense<0.000000e+00> : vector<9x128xf32>
    %212 = tpu.matmul %209, %211, %cst_73 {dimension_numbers = #tpu.dot_dimension_numbers<[1], [0], [0], [1], [0, 0, 1, 1], [], []>} : vector<9x32xf32>, vector<32x128xf32>, vector<9x128xf32> -> vector<9x128xf32>
    %213 = vector.extract_strided_slice %120 {offsets = [6, 0], sizes = [1, 128], strides = [1, 1]} : vector<8x128xf32> to vector<1x128xf32>
    %214 = vector.broadcast %213 : vector<1x128xf32> to vector<9x128xf32>
    %215 = arith.addf %212, %214 : vector<9x128xf32>
    %cst_74 = arith.constant 5.000000e-01 : f32
    %216 = vector.broadcast %cst_74 : f32 to vector<9x128xf32>
    %217 = arith.mulf %216, %215 : vector<9x128xf32>
    %cst_75 = arith.constant 4.471500e-02 : f32
    %218 = vector.broadcast %cst_75 : f32 to vector<9x128xf32>
    %219 = arith.mulf %218, %215 : vector<9x128xf32>
    %220 = arith.mulf %219, %215 : vector<9x128xf32>
    %221 = arith.mulf %220, %215 : vector<9x128xf32>
    %222 = arith.addf %215, %221 : vector<9x128xf32>
    %cst_76 = arith.constant 0.797884583 : f32
    %223 = vector.broadcast %cst_76 : f32 to vector<9x128xf32>
    %224 = arith.mulf %223, %222 : vector<9x128xf32>
    %225 = math.tanh %224 : vector<9x128xf32>
    %cst_77 = arith.constant 1.000000e+00 : f32
    %226 = vector.broadcast %cst_77 : f32 to vector<9x128xf32>
    %227 = arith.addf %226, %225 : vector<9x128xf32>
    %228 = arith.mulf %217, %227 : vector<9x128xf32>
    %c1_78 = arith.constant 1 : index
    %c0_79 = arith.constant 0 : index
    %c640_80 = arith.constant 640 : index
    %229 = vector.load %arg2[%c1_78, %c0_79, %c640_80] : memref<2x32x896xf32, #tpu.memory_space<vmem>>, vector<1x32x128xf32>
    %230 = vector.shape_cast %229 : vector<1x32x128xf32> to vector<32x128xf32>
    %cst_81 = arith.constant dense<0.000000e+00> : vector<9x32xf32>
    %231 = tpu.matmul %228, %230, %cst_81 {dimension_numbers = #tpu.dot_dimension_numbers<[1], [1], [0], [0], [0, 0, 1, 0], [], []>} : vector<9x128xf32>, vector<32x128xf32>, vector<9x32xf32> -> vector<9x32xf32>
    %232 = vector.extract_strided_slice %120 {offsets = [5, 0], sizes = [1, 32], strides = [1, 1]} : vector<8x128xf32> to vector<1x32xf32>
    %233 = vector.broadcast %232 : vector<1x32xf32> to vector<9x32xf32>
    %234 = arith.addf %231, %233 : vector<9x32xf32>
    %235 = arith.addf %187, %234 : vector<9x32xf32>
    %c0_82 = arith.constant 0 : index
    %c0_83 = arith.constant 0 : index
    %236 = vector.load %arg4[%c0_82, %c0_83] : memref<51x64xf32, #tpu.memory_space<vmem>>, vector<1x32xf32>
    %c1_84 = arith.constant 1 : index
    %c0_85 = arith.constant 0 : index
    %237 = vector.load %arg4[%c1_84, %c0_85] : memref<51x64xf32, #tpu.memory_space<vmem>>, vector<1x32xf32>
    %cst_86 = arith.constant dense<0.000000e+00> : vector<9xf32>
    %238 = vector.multi_reduction <add>, %235, %cst_86 [1] : vector<9x32xf32> to vector<9xf32>
    %239 = vector.shape_cast %238 : vector<9xf32> to vector<9x1xf32>
    %cst_87 = arith.constant 3.200000e+01 : f32
    %240 = vector.broadcast %cst_87 : f32 to vector<9x1xf32>
    %241 = arith.divf %239, %240 : vector<9x1xf32>
    %242 = vector.broadcast %241 : vector<9x1xf32> to vector<9x32xf32>
    %243 = arith.subf %235, %242 : vector<9x32xf32>
    %244 = arith.mulf %243, %243 : vector<9x32xf32>
    %cst_88 = arith.constant dense<0.000000e+00> : vector<9xf32>
    %245 = vector.multi_reduction <add>, %244, %cst_88 [1] : vector<9x32xf32> to vector<9xf32>
    %246 = vector.shape_cast %245 : vector<9xf32> to vector<9x1xf32>
    %cst_89 = arith.constant 3.200000e+01 : f32
    %247 = vector.broadcast %cst_89 : f32 to vector<9x1xf32>
    %248 = arith.divf %246, %247 : vector<9x1xf32>
    %cst_90 = arith.constant 9.99999974E-6 : f32
    %249 = vector.broadcast %cst_90 : f32 to vector<9x1xf32>
    %250 = arith.addf %248, %249 : vector<9x1xf32>
    %251 = math.rsqrt %250 : vector<9x1xf32>
    %252 = vector.broadcast %251 : vector<9x1xf32> to vector<9x32xf32>
    %253 = arith.mulf %243, %252 : vector<9x32xf32>
    %254 = vector.broadcast %236 : vector<1x32xf32> to vector<9x32xf32>
    %255 = arith.mulf %253, %254 : vector<9x32xf32>
    %256 = vector.broadcast %237 : vector<1x32xf32> to vector<9x32xf32>
    %257 = arith.addf %255, %256 : vector<9x32xf32>
    %258 = vector.extract_strided_slice %257 {offsets = [0, 0], sizes = [1, 32], strides = [1, 1]} : vector<9x32xf32> to vector<1x32xf32>
    %c2 = arith.constant 2 : index
    %c0_91 = arith.constant 0 : index
    %259 = vector.load %arg4[%c2, %c0_91] : memref<51x64xf32, #tpu.memory_space<vmem>>, vector<32x64xf32>
    %cst_92 = arith.constant dense<0.000000e+00> : vector<9x64xf32>
    %260 = tpu.matmul %257, %259, %cst_92 {dimension_numbers = #tpu.dot_dimension_numbers<[1], [0], [0], [1], [0, 0, 1, 1], [], []>} : vector<9x32xf32>, vector<32x64xf32>, vector<9x64xf32> -> vector<9x64xf32>
    %c50 = arith.constant 50 : index
    %c0_93 = arith.constant 0 : index
    %261 = vector.load %arg4[%c50, %c0_93] : memref<51x64xf32, #tpu.memory_space<vmem>>, vector<1x64xf32>
    %262 = vector.broadcast %261 : vector<1x64xf32> to vector<9x64xf32>
    %263 = arith.addf %260, %262 : vector<9x64xf32>
    %c34 = arith.constant 34 : index
    %c0_94 = arith.constant 0 : index
    %264 = vector.load %arg4[%c34, %c0_94] : memref<51x64xf32, #tpu.memory_space<vmem>>, vector<16x64xf32>
    %cst_95 = arith.constant 0.000000e+00 : f32
    %265 = vector.broadcast %cst_95 : f32 to vector<1x16xf32>
    %cst_96 = arith.constant 0.000000e+00 : f32
    %266 = vector.broadcast %cst_96 : f32 to vector<1x16xf32>
    %267 = vector.extract_strided_slice %263 {offsets = [8, 0], sizes = [1, 64], strides = [1, 1]} : vector<9x64xf32> to vector<1x64xf32>
    %cst_97 = arith.constant dense<0.000000e+00> : vector<1x64xf32>
    %268 = tpu.matmul %265, %264, %cst_97 {dimension_numbers = #tpu.dot_dimension_numbers<[1], [0], [0], [1], [0, 0, 1, 1], [], []>} : vector<1x16xf32>, vector<16x64xf32>, vector<1x64xf32> -> vector<1x64xf32>
    %269 = arith.addf %267, %268 : vector<1x64xf32>
    %270 = vector.extract_strided_slice %269 {offsets = [0, 0], sizes = [1, 16], strides = [1, 1]} : vector<1x64xf32> to vector<1x16xf32>
    %271 = arith.negf %270 : vector<1x16xf32>
    %272 = math.exp %271 : vector<1x16xf32>
    %cst_98 = arith.constant 1.000000e+00 : f32
    %273 = vector.broadcast %cst_98 : f32 to vector<1x16xf32>
    %274 = arith.addf %273, %272 : vector<1x16xf32>
    %275 = arith.divf %273, %274 : vector<1x16xf32>
    %276 = vector.extract_strided_slice %269 {offsets = [0, 16], sizes = [1, 16], strides = [1, 1]} : vector<1x64xf32> to vector<1x16xf32>
    %277 = arith.negf %276 : vector<1x16xf32>
    %278 = math.exp %277 : vector<1x16xf32>
    %cst_99 = arith.constant 1.000000e+00 : f32
    %279 = vector.broadcast %cst_99 : f32 to vector<1x16xf32>
    %280 = arith.addf %279, %278 : vector<1x16xf32>
    %281 = arith.divf %279, %280 : vector<1x16xf32>
    %282 = vector.extract_strided_slice %269 {offsets = [0, 32], sizes = [1, 16], strides = [1, 1]} : vector<1x64xf32> to vector<1x16xf32>
    %283 = math.tanh %282 : vector<1x16xf32>
    %284 = vector.extract_strided_slice %269 {offsets = [0, 48], sizes = [1, 16], strides = [1, 1]} : vector<1x64xf32> to vector<1x16xf32>
    %285 = arith.negf %284 : vector<1x16xf32>
    %286 = math.exp %285 : vector<1x16xf32>
    %cst_100 = arith.constant 1.000000e+00 : f32
    %287 = vector.broadcast %cst_100 : f32 to vector<1x16xf32>
    %288 = arith.addf %287, %286 : vector<1x16xf32>
    %289 = arith.divf %287, %288 : vector<1x16xf32>
    %290 = arith.mulf %281, %266 : vector<1x16xf32>
    %291 = arith.mulf %275, %283 : vector<1x16xf32>
    %292 = arith.addf %290, %291 : vector<1x16xf32>
    %293 = math.tanh %292 : vector<1x16xf32>
    %294 = arith.mulf %289, %293 : vector<1x16xf32>
    %295 = vector.extract_strided_slice %263 {offsets = [7, 0], sizes = [1, 64], strides = [1, 1]} : vector<9x64xf32> to vector<1x64xf32>
    %cst_101 = arith.constant dense<0.000000e+00> : vector<1x64xf32>
    %296 = tpu.matmul %294, %264, %cst_101 {dimension_numbers = #tpu.dot_dimension_numbers<[1], [0], [0], [1], [0, 0, 1, 1], [], []>} : vector<1x16xf32>, vector<16x64xf32>, vector<1x64xf32> -> vector<1x64xf32>
    %297 = arith.addf %295, %296 : vector<1x64xf32>
    %298 = vector.extract_strided_slice %297 {offsets = [0, 0], sizes = [1, 16], strides = [1, 1]} : vector<1x64xf32> to vector<1x16xf32>
    %299 = arith.negf %298 : vector<1x16xf32>
    %300 = math.exp %299 : vector<1x16xf32>
    %cst_102 = arith.constant 1.000000e+00 : f32
    %301 = vector.broadcast %cst_102 : f32 to vector<1x16xf32>
    %302 = arith.addf %301, %300 : vector<1x16xf32>
    %303 = arith.divf %301, %302 : vector<1x16xf32>
    %304 = vector.extract_strided_slice %297 {offsets = [0, 16], sizes = [1, 16], strides = [1, 1]} : vector<1x64xf32> to vector<1x16xf32>
    %305 = arith.negf %304 : vector<1x16xf32>
    %306 = math.exp %305 : vector<1x16xf32>
    %cst_103 = arith.constant 1.000000e+00 : f32
    %307 = vector.broadcast %cst_103 : f32 to vector<1x16xf32>
    %308 = arith.addf %307, %306 : vector<1x16xf32>
    %309 = arith.divf %307, %308 : vector<1x16xf32>
    %310 = vector.extract_strided_slice %297 {offsets = [0, 32], sizes = [1, 16], strides = [1, 1]} : vector<1x64xf32> to vector<1x16xf32>
    %311 = math.tanh %310 : vector<1x16xf32>
    %312 = vector.extract_strided_slice %297 {offsets = [0, 48], sizes = [1, 16], strides = [1, 1]} : vector<1x64xf32> to vector<1x16xf32>
    %313 = arith.negf %312 : vector<1x16xf32>
    %314 = math.exp %313 : vector<1x16xf32>
    %cst_104 = arith.constant 1.000000e+00 : f32
    %315 = vector.broadcast %cst_104 : f32 to vector<1x16xf32>
    %316 = arith.addf %315, %314 : vector<1x16xf32>
    %317 = arith.divf %315, %316 : vector<1x16xf32>
    %318 = arith.mulf %309, %292 : vector<1x16xf32>
    %319 = arith.mulf %303, %311 : vector<1x16xf32>
    %320 = arith.addf %318, %319 : vector<1x16xf32>
    %321 = math.tanh %320 : vector<1x16xf32>
    %322 = arith.mulf %317, %321 : vector<1x16xf32>
    %323 = vector.extract_strided_slice %263 {offsets = [6, 0], sizes = [1, 64], strides = [1, 1]} : vector<9x64xf32> to vector<1x64xf32>
    %cst_105 = arith.constant dense<0.000000e+00> : vector<1x64xf32>
    %324 = tpu.matmul %322, %264, %cst_105 {dimension_numbers = #tpu.dot_dimension_numbers<[1], [0], [0], [1], [0, 0, 1, 1], [], []>} : vector<1x16xf32>, vector<16x64xf32>, vector<1x64xf32> -> vector<1x64xf32>
    %325 = arith.addf %323, %324 : vector<1x64xf32>
    %326 = vector.extract_strided_slice %325 {offsets = [0, 0], sizes = [1, 16], strides = [1, 1]} : vector<1x64xf32> to vector<1x16xf32>
    %327 = arith.negf %326 : vector<1x16xf32>
    %328 = math.exp %327 : vector<1x16xf32>
    %cst_106 = arith.constant 1.000000e+00 : f32
    %329 = vector.broadcast %cst_106 : f32 to vector<1x16xf32>
    %330 = arith.addf %329, %328 : vector<1x16xf32>
    %331 = arith.divf %329, %330 : vector<1x16xf32>
    %332 = vector.extract_strided_slice %325 {offsets = [0, 16], sizes = [1, 16], strides = [1, 1]} : vector<1x64xf32> to vector<1x16xf32>
    %333 = arith.negf %332 : vector<1x16xf32>
    %334 = math.exp %333 : vector<1x16xf32>
    %cst_107 = arith.constant 1.000000e+00 : f32
    %335 = vector.broadcast %cst_107 : f32 to vector<1x16xf32>
    %336 = arith.addf %335, %334 : vector<1x16xf32>
    %337 = arith.divf %335, %336 : vector<1x16xf32>
    %338 = vector.extract_strided_slice %325 {offsets = [0, 32], sizes = [1, 16], strides = [1, 1]} : vector<1x64xf32> to vector<1x16xf32>
    %339 = math.tanh %338 : vector<1x16xf32>
    %340 = vector.extract_strided_slice %325 {offsets = [0, 48], sizes = [1, 16], strides = [1, 1]} : vector<1x64xf32> to vector<1x16xf32>
    %341 = arith.negf %340 : vector<1x16xf32>
    %342 = math.exp %341 : vector<1x16xf32>
    %cst_108 = arith.constant 1.000000e+00 : f32
    %343 = vector.broadcast %cst_108 : f32 to vector<1x16xf32>
    %344 = arith.addf %343, %342 : vector<1x16xf32>
    %345 = arith.divf %343, %344 : vector<1x16xf32>
    %346 = arith.mulf %337, %320 : vector<1x16xf32>
    %347 = arith.mulf %331, %339 : vector<1x16xf32>
    %348 = arith.addf %346, %347 : vector<1x16xf32>
    %349 = math.tanh %348 : vector<1x16xf32>
    %350 = arith.mulf %345, %349 : vector<1x16xf32>
    %351 = vector.extract_strided_slice %263 {offsets = [5, 0], sizes = [1, 64], strides = [1, 1]} : vector<9x64xf32> to vector<1x64xf32>
    %cst_109 = arith.constant dense<0.000000e+00> : vector<1x64xf32>
    %352 = tpu.matmul %350, %264, %cst_109 {dimension_numbers = #tpu.dot_dimension_numbers<[1], [0], [0], [1], [0, 0, 1, 1], [], []>} : vector<1x16xf32>, vector<16x64xf32>, vector<1x64xf32> -> vector<1x64xf32>
    %353 = arith.addf %351, %352 : vector<1x64xf32>
    %354 = vector.extract_strided_slice %353 {offsets = [0, 0], sizes = [1, 16], strides = [1, 1]} : vector<1x64xf32> to vector<1x16xf32>
    %355 = arith.negf %354 : vector<1x16xf32>
    %356 = math.exp %355 : vector<1x16xf32>
    %cst_110 = arith.constant 1.000000e+00 : f32
    %357 = vector.broadcast %cst_110 : f32 to vector<1x16xf32>
    %358 = arith.addf %357, %356 : vector<1x16xf32>
    %359 = arith.divf %357, %358 : vector<1x16xf32>
    %360 = vector.extract_strided_slice %353 {offsets = [0, 16], sizes = [1, 16], strides = [1, 1]} : vector<1x64xf32> to vector<1x16xf32>
    %361 = arith.negf %360 : vector<1x16xf32>
    %362 = math.exp %361 : vector<1x16xf32>
    %cst_111 = arith.constant 1.000000e+00 : f32
    %363 = vector.broadcast %cst_111 : f32 to vector<1x16xf32>
    %364 = arith.addf %363, %362 : vector<1x16xf32>
    %365 = arith.divf %363, %364 : vector<1x16xf32>
    %366 = vector.extract_strided_slice %353 {offsets = [0, 32], sizes = [1, 16], strides = [1, 1]} : vector<1x64xf32> to vector<1x16xf32>
    %367 = math.tanh %366 : vector<1x16xf32>
    %368 = vector.extract_strided_slice %353 {offsets = [0, 48], sizes = [1, 16], strides = [1, 1]} : vector<1x64xf32> to vector<1x16xf32>
    %369 = arith.negf %368 : vector<1x16xf32>
    %370 = math.exp %369 : vector<1x16xf32>
    %cst_112 = arith.constant 1.000000e+00 : f32
    %371 = vector.broadcast %cst_112 : f32 to vector<1x16xf32>
    %372 = arith.addf %371, %370 : vector<1x16xf32>
    %373 = arith.divf %371, %372 : vector<1x16xf32>
    %374 = arith.mulf %365, %348 : vector<1x16xf32>
    %375 = arith.mulf %359, %367 : vector<1x16xf32>
    %376 = arith.addf %374, %375 : vector<1x16xf32>
    %377 = math.tanh %376 : vector<1x16xf32>
    %378 = arith.mulf %373, %377 : vector<1x16xf32>
    %379 = vector.extract_strided_slice %263 {offsets = [4, 0], sizes = [1, 64], strides = [1, 1]} : vector<9x64xf32> to vector<1x64xf32>
    %cst_113 = arith.constant dense<0.000000e+00> : vector<1x64xf32>
    %380 = tpu.matmul %378, %264, %cst_113 {dimension_numbers = #tpu.dot_dimension_numbers<[1], [0], [0], [1], [0, 0, 1, 1], [], []>} : vector<1x16xf32>, vector<16x64xf32>, vector<1x64xf32> -> vector<1x64xf32>
    %381 = arith.addf %379, %380 : vector<1x64xf32>
    %382 = vector.extract_strided_slice %381 {offsets = [0, 0], sizes = [1, 16], strides = [1, 1]} : vector<1x64xf32> to vector<1x16xf32>
    %383 = arith.negf %382 : vector<1x16xf32>
    %384 = math.exp %383 : vector<1x16xf32>
    %cst_114 = arith.constant 1.000000e+00 : f32
    %385 = vector.broadcast %cst_114 : f32 to vector<1x16xf32>
    %386 = arith.addf %385, %384 : vector<1x16xf32>
    %387 = arith.divf %385, %386 : vector<1x16xf32>
    %388 = vector.extract_strided_slice %381 {offsets = [0, 16], sizes = [1, 16], strides = [1, 1]} : vector<1x64xf32> to vector<1x16xf32>
    %389 = arith.negf %388 : vector<1x16xf32>
    %390 = math.exp %389 : vector<1x16xf32>
    %cst_115 = arith.constant 1.000000e+00 : f32
    %391 = vector.broadcast %cst_115 : f32 to vector<1x16xf32>
    %392 = arith.addf %391, %390 : vector<1x16xf32>
    %393 = arith.divf %391, %392 : vector<1x16xf32>
    %394 = vector.extract_strided_slice %381 {offsets = [0, 32], sizes = [1, 16], strides = [1, 1]} : vector<1x64xf32> to vector<1x16xf32>
    %395 = math.tanh %394 : vector<1x16xf32>
    %396 = vector.extract_strided_slice %381 {offsets = [0, 48], sizes = [1, 16], strides = [1, 1]} : vector<1x64xf32> to vector<1x16xf32>
    %397 = arith.negf %396 : vector<1x16xf32>
    %398 = math.exp %397 : vector<1x16xf32>
    %cst_116 = arith.constant 1.000000e+00 : f32
    %399 = vector.broadcast %cst_116 : f32 to vector<1x16xf32>
    %400 = arith.addf %399, %398 : vector<1x16xf32>
    %401 = arith.divf %399, %400 : vector<1x16xf32>
    %402 = arith.mulf %393, %376 : vector<1x16xf32>
    %403 = arith.mulf %387, %395 : vector<1x16xf32>
    %404 = arith.addf %402, %403 : vector<1x16xf32>
    %405 = math.tanh %404 : vector<1x16xf32>
    %406 = arith.mulf %401, %405 : vector<1x16xf32>
    %407 = vector.extract_strided_slice %263 {offsets = [3, 0], sizes = [1, 64], strides = [1, 1]} : vector<9x64xf32> to vector<1x64xf32>
    %cst_117 = arith.constant dense<0.000000e+00> : vector<1x64xf32>
    %408 = tpu.matmul %406, %264, %cst_117 {dimension_numbers = #tpu.dot_dimension_numbers<[1], [0], [0], [1], [0, 0, 1, 1], [], []>} : vector<1x16xf32>, vector<16x64xf32>, vector<1x64xf32> -> vector<1x64xf32>
    %409 = arith.addf %407, %408 : vector<1x64xf32>
    %410 = vector.extract_strided_slice %409 {offsets = [0, 0], sizes = [1, 16], strides = [1, 1]} : vector<1x64xf32> to vector<1x16xf32>
    %411 = arith.negf %410 : vector<1x16xf32>
    %412 = math.exp %411 : vector<1x16xf32>
    %cst_118 = arith.constant 1.000000e+00 : f32
    %413 = vector.broadcast %cst_118 : f32 to vector<1x16xf32>
    %414 = arith.addf %413, %412 : vector<1x16xf32>
    %415 = arith.divf %413, %414 : vector<1x16xf32>
    %416 = vector.extract_strided_slice %409 {offsets = [0, 16], sizes = [1, 16], strides = [1, 1]} : vector<1x64xf32> to vector<1x16xf32>
    %417 = arith.negf %416 : vector<1x16xf32>
    %418 = math.exp %417 : vector<1x16xf32>
    %cst_119 = arith.constant 1.000000e+00 : f32
    %419 = vector.broadcast %cst_119 : f32 to vector<1x16xf32>
    %420 = arith.addf %419, %418 : vector<1x16xf32>
    %421 = arith.divf %419, %420 : vector<1x16xf32>
    %422 = vector.extract_strided_slice %409 {offsets = [0, 32], sizes = [1, 16], strides = [1, 1]} : vector<1x64xf32> to vector<1x16xf32>
    %423 = math.tanh %422 : vector<1x16xf32>
    %424 = vector.extract_strided_slice %409 {offsets = [0, 48], sizes = [1, 16], strides = [1, 1]} : vector<1x64xf32> to vector<1x16xf32>
    %425 = arith.negf %424 : vector<1x16xf32>
    %426 = math.exp %425 : vector<1x16xf32>
    %cst_120 = arith.constant 1.000000e+00 : f32
    %427 = vector.broadcast %cst_120 : f32 to vector<1x16xf32>
    %428 = arith.addf %427, %426 : vector<1x16xf32>
    %429 = arith.divf %427, %428 : vector<1x16xf32>
    %430 = arith.mulf %421, %404 : vector<1x16xf32>
    %431 = arith.mulf %415, %423 : vector<1x16xf32>
    %432 = arith.addf %430, %431 : vector<1x16xf32>
    %433 = math.tanh %432 : vector<1x16xf32>
    %434 = arith.mulf %429, %433 : vector<1x16xf32>
    %435 = vector.extract_strided_slice %263 {offsets = [2, 0], sizes = [1, 64], strides = [1, 1]} : vector<9x64xf32> to vector<1x64xf32>
    %cst_121 = arith.constant dense<0.000000e+00> : vector<1x64xf32>
    %436 = tpu.matmul %434, %264, %cst_121 {dimension_numbers = #tpu.dot_dimension_numbers<[1], [0], [0], [1], [0, 0, 1, 1], [], []>} : vector<1x16xf32>, vector<16x64xf32>, vector<1x64xf32> -> vector<1x64xf32>
    %437 = arith.addf %435, %436 : vector<1x64xf32>
    %438 = vector.extract_strided_slice %437 {offsets = [0, 0], sizes = [1, 16], strides = [1, 1]} : vector<1x64xf32> to vector<1x16xf32>
    %439 = arith.negf %438 : vector<1x16xf32>
    %440 = math.exp %439 : vector<1x16xf32>
    %cst_122 = arith.constant 1.000000e+00 : f32
    %441 = vector.broadcast %cst_122 : f32 to vector<1x16xf32>
    %442 = arith.addf %441, %440 : vector<1x16xf32>
    %443 = arith.divf %441, %442 : vector<1x16xf32>
    %444 = vector.extract_strided_slice %437 {offsets = [0, 16], sizes = [1, 16], strides = [1, 1]} : vector<1x64xf32> to vector<1x16xf32>
    %445 = arith.negf %444 : vector<1x16xf32>
    %446 = math.exp %445 : vector<1x16xf32>
    %cst_123 = arith.constant 1.000000e+00 : f32
    %447 = vector.broadcast %cst_123 : f32 to vector<1x16xf32>
    %448 = arith.addf %447, %446 : vector<1x16xf32>
    %449 = arith.divf %447, %448 : vector<1x16xf32>
    %450 = vector.extract_strided_slice %437 {offsets = [0, 32], sizes = [1, 16], strides = [1, 1]} : vector<1x64xf32> to vector<1x16xf32>
    %451 = math.tanh %450 : vector<1x16xf32>
    %452 = vector.extract_strided_slice %437 {offsets = [0, 48], sizes = [1, 16], strides = [1, 1]} : vector<1x64xf32> to vector<1x16xf32>
    %453 = arith.negf %452 : vector<1x16xf32>
    %454 = math.exp %453 : vector<1x16xf32>
    %cst_124 = arith.constant 1.000000e+00 : f32
    %455 = vector.broadcast %cst_124 : f32 to vector<1x16xf32>
    %456 = arith.addf %455, %454 : vector<1x16xf32>
    %457 = arith.divf %455, %456 : vector<1x16xf32>
    %458 = arith.mulf %449, %432 : vector<1x16xf32>
    %459 = arith.mulf %443, %451 : vector<1x16xf32>
    %460 = arith.addf %458, %459 : vector<1x16xf32>
    %461 = math.tanh %460 : vector<1x16xf32>
    %462 = arith.mulf %457, %461 : vector<1x16xf32>
    %463 = vector.extract_strided_slice %263 {offsets = [1, 0], sizes = [1, 64], strides = [1, 1]} : vector<9x64xf32> to vector<1x64xf32>
    %cst_125 = arith.constant dense<0.000000e+00> : vector<1x64xf32>
    %464 = tpu.matmul %462, %264, %cst_125 {dimension_numbers = #tpu.dot_dimension_numbers<[1], [0], [0], [1], [0, 0, 1, 1], [], []>} : vector<1x16xf32>, vector<16x64xf32>, vector<1x64xf32> -> vector<1x64xf32>
    %465 = arith.addf %463, %464 : vector<1x64xf32>
    %466 = vector.extract_strided_slice %465 {offsets = [0, 0], sizes = [1, 16], strides = [1, 1]} : vector<1x64xf32> to vector<1x16xf32>
    %467 = arith.negf %466 : vector<1x16xf32>
    %468 = math.exp %467 : vector<1x16xf32>
    %cst_126 = arith.constant 1.000000e+00 : f32
    %469 = vector.broadcast %cst_126 : f32 to vector<1x16xf32>
    %470 = arith.addf %469, %468 : vector<1x16xf32>
    %471 = arith.divf %469, %470 : vector<1x16xf32>
    %472 = vector.extract_strided_slice %465 {offsets = [0, 16], sizes = [1, 16], strides = [1, 1]} : vector<1x64xf32> to vector<1x16xf32>
    %473 = arith.negf %472 : vector<1x16xf32>
    %474 = math.exp %473 : vector<1x16xf32>
    %cst_127 = arith.constant 1.000000e+00 : f32
    %475 = vector.broadcast %cst_127 : f32 to vector<1x16xf32>
    %476 = arith.addf %475, %474 : vector<1x16xf32>
    %477 = arith.divf %475, %476 : vector<1x16xf32>
    %478 = vector.extract_strided_slice %465 {offsets = [0, 32], sizes = [1, 16], strides = [1, 1]} : vector<1x64xf32> to vector<1x16xf32>
    %479 = math.tanh %478 : vector<1x16xf32>
    %480 = vector.extract_strided_slice %465 {offsets = [0, 48], sizes = [1, 16], strides = [1, 1]} : vector<1x64xf32> to vector<1x16xf32>
    %481 = arith.negf %480 : vector<1x16xf32>
    %482 = math.exp %481 : vector<1x16xf32>
    %cst_128 = arith.constant 1.000000e+00 : f32
    %483 = vector.broadcast %cst_128 : f32 to vector<1x16xf32>
    %484 = arith.addf %483, %482 : vector<1x16xf32>
    %485 = arith.divf %483, %484 : vector<1x16xf32>
    %486 = arith.mulf %477, %460 : vector<1x16xf32>
    %487 = arith.mulf %471, %479 : vector<1x16xf32>
    %488 = arith.addf %486, %487 : vector<1x16xf32>
    %489 = math.tanh %488 : vector<1x16xf32>
    %490 = arith.mulf %485, %489 : vector<1x16xf32>
    %491 = vector.extract_strided_slice %263 {offsets = [0, 0], sizes = [1, 64], strides = [1, 1]} : vector<9x64xf32> to vector<1x64xf32>
    %cst_129 = arith.constant dense<0.000000e+00> : vector<1x64xf32>
    %492 = tpu.matmul %490, %264, %cst_129 {dimension_numbers = #tpu.dot_dimension_numbers<[1], [0], [0], [1], [0, 0, 1, 1], [], []>} : vector<1x16xf32>, vector<16x64xf32>, vector<1x64xf32> -> vector<1x64xf32>
    %493 = arith.addf %491, %492 : vector<1x64xf32>
    %494 = vector.extract_strided_slice %493 {offsets = [0, 0], sizes = [1, 16], strides = [1, 1]} : vector<1x64xf32> to vector<1x16xf32>
    %495 = arith.negf %494 : vector<1x16xf32>
    %496 = math.exp %495 : vector<1x16xf32>
    %cst_130 = arith.constant 1.000000e+00 : f32
    %497 = vector.broadcast %cst_130 : f32 to vector<1x16xf32>
    %498 = arith.addf %497, %496 : vector<1x16xf32>
    %499 = arith.divf %497, %498 : vector<1x16xf32>
    %500 = vector.extract_strided_slice %493 {offsets = [0, 16], sizes = [1, 16], strides = [1, 1]} : vector<1x64xf32> to vector<1x16xf32>
    %501 = arith.negf %500 : vector<1x16xf32>
    %502 = math.exp %501 : vector<1x16xf32>
    %cst_131 = arith.constant 1.000000e+00 : f32
    %503 = vector.broadcast %cst_131 : f32 to vector<1x16xf32>
    %504 = arith.addf %503, %502 : vector<1x16xf32>
    %505 = arith.divf %503, %504 : vector<1x16xf32>
    %506 = vector.extract_strided_slice %493 {offsets = [0, 32], sizes = [1, 16], strides = [1, 1]} : vector<1x64xf32> to vector<1x16xf32>
    %507 = math.tanh %506 : vector<1x16xf32>
    %508 = vector.extract_strided_slice %493 {offsets = [0, 48], sizes = [1, 16], strides = [1, 1]} : vector<1x64xf32> to vector<1x16xf32>
    %509 = arith.negf %508 : vector<1x16xf32>
    %510 = math.exp %509 : vector<1x16xf32>
    %cst_132 = arith.constant 1.000000e+00 : f32
    %511 = vector.broadcast %cst_132 : f32 to vector<1x16xf32>
    %512 = arith.addf %511, %510 : vector<1x16xf32>
    %513 = arith.divf %511, %512 : vector<1x16xf32>
    %514 = arith.mulf %505, %488 : vector<1x16xf32>
    %515 = arith.mulf %499, %507 : vector<1x16xf32>
    %516 = arith.addf %514, %515 : vector<1x16xf32>
    %517 = math.tanh %516 : vector<1x16xf32>
    %518 = arith.mulf %513, %517 : vector<1x16xf32>
    %c0_133 = arith.constant 0 : index
    %c0_134 = arith.constant 0 : index
    %c0_135 = arith.constant 0 : index
    %519 = vector.load %arg8[%c0_133, %c0_134, %c0_135] : memref<1x1x16xf32, #tpu.memory_space<vmem>>, vector<1x1x16xf32>
    %520 = vector.shape_cast %519 : vector<1x1x16xf32> to vector<1x16xf32>
    %521 = vector.shape_cast %518 : vector<1x16xf32> to vector<1x1x16xf32>
    tpu.vector_store %arg8[%c0_133, %c0_134, %c0_135], %521 {strides = array<i32>} : memref<1x1x16xf32, #tpu.memory_space<vmem>>, vector<1x1x16xf32>,
    %c0_136 = arith.constant 0 : index
    %c0_137 = arith.constant 0 : index
    %522 = vector.load %arg5[%c0_136, %c0_137] : memref<146x256xf32, #tpu.memory_space<vmem>>, vector<16x128xf32>
    %cst_138 = arith.constant dense<0.000000e+00> : vector<1x128xf32>
    %523 = tpu.matmul %518, %522, %cst_138 {dimension_numbers = #tpu.dot_dimension_numbers<[1], [0], [0], [1], [0, 0, 1, 1], [], []>} : vector<1x16xf32>, vector<16x128xf32>, vector<1x128xf32> -> vector<1x128xf32>
    %c16 = arith.constant 16 : index
    %c0_139 = arith.constant 0 : index
    %524 = vector.load %arg5[%c16, %c0_139] : memref<146x256xf32, #tpu.memory_space<vmem>>, vector<1x128xf32>
    %525 = arith.addf %523, %524 : vector<1x128xf32>
    %cst_140 = arith.constant 5.000000e-01 : f32
    %526 = vector.broadcast %cst_140 : f32 to vector<1x128xf32>
    %527 = arith.mulf %526, %525 : vector<1x128xf32>
    %cst_141 = arith.constant 4.471500e-02 : f32
    %528 = vector.broadcast %cst_141 : f32 to vector<1x128xf32>
    %529 = arith.mulf %528, %525 : vector<1x128xf32>
    %530 = arith.mulf %529, %525 : vector<1x128xf32>
    %531 = arith.mulf %530, %525 : vector<1x128xf32>
    %532 = arith.addf %525, %531 : vector<1x128xf32>
    %cst_142 = arith.constant 0.797884583 : f32
    %533 = vector.broadcast %cst_142 : f32 to vector<1x128xf32>
    %534 = arith.mulf %533, %532 : vector<1x128xf32>
    %535 = math.tanh %534 : vector<1x128xf32>
    %cst_143 = arith.constant 1.000000e+00 : f32
    %536 = vector.broadcast %cst_143 : f32 to vector<1x128xf32>
    %537 = arith.addf %536, %535 : vector<1x128xf32>
    %538 = arith.mulf %527, %537 : vector<1x128xf32>
    %c17 = arith.constant 17 : index
    %c0_144 = arith.constant 0 : index
    %539 = vector.load %arg5[%c17, %c0_144] : memref<146x256xf32, #tpu.memory_space<vmem>>, vector<128x256xf32>
    %cst_145 = arith.constant dense<0.000000e+00> : vector<1x256xf32>
    %540 = tpu.matmul %538, %539, %cst_145 {dimension_numbers = #tpu.dot_dimension_numbers<[1], [0], [0], [1], [0, 0, 1, 1], [], []>} : vector<1x128xf32>, vector<128x256xf32>, vector<1x256xf32> -> vector<1x256xf32>
    %c145 = arith.constant 145 : index
    %c0_146 = arith.constant 0 : index
    %541 = vector.load %arg5[%c145, %c0_146] : memref<146x256xf32, #tpu.memory_space<vmem>>, vector<1x256xf32>
    %542 = arith.addf %540, %541 : vector<1x256xf32>
    %cst_147 = arith.constant 0.000000e+00 : f32
    %543 = vector.broadcast %cst_147 : f32 to vector<1x256xf32>
    %544 = arith.cmpf ogt, %542, %543 : vector<1x256xf32>
    %cst_148 = arith.constant 0.000000e+00 : f32
    %545 = vector.broadcast %cst_148 : f32 to vector<1x256xf32>
    %546 = arith.minimumf %542, %545 : vector<1x256xf32>
    %547 = math.exp %546 : vector<1x256xf32>
    %cst_149 = arith.constant 1.000000e+00 : f32
    %548 = vector.broadcast %cst_149 : f32 to vector<1x256xf32>
    %549 = arith.subf %547, %548 : vector<1x256xf32>
    %550 = arith.select %544, %542, %549 : vector<1x256xi1>, vector<1x256xf32>
    %551 = vector.extract_strided_slice %550 {offsets = [0, 0], sizes = [1, 32], strides = [1, 1]} : vector<1x256xf32> to vector<1x32xf32>
    %552 = vector.extract_strided_slice %550 {offsets = [0, 32], sizes = [1, 32], strides = [1, 1]} : vector<1x256xf32> to vector<1x32xf32>
    %553 = vector.extract_strided_slice %550 {offsets = [0, 64], sizes = [1, 32], strides = [1, 1]} : vector<1x256xf32> to vector<1x32xf32>
    %554 = vector.extract_strided_slice %550 {offsets = [0, 96], sizes = [1, 32], strides = [1, 1]} : vector<1x256xf32> to vector<1x32xf32>
    %555 = vector.extract_strided_slice %550 {offsets = [0, 128], sizes = [1, 32], strides = [1, 1]} : vector<1x256xf32> to vector<1x32xf32>
    %556 = vector.extract_strided_slice %550 {offsets = [0, 160], sizes = [1, 32], strides = [1, 1]} : vector<1x256xf32> to vector<1x32xf32>
    %557 = vector.extract_strided_slice %550 {offsets = [0, 192], sizes = [1, 32], strides = [1, 1]} : vector<1x256xf32> to vector<1x32xf32>
    %558 = vector.extract_strided_slice %550 {offsets = [0, 224], sizes = [1, 32], strides = [1, 1]} : vector<1x256xf32> to vector<1x32xf32>
    %559 = tpu.concatenate %551, %552, %553, %554, %555, %556, %557, %558 in 0 : vector<1x32xf32>, vector<1x32xf32>, vector<1x32xf32>, vector<1x32xf32>, vector<1x32xf32>, vector<1x32xf32>, vector<1x32xf32>, vector<1x32xf32> -> vector<8x32xf32>
    %c0_150 = arith.constant 0 : index
    %c0_151 = arith.constant 0 : index
    %560 = vector.load %arg6[%c0_150, %c0_151] : memref<110x32xf32, #tpu.memory_space<vmem>>, vector<32x32xf32>
    %cst_152 = arith.constant dense<0.000000e+00> : vector<8x32xf32>
    %561 = tpu.matmul %559, %560, %cst_152 {dimension_numbers = #tpu.dot_dimension_numbers<[1], [0], [0], [1], [0, 0, 1, 1], [], []>} : vector<8x32xf32>, vector<32x32xf32>, vector<8x32xf32> -> vector<8x32xf32>
    %c32 = arith.constant 32 : index
    %c0_153 = arith.constant 0 : index
    %562 = vector.load %arg6[%c32, %c0_153] : memref<110x32xf32, #tpu.memory_space<vmem>>, vector<1x32xf32>
    %563 = vector.broadcast %562 : vector<1x32xf32> to vector<8x32xf32>
    %564 = arith.addf %561, %563 : vector<8x32xf32>
    %c33 = arith.constant 33 : index
    %c0_154 = arith.constant 0 : index
    %565 = vector.load %arg6[%c33, %c0_154] : memref<110x32xf32, #tpu.memory_space<vmem>>, vector<32x32xf32>
    %cst_155 = arith.constant dense<0.000000e+00> : vector<1x32xf32>
    %566 = tpu.matmul %258, %565, %cst_155 {dimension_numbers = #tpu.dot_dimension_numbers<[1], [0], [0], [1], [0, 0, 1, 1], [], []>} : vector<1x32xf32>, vector<32x32xf32>, vector<1x32xf32> -> vector<1x32xf32>
    %c65 = arith.constant 65 : index
    %c0_156 = arith.constant 0 : index
    %567 = vector.load %arg6[%c65, %c0_156] : memref<110x32xf32, #tpu.memory_space<vmem>>, vector<1x32xf32>
    %568 = arith.addf %566, %567 : vector<1x32xf32>
    %569 = tpu.concatenate %568, %564 in 0 : vector<1x32xf32>, vector<8x32xf32> -> vector<9x32xf32>
    %c66 = arith.constant 66 : index
    %c0_157 = arith.constant 0 : index
    %570 = vector.load %arg6[%c66, %c0_157] : memref<110x32xf32, #tpu.memory_space<vmem>>, vector<9x32xf32>
    %571 = arith.addf %569, %570 : vector<9x32xf32>
    %c0_158 = arith.constant 0 : index
    %c0_159 = arith.constant 0 : index
    %c768_160 = arith.constant 768 : index
    %572 = vector.load %arg3[%c0_158, %c0_159, %c768_160] : memref<2x32x896xf32, #tpu.memory_space<vmem>>, vector<1x8x128xf32>
    %573 = vector.shape_cast %572 : vector<1x8x128xf32> to vector<8x128xf32>
    %574 = vector.extract_strided_slice %573 {offsets = [0, 0], sizes = [1, 32], strides = [1, 1]} : vector<8x128xf32> to vector<1x32xf32>
    %575 = vector.extract_strided_slice %573 {offsets = [1, 0], sizes = [1, 32], strides = [1, 1]} : vector<8x128xf32> to vector<1x32xf32>
    %cst_161 = arith.constant dense<0.000000e+00> : vector<9xf32>
    %576 = vector.multi_reduction <add>, %571, %cst_161 [1] : vector<9x32xf32> to vector<9xf32>
    %577 = vector.shape_cast %576 : vector<9xf32> to vector<9x1xf32>
    %cst_162 = arith.constant 3.200000e+01 : f32
    %578 = vector.broadcast %cst_162 : f32 to vector<9x1xf32>
    %579 = arith.divf %577, %578 : vector<9x1xf32>
    %580 = vector.broadcast %579 : vector<9x1xf32> to vector<9x32xf32>
    %581 = arith.subf %571, %580 : vector<9x32xf32>
    %582 = arith.mulf %581, %581 : vector<9x32xf32>
    %cst_163 = arith.constant dense<0.000000e+00> : vector<9xf32>
    %583 = vector.multi_reduction <add>, %582, %cst_163 [1] : vector<9x32xf32> to vector<9xf32>
    %584 = vector.shape_cast %583 : vector<9xf32> to vector<9x1xf32>
    %cst_164 = arith.constant 3.200000e+01 : f32
    %585 = vector.broadcast %cst_164 : f32 to vector<9x1xf32>
    %586 = arith.divf %584, %585 : vector<9x1xf32>
    %cst_165 = arith.constant 9.99999974E-6 : f32
    %587 = vector.broadcast %cst_165 : f32 to vector<9x1xf32>
    %588 = arith.addf %586, %587 : vector<9x1xf32>
    %589 = math.rsqrt %588 : vector<9x1xf32>
    %590 = vector.broadcast %589 : vector<9x1xf32> to vector<9x32xf32>
    %591 = arith.mulf %581, %590 : vector<9x32xf32>
    %592 = vector.broadcast %574 : vector<1x32xf32> to vector<9x32xf32>
    %593 = arith.mulf %591, %592 : vector<9x32xf32>
    %594 = vector.broadcast %575 : vector<1x32xf32> to vector<9x32xf32>
    %595 = arith.addf %593, %594 : vector<9x32xf32>
    %c0_166 = arith.constant 0 : index
    %c0_167 = arith.constant 0 : index
    %c0_168 = arith.constant 0 : index
    %596 = vector.load %arg3[%c0_166, %c0_167, %c0_168] : memref<2x32x896xf32, #tpu.memory_space<vmem>>, vector<1x32x384xf32>
    %597 = vector.shape_cast %596 : vector<1x32x384xf32> to vector<32x384xf32>
    %cst_169 = arith.constant dense<0.000000e+00> : vector<9x384xf32>
    %598 = tpu.matmul %595, %597, %cst_169 {dimension_numbers = #tpu.dot_dimension_numbers<[1], [0], [0], [1], [0, 0, 1, 1], [], []>} : vector<9x32xf32>, vector<32x384xf32>, vector<9x384xf32> -> vector<9x384xf32>
    %599 = vector.extract_strided_slice %598 {offsets = [0, 0], sizes = [9, 64], strides = [1, 1]} : vector<9x384xf32> to vector<9x64xf32>
    %600 = vector.extract_strided_slice %598 {offsets = [0, 128], sizes = [9, 64], strides = [1, 1]} : vector<9x384xf32> to vector<9x64xf32>
    %601 = vector.extract_strided_slice %598 {offsets = [0, 256], sizes = [9, 64], strides = [1, 1]} : vector<9x384xf32> to vector<9x64xf32>
    %cst_170 = arith.constant dense<0.000000e+00> : vector<9x9xf32>
    %602 = tpu.matmul %599, %600, %cst_170 {dimension_numbers = #tpu.dot_dimension_numbers<[1], [1], [0], [0], [0, 0, 1, 0], [], []>} : vector<9x64xf32>, vector<9x64xf32>, vector<9x9xf32> -> vector<9x9xf32>
    %cst_171 = arith.constant 1.250000e-01 : f32
    %603 = vector.broadcast %cst_171 : f32 to vector<9x9xf32>
    %604 = arith.mulf %602, %603 : vector<9x9xf32>
    %cst_172 = arith.constant dense<0xFF800000> : vector<9xf32>
    %605 = vector.multi_reduction <maximumf>, %604, %cst_172 [1] : vector<9x9xf32> to vector<9xf32>
    %606 = vector.shape_cast %605 : vector<9xf32> to vector<9x1xf32>
    %607 = vector.broadcast %606 : vector<9x1xf32> to vector<9x9xf32>
    %608 = arith.subf %604, %607 : vector<9x9xf32>
    %609 = math.exp %608 : vector<9x9xf32>
    %cst_173 = arith.constant dense<0.000000e+00> : vector<9xf32>
    %610 = vector.multi_reduction <add>, %609, %cst_173 [1] : vector<9x9xf32> to vector<9xf32>
    %611 = vector.shape_cast %610 : vector<9xf32> to vector<9x1xf32>
    %612 = tpu.reciprocal %611 {approx = true} : vector<9x1xf32> -> vector<9x1xf32>
    %613 = vector.broadcast %612 : vector<9x1xf32> to vector<9x9xf32>
    %614 = arith.mulf %609, %613 : vector<9x9xf32>
    %cst_174 = arith.constant dense<0.000000e+00> : vector<9x64xf32>
    %615 = tpu.matmul %614, %601, %cst_174 {dimension_numbers = #tpu.dot_dimension_numbers<[1], [0], [0], [1], [0, 0, 1, 1], [], []>} : vector<9x9xf32>, vector<9x64xf32>, vector<9x64xf32> -> vector<9x64xf32>
    %616 = vector.extract_strided_slice %598 {offsets = [0, 64], sizes = [9, 64], strides = [1, 1]} : vector<9x384xf32> to vector<9x64xf32>
    %617 = vector.extract_strided_slice %598 {offsets = [0, 192], sizes = [9, 64], strides = [1, 1]} : vector<9x384xf32> to vector<9x64xf32>
    %618 = vector.extract_strided_slice %598 {offsets = [0, 320], sizes = [9, 64], strides = [1, 1]} : vector<9x384xf32> to vector<9x64xf32>
    %cst_175 = arith.constant dense<0.000000e+00> : vector<9x9xf32>
    %619 = tpu.matmul %616, %617, %cst_175 {dimension_numbers = #tpu.dot_dimension_numbers<[1], [1], [0], [0], [0, 0, 1, 0], [], []>} : vector<9x64xf32>, vector<9x64xf32>, vector<9x9xf32> -> vector<9x9xf32>
    %cst_176 = arith.constant 1.250000e-01 : f32
    %620 = vector.broadcast %cst_176 : f32 to vector<9x9xf32>
    %621 = arith.mulf %619, %620 : vector<9x9xf32>
    %cst_177 = arith.constant dense<0xFF800000> : vector<9xf32>
    %622 = vector.multi_reduction <maximumf>, %621, %cst_177 [1] : vector<9x9xf32> to vector<9xf32>
    %623 = vector.shape_cast %622 : vector<9xf32> to vector<9x1xf32>
    %624 = vector.broadcast %623 : vector<9x1xf32> to vector<9x9xf32>
    %625 = arith.subf %621, %624 : vector<9x9xf32>
    %626 = math.exp %625 : vector<9x9xf32>
    %cst_178 = arith.constant dense<0.000000e+00> : vector<9xf32>
    %627 = vector.multi_reduction <add>, %626, %cst_178 [1] : vector<9x9xf32> to vector<9xf32>
    %628 = vector.shape_cast %627 : vector<9xf32> to vector<9x1xf32>
    %629 = tpu.reciprocal %628 {approx = true} : vector<9x1xf32> -> vector<9x1xf32>
    %630 = vector.broadcast %629 : vector<9x1xf32> to vector<9x9xf32>
    %631 = arith.mulf %626, %630 : vector<9x9xf32>
    %cst_179 = arith.constant dense<0.000000e+00> : vector<9x64xf32>
    %632 = tpu.matmul %631, %618, %cst_179 {dimension_numbers = #tpu.dot_dimension_numbers<[1], [0], [0], [1], [0, 0, 1, 1], [], []>} : vector<9x9xf32>, vector<9x64xf32>, vector<9x64xf32> -> vector<9x64xf32>
    %633 = tpu.concatenate %615, %632 in 1 : vector<9x64xf32>, vector<9x64xf32> -> vector<9x128xf32>
    %c0_180 = arith.constant 0 : index
    %c0_181 = arith.constant 0 : index
    %c384_182 = arith.constant 384 : index
    %634 = vector.load %arg3[%c0_180, %c0_181, %c384_182] : memref<2x32x896xf32, #tpu.memory_space<vmem>>, vector<1x32x128xf32>
    %635 = vector.shape_cast %634 : vector<1x32x128xf32> to vector<32x128xf32>
    %cst_183 = arith.constant dense<0.000000e+00> : vector<9x32xf32>
    %636 = tpu.matmul %633, %635, %cst_183 {dimension_numbers = #tpu.dot_dimension_numbers<[1], [1], [0], [0], [0, 0, 1, 0], [], []>} : vector<9x128xf32>, vector<32x128xf32>, vector<9x32xf32> -> vector<9x32xf32>
    %637 = arith.addf %571, %636 : vector<9x32xf32>
    %638 = vector.extract_strided_slice %573 {offsets = [2, 0], sizes = [1, 32], strides = [1, 1]} : vector<8x128xf32> to vector<1x32xf32>
    %639 = vector.broadcast %638 : vector<1x32xf32> to vector<9x32xf32>
    %640 = arith.addf %637, %639 : vector<9x32xf32>
    %641 = vector.extract_strided_slice %573 {offsets = [3, 0], sizes = [1, 32], strides = [1, 1]} : vector<8x128xf32> to vector<1x32xf32>
    %642 = vector.extract_strided_slice %573 {offsets = [4, 0], sizes = [1, 32], strides = [1, 1]} : vector<8x128xf32> to vector<1x32xf32>
    %cst_184 = arith.constant dense<0.000000e+00> : vector<9xf32>
    %643 = vector.multi_reduction <add>, %640, %cst_184 [1] : vector<9x32xf32> to vector<9xf32>
    %644 = vector.shape_cast %643 : vector<9xf32> to vector<9x1xf32>
    %cst_185 = arith.constant 3.200000e+01 : f32
    %645 = vector.broadcast %cst_185 : f32 to vector<9x1xf32>
    %646 = arith.divf %644, %645 : vector<9x1xf32>
    %647 = vector.broadcast %646 : vector<9x1xf32> to vector<9x32xf32>
    %648 = arith.subf %640, %647 : vector<9x32xf32>
    %649 = arith.mulf %648, %648 : vector<9x32xf32>
    %cst_186 = arith.constant dense<0.000000e+00> : vector<9xf32>
    %650 = vector.multi_reduction <add>, %649, %cst_186 [1] : vector<9x32xf32> to vector<9xf32>
    %651 = vector.shape_cast %650 : vector<9xf32> to vector<9x1xf32>
    %cst_187 = arith.constant 3.200000e+01 : f32
    %652 = vector.broadcast %cst_187 : f32 to vector<9x1xf32>
    %653 = arith.divf %651, %652 : vector<9x1xf32>
    %cst_188 = arith.constant 9.99999974E-6 : f32
    %654 = vector.broadcast %cst_188 : f32 to vector<9x1xf32>
    %655 = arith.addf %653, %654 : vector<9x1xf32>
    %656 = math.rsqrt %655 : vector<9x1xf32>
    %657 = vector.broadcast %656 : vector<9x1xf32> to vector<9x32xf32>
    %658 = arith.mulf %648, %657 : vector<9x32xf32>
    %659 = vector.broadcast %641 : vector<1x32xf32> to vector<9x32xf32>
    %660 = arith.mulf %658, %659 : vector<9x32xf32>
    %661 = vector.broadcast %642 : vector<1x32xf32> to vector<9x32xf32>
    %662 = arith.addf %660, %661 : vector<9x32xf32>
    %c0_189 = arith.constant 0 : index
    %c0_190 = arith.constant 0 : index
    %c512_191 = arith.constant 512 : index
    %663 = vector.load %arg3[%c0_189, %c0_190, %c512_191] : memref<2x32x896xf32, #tpu.memory_space<vmem>>, vector<1x32x128xf32>
    %664 = vector.shape_cast %663 : vector<1x32x128xf32> to vector<32x128xf32>
    %cst_192 = arith.constant dense<0.000000e+00> : vector<9x128xf32>
    %665 = tpu.matmul %662, %664, %cst_192 {dimension_numbers = #tpu.dot_dimension_numbers<[1], [0], [0], [1], [0, 0, 1, 1], [], []>} : vector<9x32xf32>, vector<32x128xf32>, vector<9x128xf32> -> vector<9x128xf32>
    %666 = vector.extract_strided_slice %573 {offsets = [6, 0], sizes = [1, 128], strides = [1, 1]} : vector<8x128xf32> to vector<1x128xf32>
    %667 = vector.broadcast %666 : vector<1x128xf32> to vector<9x128xf32>
    %668 = arith.addf %665, %667 : vector<9x128xf32>
    %cst_193 = arith.constant 5.000000e-01 : f32
    %669 = vector.broadcast %cst_193 : f32 to vector<9x128xf32>
    %670 = arith.mulf %669, %668 : vector<9x128xf32>
    %cst_194 = arith.constant 4.471500e-02 : f32
    %671 = vector.broadcast %cst_194 : f32 to vector<9x128xf32>
    %672 = arith.mulf %671, %668 : vector<9x128xf32>
    %673 = arith.mulf %672, %668 : vector<9x128xf32>
    %674 = arith.mulf %673, %668 : vector<9x128xf32>
    %675 = arith.addf %668, %674 : vector<9x128xf32>
    %cst_195 = arith.constant 0.797884583 : f32
    %676 = vector.broadcast %cst_195 : f32 to vector<9x128xf32>
    %677 = arith.mulf %676, %675 : vector<9x128xf32>
    %678 = math.tanh %677 : vector<9x128xf32>
    %cst_196 = arith.constant 1.000000e+00 : f32
    %679 = vector.broadcast %cst_196 : f32 to vector<9x128xf32>
    %680 = arith.addf %679, %678 : vector<9x128xf32>
    %681 = arith.mulf %670, %680 : vector<9x128xf32>
    %c0_197 = arith.constant 0 : index
    %c0_198 = arith.constant 0 : index
    %c640_199 = arith.constant 640 : index
    %682 = vector.load %arg3[%c0_197, %c0_198, %c640_199] : memref<2x32x896xf32, #tpu.memory_space<vmem>>, vector<1x32x128xf32>
    %683 = vector.shape_cast %682 : vector<1x32x128xf32> to vector<32x128xf32>
    %cst_200 = arith.constant dense<0.000000e+00> : vector<9x32xf32>
    %684 = tpu.matmul %681, %683, %cst_200 {dimension_numbers = #tpu.dot_dimension_numbers<[1], [1], [0], [0], [0, 0, 1, 0], [], []>} : vector<9x128xf32>, vector<32x128xf32>, vector<9x32xf32> -> vector<9x32xf32>
    %685 = vector.extract_strided_slice %573 {offsets = [5, 0], sizes = [1, 32], strides = [1, 1]} : vector<8x128xf32> to vector<1x32xf32>
    %686 = vector.broadcast %685 : vector<1x32xf32> to vector<9x32xf32>
    %687 = arith.addf %684, %686 : vector<9x32xf32>
    %688 = arith.addf %640, %687 : vector<9x32xf32>
    %c1_201 = arith.constant 1 : index
    %c0_202 = arith.constant 0 : index
    %c768_203 = arith.constant 768 : index
    %689 = vector.load %arg3[%c1_201, %c0_202, %c768_203] : memref<2x32x896xf32, #tpu.memory_space<vmem>>, vector<1x8x128xf32>
    %690 = vector.shape_cast %689 : vector<1x8x128xf32> to vector<8x128xf32>
    %691 = vector.extract_strided_slice %690 {offsets = [0, 0], sizes = [1, 32], strides = [1, 1]} : vector<8x128xf32> to vector<1x32xf32>
    %692 = vector.extract_strided_slice %690 {offsets = [1, 0], sizes = [1, 32], strides = [1, 1]} : vector<8x128xf32> to vector<1x32xf32>
    %cst_204 = arith.constant dense<0.000000e+00> : vector<9xf32>
    %693 = vector.multi_reduction <add>, %688, %cst_204 [1] : vector<9x32xf32> to vector<9xf32>
    %694 = vector.shape_cast %693 : vector<9xf32> to vector<9x1xf32>
    %cst_205 = arith.constant 3.200000e+01 : f32
    %695 = vector.broadcast %cst_205 : f32 to vector<9x1xf32>
    %696 = arith.divf %694, %695 : vector<9x1xf32>
    %697 = vector.broadcast %696 : vector<9x1xf32> to vector<9x32xf32>
    %698 = arith.subf %688, %697 : vector<9x32xf32>
    %699 = arith.mulf %698, %698 : vector<9x32xf32>
    %cst_206 = arith.constant dense<0.000000e+00> : vector<9xf32>
    %700 = vector.multi_reduction <add>, %699, %cst_206 [1] : vector<9x32xf32> to vector<9xf32>
    %701 = vector.shape_cast %700 : vector<9xf32> to vector<9x1xf32>
    %cst_207 = arith.constant 3.200000e+01 : f32
    %702 = vector.broadcast %cst_207 : f32 to vector<9x1xf32>
    %703 = arith.divf %701, %702 : vector<9x1xf32>
    %cst_208 = arith.constant 9.99999974E-6 : f32
    %704 = vector.broadcast %cst_208 : f32 to vector<9x1xf32>
    %705 = arith.addf %703, %704 : vector<9x1xf32>
    %706 = math.rsqrt %705 : vector<9x1xf32>
    %707 = vector.broadcast %706 : vector<9x1xf32> to vector<9x32xf32>
    %708 = arith.mulf %698, %707 : vector<9x32xf32>
    %709 = vector.broadcast %691 : vector<1x32xf32> to vector<9x32xf32>
    %710 = arith.mulf %708, %709 : vector<9x32xf32>
    %711 = vector.broadcast %692 : vector<1x32xf32> to vector<9x32xf32>
    %712 = arith.addf %710, %711 : vector<9x32xf32>
    %c1_209 = arith.constant 1 : index
    %c0_210 = arith.constant 0 : index
    %c0_211 = arith.constant 0 : index
    %713 = vector.load %arg3[%c1_209, %c0_210, %c0_211] : memref<2x32x896xf32, #tpu.memory_space<vmem>>, vector<1x32x384xf32>
    %714 = vector.shape_cast %713 : vector<1x32x384xf32> to vector<32x384xf32>
    %cst_212 = arith.constant dense<0.000000e+00> : vector<9x384xf32>
    %715 = tpu.matmul %712, %714, %cst_212 {dimension_numbers = #tpu.dot_dimension_numbers<[1], [0], [0], [1], [0, 0, 1, 1], [], []>} : vector<9x32xf32>, vector<32x384xf32>, vector<9x384xf32> -> vector<9x384xf32>
    %716 = vector.extract_strided_slice %715 {offsets = [0, 0], sizes = [9, 64], strides = [1, 1]} : vector<9x384xf32> to vector<9x64xf32>
    %717 = vector.extract_strided_slice %715 {offsets = [0, 128], sizes = [9, 64], strides = [1, 1]} : vector<9x384xf32> to vector<9x64xf32>
    %718 = vector.extract_strided_slice %715 {offsets = [0, 256], sizes = [9, 64], strides = [1, 1]} : vector<9x384xf32> to vector<9x64xf32>
    %cst_213 = arith.constant dense<0.000000e+00> : vector<9x9xf32>
    %719 = tpu.matmul %716, %717, %cst_213 {dimension_numbers = #tpu.dot_dimension_numbers<[1], [1], [0], [0], [0, 0, 1, 0], [], []>} : vector<9x64xf32>, vector<9x64xf32>, vector<9x9xf32> -> vector<9x9xf32>
    %cst_214 = arith.constant 1.250000e-01 : f32
    %720 = vector.broadcast %cst_214 : f32 to vector<9x9xf32>
    %721 = arith.mulf %719, %720 : vector<9x9xf32>
    %cst_215 = arith.constant dense<0xFF800000> : vector<9xf32>
    %722 = vector.multi_reduction <maximumf>, %721, %cst_215 [1] : vector<9x9xf32> to vector<9xf32>
    %723 = vector.shape_cast %722 : vector<9xf32> to vector<9x1xf32>
    %724 = vector.broadcast %723 : vector<9x1xf32> to vector<9x9xf32>
    %725 = arith.subf %721, %724 : vector<9x9xf32>
    %726 = math.exp %725 : vector<9x9xf32>
    %cst_216 = arith.constant dense<0.000000e+00> : vector<9xf32>
    %727 = vector.multi_reduction <add>, %726, %cst_216 [1] : vector<9x9xf32> to vector<9xf32>
    %728 = vector.shape_cast %727 : vector<9xf32> to vector<9x1xf32>
    %729 = tpu.reciprocal %728 {approx = true} : vector<9x1xf32> -> vector<9x1xf32>
    %730 = vector.broadcast %729 : vector<9x1xf32> to vector<9x9xf32>
    %731 = arith.mulf %726, %730 : vector<9x9xf32>
    %cst_217 = arith.constant dense<0.000000e+00> : vector<9x64xf32>
    %732 = tpu.matmul %731, %718, %cst_217 {dimension_numbers = #tpu.dot_dimension_numbers<[1], [0], [0], [1], [0, 0, 1, 1], [], []>} : vector<9x9xf32>, vector<9x64xf32>, vector<9x64xf32> -> vector<9x64xf32>
    %733 = vector.extract_strided_slice %715 {offsets = [0, 64], sizes = [9, 64], strides = [1, 1]} : vector<9x384xf32> to vector<9x64xf32>
    %734 = vector.extract_strided_slice %715 {offsets = [0, 192], sizes = [9, 64], strides = [1, 1]} : vector<9x384xf32> to vector<9x64xf32>
    %735 = vector.extract_strided_slice %715 {offsets = [0, 320], sizes = [9, 64], strides = [1, 1]} : vector<9x384xf32> to vector<9x64xf32>
    %cst_218 = arith.constant dense<0.000000e+00> : vector<9x9xf32>
    %736 = tpu.matmul %733, %734, %cst_218 {dimension_numbers = #tpu.dot_dimension_numbers<[1], [1], [0], [0], [0, 0, 1, 0], [], []>} : vector<9x64xf32>, vector<9x64xf32>, vector<9x9xf32> -> vector<9x9xf32>
    %cst_219 = arith.constant 1.250000e-01 : f32
    %737 = vector.broadcast %cst_219 : f32 to vector<9x9xf32>
    %738 = arith.mulf %736, %737 : vector<9x9xf32>
    %cst_220 = arith.constant dense<0xFF800000> : vector<9xf32>
    %739 = vector.multi_reduction <maximumf>, %738, %cst_220 [1] : vector<9x9xf32> to vector<9xf32>
    %740 = vector.shape_cast %739 : vector<9xf32> to vector<9x1xf32>
    %741 = vector.broadcast %740 : vector<9x1xf32> to vector<9x9xf32>
    %742 = arith.subf %738, %741 : vector<9x9xf32>
    %743 = math.exp %742 : vector<9x9xf32>
    %cst_221 = arith.constant dense<0.000000e+00> : vector<9xf32>
    %744 = vector.multi_reduction <add>, %743, %cst_221 [1] : vector<9x9xf32> to vector<9xf32>
    %745 = vector.shape_cast %744 : vector<9xf32> to vector<9x1xf32>
    %746 = tpu.reciprocal %745 {approx = true} : vector<9x1xf32> -> vector<9x1xf32>
    %747 = vector.broadcast %746 : vector<9x1xf32> to vector<9x9xf32>
    %748 = arith.mulf %743, %747 : vector<9x9xf32>
    %cst_222 = arith.constant dense<0.000000e+00> : vector<9x64xf32>
    %749 = tpu.matmul %748, %735, %cst_222 {dimension_numbers = #tpu.dot_dimension_numbers<[1], [0], [0], [1], [0, 0, 1, 1], [], []>} : vector<9x9xf32>, vector<9x64xf32>, vector<9x64xf32> -> vector<9x64xf32>
    %750 = tpu.concatenate %732, %749 in 1 : vector<9x64xf32>, vector<9x64xf32> -> vector<9x128xf32>
    %c1_223 = arith.constant 1 : index
    %c0_224 = arith.constant 0 : index
    %c384_225 = arith.constant 384 : index
    %751 = vector.load %arg3[%c1_223, %c0_224, %c384_225] : memref<2x32x896xf32, #tpu.memory_space<vmem>>, vector<1x32x128xf32>
    %752 = vector.shape_cast %751 : vector<1x32x128xf32> to vector<32x128xf32>
    %cst_226 = arith.constant dense<0.000000e+00> : vector<9x32xf32>
    %753 = tpu.matmul %750, %752, %cst_226 {dimension_numbers = #tpu.dot_dimension_numbers<[1], [1], [0], [0], [0, 0, 1, 0], [], []>} : vector<9x128xf32>, vector<32x128xf32>, vector<9x32xf32> -> vector<9x32xf32>
    %754 = arith.addf %688, %753 : vector<9x32xf32>
    %755 = vector.extract_strided_slice %690 {offsets = [2, 0], sizes = [1, 32], strides = [1, 1]} : vector<8x128xf32> to vector<1x32xf32>
    %756 = vector.broadcast %755 : vector<1x32xf32> to vector<9x32xf32>
    %757 = arith.addf %754, %756 : vector<9x32xf32>
    %758 = vector.extract_strided_slice %690 {offsets = [3, 0], sizes = [1, 32], strides = [1, 1]} : vector<8x128xf32> to vector<1x32xf32>
    %759 = vector.extract_strided_slice %690 {offsets = [4, 0], sizes = [1, 32], strides = [1, 1]} : vector<8x128xf32> to vector<1x32xf32>
    %cst_227 = arith.constant dense<0.000000e+00> : vector<9xf32>
    %760 = vector.multi_reduction <add>, %757, %cst_227 [1] : vector<9x32xf32> to vector<9xf32>
    %761 = vector.shape_cast %760 : vector<9xf32> to vector<9x1xf32>
    %cst_228 = arith.constant 3.200000e+01 : f32
    %762 = vector.broadcast %cst_228 : f32 to vector<9x1xf32>
    %763 = arith.divf %761, %762 : vector<9x1xf32>
    %764 = vector.broadcast %763 : vector<9x1xf32> to vector<9x32xf32>
    %765 = arith.subf %757, %764 : vector<9x32xf32>
    %766 = arith.mulf %765, %765 : vector<9x32xf32>
    %cst_229 = arith.constant dense<0.000000e+00> : vector<9xf32>
    %767 = vector.multi_reduction <add>, %766, %cst_229 [1] : vector<9x32xf32> to vector<9xf32>
    %768 = vector.shape_cast %767 : vector<9xf32> to vector<9x1xf32>
    %cst_230 = arith.constant 3.200000e+01 : f32
    %769 = vector.broadcast %cst_230 : f32 to vector<9x1xf32>
    %770 = arith.divf %768, %769 : vector<9x1xf32>
    %cst_231 = arith.constant 9.99999974E-6 : f32
    %771 = vector.broadcast %cst_231 : f32 to vector<9x1xf32>
    %772 = arith.addf %770, %771 : vector<9x1xf32>
    %773 = math.rsqrt %772 : vector<9x1xf32>
    %774 = vector.broadcast %773 : vector<9x1xf32> to vector<9x32xf32>
    %775 = arith.mulf %765, %774 : vector<9x32xf32>
    %776 = vector.broadcast %758 : vector<1x32xf32> to vector<9x32xf32>
    %777 = arith.mulf %775, %776 : vector<9x32xf32>
    %778 = vector.broadcast %759 : vector<1x32xf32> to vector<9x32xf32>
    %779 = arith.addf %777, %778 : vector<9x32xf32>
    %c1_232 = arith.constant 1 : index
    %c0_233 = arith.constant 0 : index
    %c512_234 = arith.constant 512 : index
    %780 = vector.load %arg3[%c1_232, %c0_233, %c512_234] : memref<2x32x896xf32, #tpu.memory_space<vmem>>, vector<1x32x128xf32>
    %781 = vector.shape_cast %780 : vector<1x32x128xf32> to vector<32x128xf32>
    %cst_235 = arith.constant dense<0.000000e+00> : vector<9x128xf32>
    %782 = tpu.matmul %779, %781, %cst_235 {dimension_numbers = #tpu.dot_dimension_numbers<[1], [0], [0], [1], [0, 0, 1, 1], [], []>} : vector<9x32xf32>, vector<32x128xf32>, vector<9x128xf32> -> vector<9x128xf32>
    %783 = vector.extract_strided_slice %690 {offsets = [6, 0], sizes = [1, 128], strides = [1, 1]} : vector<8x128xf32> to vector<1x128xf32>
    %784 = vector.broadcast %783 : vector<1x128xf32> to vector<9x128xf32>
    %785 = arith.addf %782, %784 : vector<9x128xf32>
    %cst_236 = arith.constant 5.000000e-01 : f32
    %786 = vector.broadcast %cst_236 : f32 to vector<9x128xf32>
    %787 = arith.mulf %786, %785 : vector<9x128xf32>
    %cst_237 = arith.constant 4.471500e-02 : f32
    %788 = vector.broadcast %cst_237 : f32 to vector<9x128xf32>
    %789 = arith.mulf %788, %785 : vector<9x128xf32>
    %790 = arith.mulf %789, %785 : vector<9x128xf32>
    %791 = arith.mulf %790, %785 : vector<9x128xf32>
    %792 = arith.addf %785, %791 : vector<9x128xf32>
    %cst_238 = arith.constant 0.797884583 : f32
    %793 = vector.broadcast %cst_238 : f32 to vector<9x128xf32>
    %794 = arith.mulf %793, %792 : vector<9x128xf32>
    %795 = math.tanh %794 : vector<9x128xf32>
    %cst_239 = arith.constant 1.000000e+00 : f32
    %796 = vector.broadcast %cst_239 : f32 to vector<9x128xf32>
    %797 = arith.addf %796, %795 : vector<9x128xf32>
    %798 = arith.mulf %787, %797 : vector<9x128xf32>
    %c1_240 = arith.constant 1 : index
    %c0_241 = arith.constant 0 : index
    %c640_242 = arith.constant 640 : index
    %799 = vector.load %arg3[%c1_240, %c0_241, %c640_242] : memref<2x32x896xf32, #tpu.memory_space<vmem>>, vector<1x32x128xf32>
    %800 = vector.shape_cast %799 : vector<1x32x128xf32> to vector<32x128xf32>
    %cst_243 = arith.constant dense<0.000000e+00> : vector<9x32xf32>
    %801 = tpu.matmul %798, %800, %cst_243 {dimension_numbers = #tpu.dot_dimension_numbers<[1], [1], [0], [0], [0, 0, 1, 0], [], []>} : vector<9x128xf32>, vector<32x128xf32>, vector<9x32xf32> -> vector<9x32xf32>
    %802 = vector.extract_strided_slice %690 {offsets = [5, 0], sizes = [1, 32], strides = [1, 1]} : vector<8x128xf32> to vector<1x32xf32>
    %803 = vector.broadcast %802 : vector<1x32xf32> to vector<9x32xf32>
    %804 = arith.addf %801, %803 : vector<9x32xf32>
    %805 = arith.addf %757, %804 : vector<9x32xf32>
    %c75 = arith.constant 75 : index
    %c0_244 = arith.constant 0 : index
    %806 = vector.load %arg6[%c75, %c0_244] : memref<110x32xf32, #tpu.memory_space<vmem>>, vector<1x32xf32>
    %c76 = arith.constant 76 : index
    %c0_245 = arith.constant 0 : index
    %807 = vector.load %arg6[%c76, %c0_245] : memref<110x32xf32, #tpu.memory_space<vmem>>, vector<1x32xf32>
    %cst_246 = arith.constant dense<0.000000e+00> : vector<9xf32>
    %808 = vector.multi_reduction <add>, %805, %cst_246 [1] : vector<9x32xf32> to vector<9xf32>
    %809 = vector.shape_cast %808 : vector<9xf32> to vector<9x1xf32>
    %cst_247 = arith.constant 3.200000e+01 : f32
    %810 = vector.broadcast %cst_247 : f32 to vector<9x1xf32>
    %811 = arith.divf %809, %810 : vector<9x1xf32>
    %812 = vector.broadcast %811 : vector<9x1xf32> to vector<9x32xf32>
    %813 = arith.subf %805, %812 : vector<9x32xf32>
    %814 = arith.mulf %813, %813 : vector<9x32xf32>
    %cst_248 = arith.constant dense<0.000000e+00> : vector<9xf32>
    %815 = vector.multi_reduction <add>, %814, %cst_248 [1] : vector<9x32xf32> to vector<9xf32>
    %816 = vector.shape_cast %815 : vector<9xf32> to vector<9x1xf32>
    %cst_249 = arith.constant 3.200000e+01 : f32
    %817 = vector.broadcast %cst_249 : f32 to vector<9x1xf32>
    %818 = arith.divf %816, %817 : vector<9x1xf32>
    %cst_250 = arith.constant 9.99999974E-6 : f32
    %819 = vector.broadcast %cst_250 : f32 to vector<9x1xf32>
    %820 = arith.addf %818, %819 : vector<9x1xf32>
    %821 = math.rsqrt %820 : vector<9x1xf32>
    %822 = vector.broadcast %821 : vector<9x1xf32> to vector<9x32xf32>
    %823 = arith.mulf %813, %822 : vector<9x32xf32>
    %824 = vector.broadcast %806 : vector<1x32xf32> to vector<9x32xf32>
    %825 = arith.mulf %823, %824 : vector<9x32xf32>
    %826 = vector.broadcast %807 : vector<1x32xf32> to vector<9x32xf32>
    %827 = arith.addf %825, %826 : vector<9x32xf32>
    %c77 = arith.constant 77 : index
    %c0_251 = arith.constant 0 : index
    %828 = vector.load %arg6[%c77, %c0_251] : memref<110x32xf32, #tpu.memory_space<vmem>>, vector<32x32xf32>
    %cst_252 = arith.constant dense<0.000000e+00> : vector<9x32xf32>
    %829 = tpu.matmul %827, %828, %cst_252 {dimension_numbers = #tpu.dot_dimension_numbers<[1], [0], [0], [1], [0, 0, 1, 1], [], []>} : vector<9x32xf32>, vector<32x32xf32>, vector<9x32xf32> -> vector<9x32xf32>
    %c109 = arith.constant 109 : index
    %c0_253 = arith.constant 0 : index
    %830 = vector.load %arg6[%c109, %c0_253] : memref<110x32xf32, #tpu.memory_space<vmem>>, vector<1x32xf32>
    %831 = vector.broadcast %830 : vector<1x32xf32> to vector<9x32xf32>
    %832 = arith.addf %829, %831 : vector<9x32xf32>
    %833 = vector.extract_strided_slice %832 {offsets = [1, 0], sizes = [8, 32], strides = [1, 1]} : vector<9x32xf32> to vector<8x32xf32>
    %c0_254 = arith.constant 0 : index
    %c0_255 = arith.constant 0 : index
    %c0_256 = arith.constant 0 : index
    %834 = vector.load %arg7[%c0_254, %c0_255, %c0_256] : memref<1x8x32xf32, #tpu.memory_space<vmem>>, vector<1x8x32xf32>
    %835 = vector.shape_cast %834 : vector<1x8x32xf32> to vector<8x32xf32>
    %836 = vector.shape_cast %833 : vector<8x32xf32> to vector<1x8x32xf32>
    tpu.vector_store %arg7[%c0_254, %c0_255, %c0_256], %836 {strides = array<i32>} : memref<1x8x32xf32, #tpu.memory_space<vmem>>, vector<1x8x32xf32>,
    return
  }
  func.func @transform_0(%arg0: i32) -> (i32, i32, i32) {
    %c0_i32 = arith.constant 0 : i32
    %c0_i32_0 = arith.constant 0 : i32
    %c0_i32_1 = arith.constant 0 : i32
    return %arg0, %c0_i32, %c0_i32_0 : i32, i32, i32
  }
  func.func @transform_1(%arg0: i32) -> (i32, i32, i32) {
    %c0_i32 = arith.constant 0 : i32
    %c0_i32_0 = arith.constant 0 : i32
    %c0_i32_1 = arith.constant 0 : i32
    %c0_i32_2 = arith.constant 0 : i32
    return %c0_i32, %c0_i32_0, %c0_i32_1 : i32, i32, i32
  }
  func.func @transform_2(%arg0: i32) -> (i32, i32, i32) {
    %c0_i32 = arith.constant 0 : i32
    %c0_i32_0 = arith.constant 0 : i32
    %c0_i32_1 = arith.constant 0 : i32
    %c0_i32_2 = arith.constant 0 : i32
    return %c0_i32, %c0_i32_0, %c0_i32_1 : i32, i32, i32
  }
  func.func @transform_3(%arg0: i32) -> (i32, i32) {
    %c0_i32 = arith.constant 0 : i32
    %c0_i32_0 = arith.constant 0 : i32
    %c0_i32_1 = arith.constant 0 : i32
    return %c0_i32, %c0_i32_0 : i32, i32
  }
  func.func @transform_4(%arg0: i32) -> (i32, i32) {
    %c0_i32 = arith.constant 0 : i32
    %c0_i32_0 = arith.constant 0 : i32
    %c0_i32_1 = arith.constant 0 : i32
    return %c0_i32, %c0_i32_0 : i32, i32
  }
  func.func @transform_5(%arg0: i32) -> (i32, i32) {
    %c0_i32 = arith.constant 0 : i32
    %c0_i32_0 = arith.constant 0 : i32
    %c0_i32_1 = arith.constant 0 : i32
    return %c0_i32, %c0_i32_0 : i32, i32
  }
  func.func @transform_6(%arg0: i32) -> (i32, i32, i32) {
    %c0_i32 = arith.constant 0 : i32
    %c0_i32_0 = arith.constant 0 : i32
    %c0_i32_1 = arith.constant 0 : i32
    return %arg0, %c0_i32, %c0_i32_0 : i32, i32, i32
  }
  func.func @transform_7(%arg0: i32) -> (i32, i32, i32) {
    %c0_i32 = arith.constant 0 : i32
    %c0_i32_0 = arith.constant 0 : i32
    %c0_i32_1 = arith.constant 0 : i32
    return %arg0, %c0_i32, %c0_i32_0 : i32, i32, i32
  }
}

</mosaic_0001>

<bundles_post_ra>
// kernel: _lambda_.1
= control target key start
LH: loop header
LB: loop body
LE: loop exit
PB: predicated region body
PF: predicated region fallthrough
CT: control target
= control target key end

     0   :  { %13 = vsyncpa [#allocation3], 0  ;;  %s5310_s0 = inlined_call_operand.vmem [shape: f32[2,9,32], index: 0, kind: input, shape index: {}]   ;;  %s5311_s1 = inlined_call_operand.vmem [shape: f32[2,32,896], index: 1, kind: input, shape index: {}]   ;;  %s5312_s2 = inlined_call_operand.vmem [shape: f32[2,32,896], index: 2, kind: input, shape index: {}]   ;;  %s5313_s3 = inlined_call_operand.vmem [shape: f32[51,64], index: 3, kind: input, shape index: {}]   ;;  %s5314_s4 = inlined_call_operand.vmem [shape: f32[146,256], index: 4, kind: input, shape index: {}]   ;;  %s5315_s5 = inlined_call_operand.vmem [shape: f32[110,32], index: 5, kind: input, shape index: {}]   ;;  %s5316_s6 = inlined_call_operand.hbm [shape: f32[2,8,32], index: 6, kind: output, shape index: {0}]   ;;  %s5317_s7 = inlined_call_operand.hbm [shape: f32[2,1,16], index: 7, kind: output, shape index: {1}]  }
   0x1   :  { %15 = vsyncpa [#allocation3 + $0x1], 0 }
   0x2   :  { %16 = vsyncpa [#allocation5], 0 }
   0x3   :  { %18 = vsyncpa [#allocation5 + $0x1], 0  ;;  %s4183_s24 = smov 0   ;;  %s4185_s25 = smov 0  }
   0x4   :  { %s4187_s26 = smov 0   ;;  %s4189_s27 = smov 0  }
   0x5 LB: > { %s4204_s28 = sadd.s32 4294967295, %s4134_s27   ;;  %s3601_s29 = sadd.s32 4294967294, %s4134_s27   ;;  %s4134_s27 = sphi %s4189_s27, %s5323_s27   ;;  %s4130_s26 = sphi %s4187_s26, %s5322_s26   ;;  %s4126_s25 = sphi %s4185_s25, %s5321_s25   ;;  %s4122_s24 = sphi %s4183_s24, %s5320_s24  }
   0x6   : > { %s4208_s30 = sadd.s32 1, %s4134_s27   ;;  %s162_s8 = sadd.s32 1, %s4130_s26 }
   0x7   : > { %s159_s9 = ssub.s32 %s4134_s27, %s4208_s30  ;;  %p172_p0 = scmp.ne.s32.totalorder %s4130_s26, %s4126_s25 }
   0x8   : > { %p160_p1 = scmp.eq.s32.totalorder %s159_s9, 0  ;;  %p173_p2 = scmp.eq.s32.totalorder %s4204_s28, 1 }
   0x9   : > { %p178_p3 = scmp.ne.s32.totalorder %s4126_s25, %s4122_s24  ;;  %p179_p4 = scmp.eq.s32.totalorder %s3601_s29, 1 }
   0xa   : > { %s4219_s10 = scalar_select %p160_p1, %s4130_s26, %s162_s8  }
   0xb   : > { %p4221_p5 = por %p173_p2, %p172_p0  ;;  %p4225_p6 = por %p179_p4, %p178_p3 }
   0xc   : > { %p3604_p7 = scmp.ge.s32.totalorder %s4134_s27, 1  ;;  %p246_p8 = scmp.lt.s32.totalorder %s4134_s27, 3 }
   0xe   : > { %p247_p9 = pnand %p3604_p7, %p246_p8 }
   0xf   : > { %p282_p10 = scmp.lt.s32.totalorder (!%p247_p9), %s4204_s28, 1  ;;  %s4137_s16 = smov (!%p247_p9), 64  }
  0x10   : > { %250 = sbr.rel (%p247_p9) target bundleno = 13913 (0x3659), region = 44  ;;  %s4139_s18 = smov (!%p247_p9), 96  }
  0x11   : > { %s4140_s19 = smov (!%p247_p9), 16   ;;  %s4141_s20 = smov (!%p247_p9), 32  }
  0x12   : > { %s4142_s21 = smov (!%p247_p9), 80   ;;  %s4750_s22 = sand.u32 (!%p247_p9), 1, %s4126_s25  }
  0x13   : > { %s281_s23 = scalar_lea.vmem (!%p247_p9), [#allocation4], %s4750_s22 }
  0x15   : > { %s283_s13 = scalar_select %p282_p10, %s4204_s28, 1  ;;  %vm294_vm0 = vcmask 253952   ;;  %vm290_vm1 = vcmask 261120   ;;  %v4136_v4 = vmov 32.0   ;;  %v358_v21 = vld [vmem:[%s5311_s1 + $0xa8] sm:$0xff]  ;;  %v355_v22 = vld [vmem:[%s5311_s1 + $0x70] sm:$0xff] }
  0x16   : > { %3840 = vrcp.f32 %v4136_v4  ;;  %3778 = vmatpush.msra.mxu1 %v358_v21  ;;  %379 = vmatpush.msra.mxu0 %v358_v21  ;;  %v352_v23 = vld [vmem:[%s5311_s1 + $0x38] sm:$0xff]  ;;  %v349_v24 = vld [vmem:[%s5311_s1] sm:$0xff]  ;;  %v359_v25 = vld [vmem:[%s5311_s1 + $0xb0] sm:$0xff]  ;;  %vm436_vm9 = vcmask 523264   ;;  %vm504_vm10 = vcmask 1040384   ;;  %vm474_vm11 = vcmask 72704  }
  0x17   : > { %s3777_s14 = sshll.u32 %s283_s13, 4  ;;  %v360_v26 = vld [vmem:[%s5311_s1 + $0xb8] sm:$0xff]  ;;  %v357_v28 = vld [vmem:[%s5311_s1 + $0x80] sm:$0xff]  ;;  %v354_v30 = vld [vmem:[%s5311_s1 + $0x48] sm:$0xff]  ;;  %vm478_vm12 = vcmask 65536   ;;  %s3511_s13 = sshll.u32 %s281_s23, 4  ;;  %s3512_s13 = int_to_ptr.vmem [resolvable:$true] %s3511_s13 }
  0x18   : > { %s286_s17 = scalar_lea.vmem %s5310_s0, %s3777_s14  ;;  %3779 = vmatpush.msra.mxu1 %v355_v22  ;;  %380 = vmatpush.msra.mxu0 %v355_v22  ;;  %v356_v27 = vld [vmem:[%s5311_s1 + $0x78] sm:$0xff]  ;;  %v353_v29 = vld [vmem:[%s5311_s1 + $0x40] sm:$0xff]  ;;  %v350_v33 = vld [vmem:[%s5311_s1 + $0x8] sm:$0xff]  ;;  %s3487_s14 = scalar_lea.sflag [#allocation5], %s4750_s22 }
  0x19   : > { %v4236_v0 = vld [vmem:[%s286_s17 + $0x8] sm:$0x1]  ;;  %v4240_v2 = vld [vmem:[%s286_s17] sm:$0xff]  ;;  %425 = vmatpush.msra.mxu2 %v360_v26  ;;  %v351_v34 = vld [vmem:[%s5311_s1 + $0x10] sm:$0xff] }
  0x1a   : > { %v295_v1 = vsel %vm294_vm0, %v4236_v0, 0.0  ;;  %v291_v3 = vsel %vm290_vm1, %v4240_v2, 0.0  ;;  %3780 = vmatpush.msra.mxu1 %v352_v23  ;;  %381 = vmatpush.msra.mxu0 %v352_v23  ;;  %v4297_v44 = vld [vmem:[%s5311_s1 + $0x30] sm:$0xff] }
  0x1b   : > { %296 = vadd.xlane.f32.xlu0 %v295_v1  ;;  %426 = vmatpush.msra.mxu2 %v357_v28  ;;  %v343_v48 = vperm.slane %v4297_v44, 0  ;;  %v346_v52 = vperm.slane %v4297_v44, 1 }
  0x1c   : > { %v3841_v5 = vpop.eup %3840  ;;  %3781 = vmatpush.msra.mxu1 %v349_v24  ;;  %382 = vmatpush.msra.mxu0 %v349_v24 }
  0x1d   : > { %v299_v6 = vmul.f32 32.0, %v3841_v5  ;;  %vm303_vm2 = vweird.f32 %v3841_v5  ;;  %427 = vmatpush.msra.mxu2 %v354_v30 }
  0x1e   : > { %402 = vmatpush.msrb.mxu1 %v359_v25 }
  0x1f   : > { %v300_v7 = vsub.f32 1.0, %v299_v6  ;;  %428 = vmatpush.msra.mxu2 %v351_v34 }
  0x20   : > { %403 = vmatpush.msrb.mxu1 %v356_v27 }
  0x21   : > { %v301_v8 = vmul.f32 %v3841_v5, %v300_v7 }
  0x22   : > { %404 = vmatpush.msrb.mxu1 %v353_v29 }
  0x23   : > { %292 = vadd.xlane.f32.xlu0 %v291_v3  ;;  %v302_v9 = vadd.f32 %v3841_v5, %v301_v8 }
  0x24   : > { %405 = vmatpush.msrb.mxu1 %v350_v33 }
  0x25   : > { %v4244_v10 = vsel %vm303_vm2, %v3841_v5, %v302_v9 }
  0x8e   : > { %v297_v11 = vpop.xlane.xlu0 %296 }
  0x8f   : > { %v306_v12 = vmul.f32 %v4244_v10, %v297_v11 }
  0x91   : > { %v308_v13 = vsub.f32 %v4236_v0, %v306_v12 }
  0x93   : > { %v310_v14 = vmul.f32 %v308_v13, %v308_v13 }
  0x95   : > { %v314_v15 = vsel %vm294_vm0, %v310_v14, 0.0 }
  0x96   : > { %315 = vadd.xlane.f32.xlu1 %v314_v15  ;;  %v293_v16 = vpop.xlane.xlu0 %292 }
  0x97   : > { %v305_v17 = vmul.f32 %v4244_v10, %v293_v16 }
  0x99   : > { %v4251_v18 = vsub.f32 %v4240_v2, %v305_v17 }
  0x9b   : > { %v309_v19 = vmul.f32 %v4251_v18, %v4251_v18 }
  0x9d   : > { %v311_v20 = vsel %vm290_vm1, %v309_v19, 0.0 }
  0x9e   : > { %312 = vadd.xlane.f32.xlu1 %v311_v20 }
 0x109   : > { %v316_v31 = vpop.xlane.xlu1 %315 }
 0x10a   : > { %v318_v32 = vmul.f32 %v316_v31, %v4244_v10 }
 0x10c   : > { %v320_v35 = vadd.f32 1e-05, %v318_v32 }
 0x10e   : > { %3842 = vrsqrt.f32 %v320_v35  ;;  %vm337_vm4 = vweird.f32 %v320_v35 }
 0x111   : > { %v313_v36 = vpop.xlane.xlu1 %312 }
 0x112   : > { %v317_v37 = vmul.f32 %v313_v36, %v4244_v10 }
 0x114   : > { %v3843_v38 = vpop.eup %3842  ;;  %v319_v39 = vadd.f32 1e-05, %v317_v37 }
 0x115   : > { %v332_v40 = vmul.f32 %v3843_v38, %v320_v35  ;;  %vm338_vm3 = vweird.f32 %v3843_v38 }
 0x116   : > { %3844 = vrsqrt.f32 %v319_v39  ;;  %vm339_vm5 = vmor %vm337_vm4, %vm338_vm3  ;;  %vm327_vm7 = vweird.f32 %v319_v39 }
 0x117   : > { %v333_v41 = vmul.f32 %v3843_v38, %v332_v40 }
 0x119   : > { %v334_v42 = vmul.f32 0.5, %v333_v41 }
 0x11b   : > { %v335_v43 = vsub.f32 1.5, %v334_v42 }
 0x11c   : > { %v3845_v45 = vpop.eup %3844 }
 0x11d   : > { %v336_v46 = vmul.f32 %v3843_v38, %v335_v43  ;;  %v322_v47 = vmul.f32 %v3845_v45, %v319_v39  ;;  %vm328_vm6 = vweird.f32 %v3845_v45 }
 0x11e   : > { %vm329_vm8 = vmor %vm327_vm7, %vm328_vm6 }
 0x11f   : > { %v323_v49 = vmul.f32 %v3845_v45, %v322_v47  ;;  %v340_v50 = vsel %vm339_vm5, %v3843_v38, %v336_v46 }
 0x120   : > { %v342_v51 = vmul.f32 %v340_v50, %v308_v13 }
 0x121   : > { %v324_v53 = vmul.f32 0.5, %v323_v49 }
 0x122   : > { %v345_v54 = vmul.f32 %v343_v48, %v342_v51 }
 0x123   : > { %v325_v55 = vsub.f32 1.5, %v324_v53 }
 0x124   : > { %v348_v56 = vadd.f32 %v346_v52, %v345_v54 }
 0x125   : > { %v326_v57 = vmul.f32 %v3845_v45, %v325_v55 }
 0x126   : > { %3609 = vmatmul.msk.f32.vlgmr.msra.gmra.mxu1 %vm290_vm1, %v348_v56 }
 0x127   : > { %v330_v58 = vsel %vm329_vm8, %v3845_v45, %v326_v57 }
 0x128   : > { %v341_v59 = vmul.f32 %v330_v58, %v4251_v18  ;;  %v644_v58 = vld [vmem:[%s5311_s1 + $0xc0] sm:$0xff] }
 0x12a   : > { %v344_v60 = vmul.f32 %v343_v48, %v341_v59  ;;  %v643_v59 = vld [vmem:[%s5311_s1 + $0x88] sm:$0xff] }
 0x12c   : > { %v347_v61 = vadd.f32 %v346_v52, %v344_v60  ;;  %v642_v60 = vld [vmem:[%s5311_s1 + $0x50] sm:$0xff] }
 0x12e   : > { %3608 = vmatmul.msk.f32.vlgmr.msra.gmra.mxu0 %vm290_vm1, %v347_v61  ;;  %3610 = vmatmul.msk.f32.vlgmr.msrb.gmra.mxu1 %vm290_vm1, %v347_v61 }
 0x12f   : > { %3612 = vmatmul.msk.f32.vlgmr.msra.gmra.mxu2 %vm290_vm1, %v347_v61  ;;  %v641_v61 = vld [vmem:[%s5311_s1 + $0x18] sm:$0xff] }
 0x136   : > { %3611 = vmatmul.msk.f32.gmra.mxu1 %vm290_vm1, %v348_v56 }
 0x137   : > { %3613 = vmatmul.msk.f32.gmra.mxu2 %vm290_vm1, %v348_v56 }
 0x1a3   : > { %v387_v62 = vpop.f32.mrf.mxu1 }
 0x1a4   : > { %533 = vrot.lane.b32.xlu1 %v387_v62, %s4137_s16 }
 0x1ab   : > { %v384_v63 = vpop.f32.mrf.mxu0  ;;  %v407_v1 = vpop.f32.mrf.mxu1 }
 0x1ac   : > { %531 = vrot.lane.b32.xlu0 %v384_v63, %s4137_s16 }
 0x1b2   : > { %v430_v3 = vpop.f32.mrf.mxu2 }
 0x1b3   : > { %v410_v4 = vpop.f32.mrf.mxu1 }
 0x1b4   : > { %537 = vrot.lane.b32.xlu2 %v410_v4, %s4137_s16  ;;  %3614 = vmatpush.xpose.msk.msra.mxu3 %vm436_vm9, %v410_v4 }
 0x1b8   : > { %3615 = vmatpush.xpose.msk.msra.mxu3 %vm436_vm9, %v407_v1 }
 0x1ba   : > { %v433_v5 = vpop.f32.mrf.mxu2 }
 0x1bb   : > { %3618 = vmatpush.msk.msrb.mxu0 %vm504_vm10, %v433_v5  ;;  %3616 = vmatmul.msk.f32.vlgmr.msra.gmra.mxu3 %vm436_vm9, %v384_v63 }
 0x1bc   : > { %535 = vrot.lane.b32.xlu2 %v407_v1, %s4137_s16  ;;  %657 = vmatpush.xpose.msrb.mxu3 %v644_v58 }
 0x1bd   : > { %523 = vmatpush.msrb.mxu0 %v430_v3 }
 0x1c0   : > { %658 = vmatpush.xpose.msrb.mxu3 %v643_v59  ;;  %v778_v59 = vld [vmem:[%s5311_s1 + $0xd0] sm:$0xff] }
 0x1c3   : > { %3617 = vmatmul.msk.f32.gmra.mxu3 %vm436_vm9, %v387_v62 }
 0x1c4   : > { %659 = vmatpush.xpose.msrb.mxu3 %v642_v60  ;;  %v777_v60 = vld [vmem:[%s5311_s1 + $0x98] sm:$0xff] }
 0x1c8   : > { %660 = vmatpush.xpose.msrb.mxu3 %v641_v61  ;;  %v776_v61 = vld [vmem:[%s5311_s1 + $0x60] sm:$0xff] }
 0x20e   : > { %v538_v6 = vpop.permute.xlu2 %537 }
 0x20f   : > { %3621 = vmatpush.xpose.msk.msra.mxu1 %vm436_vm9, %v538_v6 }
 0x216   : > { %v536_v7 = vpop.permute.xlu2 %535  ;;  %v534_v9 = vpop.permute.xlu1 %533 }
 0x217   : > { %3622 = vmatpush.xpose.msk.msra.mxu1 %vm436_vm9, %v536_v7 }
 0x21b   : > { %792 = vmatpush.xpose.msrb.mxu1 %v778_v59 }
 0x21e   : > { %v532_v8 = vpop.permute.xlu0 %531 }
 0x21f   : > { %3623 = vmatmul.msk.f32.vlgmr.msra.gmra.mxu1 %vm436_vm9, %v532_v8  ;;  %v670_v8 = vperm.slane %v4297_v44, 2 }
 0x220   : > { %793 = vmatpush.xpose.msrb.mxu1 %v777_v60 }
 0x224   : > { %794 = vmatpush.xpose.msrb.mxu1 %v776_v61  ;;  %v4461_v61 = vld [vmem:[%s5311_s1 + $0x110] sm:$0xff] }
 0x227   : > { %3624 = vmatmul.msk.f32.gmra.mxu1 %vm436_vm9, %v534_v9 }
 0x23e   : > { %v466_v11 = vpop.f32.mrf.mxu3 }
 0x23f   : > { %v472_v12 = vmul.f32 0.125, %v466_v11 }
 0x241   : > { %v475_v13 = vsel %vm474_vm11, %v472_v12, -inf }
 0x242   : > { %476 = vmax.xlane.f32.xlu1 %v475_v13 }
 0x246   : > { %v469_v17 = vpop.f32.mrf.mxu3 }
 0x247   : > { %v473_v18 = vmul.f32 0.125, %v469_v17 }
 0x249   : > { %v479_v21 = vsel %vm478_vm12, %v473_v18, -inf }
 0x25b   : > { %595 = vrot.lane.b32.xlu1 %v430_v3, %s4137_s16 }
 0x29c   : > { %v564_v14 = vpop.f32.mrf.mxu1 }
 0x29d   : > { %v570_v15 = vmul.f32 0.125, %v564_v14 }
 0x29f   : > { %v572_v16 = vsel %vm474_vm11, %v570_v15, -inf }
 0x2a0   : > { %573 = vmax.xlane.f32.xlu2 %v572_v16 }
 0x2a4   : > { %v567_v19 = vpop.f32.mrf.mxu1 }
 0x2a5   : > { %v571_v20 = vmul.f32 0.125, %v567_v19 }
 0x2a7   : > { %v575_v22 = vsel %vm478_vm12, %v571_v20, -inf }
 0x2a8   : > { %480 = vmax.xlane.f32.xlu2 %v479_v21  ;;  %576 = vmax.xlane.f32.xlu0 %v575_v22 }
 0x2b5   : > { %v477_v27 = vpop.xlane.xlu1 %476 }
 0x2b6   : > { %v482_v31 = vsub.f32 %v472_v12, %v477_v27  ;;  %v725_v27 = vld [vmem:[%s5311_s1 + $0x90] sm:$0xff] }
 0x2b8   : > { %v484_v33 = vmul.f32 1.442695, %v482_v31 }
 0x2cd   : > { %v596_v48 = vpop.permute.xlu1 %595 }
 0x313   : > { %v574_v23 = vpop.xlane.xlu2 %573 }
 0x314   : > { %v578_v24 = vsub.f32 %v570_v15, %v574_v23 }
 0x316   : > { %v580_v25 = vmul.f32 1.442695, %v578_v24 }
 0x318   : > { %3846 = vpow2.f32 %v580_v25 }
 0x31b   : > { %v577_v26 = vpop.xlane.xlu0 %576  ;;  %v481_v34 = vpop.xlane.xlu2 %480 }
 0x31c   : > { %v579_v28 = vsub.f32 %v571_v20, %v577_v26  ;;  %v483_v36 = vsub.f32 %v473_v18, %v481_v34  ;;  %v726_v26 = vld [vmem:[%s5311_s1 + $0xc8] sm:$0xff] }
 0x31d   : > { %746 = vmatpush.msra.mxu0 %v726_v26 }
 0x31e   : > { %v3847_v29 = vpop.eup %3846  ;;  %v582_v30 = vmul.f32 1.442695, %v579_v28  ;;  %v486_v38 = vmul.f32 1.442695, %v483_v36  ;;  %v724_v28 = vld [vmem:[%s5311_s1 + $0x58] sm:$0xff] }
 0x31f   : > { %v584_v32 = vsel %vm474_vm11, %v3847_v29, 0.0  ;;  %747 = vmatpush.msra.mxu0 %v725_v27 }
 0x320   : > { %585 = vadd.xlane.f32.xlu2 %v584_v32  ;;  %3848 = vpow2.f32 %v582_v30 }
 0x321   : > { %3850 = vpow2.f32 %v484_v33  ;;  %748 = vmatpush.msra.mxu0 %v724_v28 }
 0x322   : > { %3852 = vpow2.f32 %v486_v38 }
 0x326   : > { %v3849_v35 = vpop.eup %3848 }
 0x327   : > { %v587_v37 = vsel %vm478_vm12, %v3849_v35, 0.0  ;;  %v3851_v39 = vpop.eup %3850 }
 0x328   : > { %588 = vadd.xlane.f32.xlu0 %v587_v37  ;;  %v488_v40 = vsel %vm474_vm11, %v3851_v39, 0.0  ;;  %v3853_v41 = vpop.eup %3852 }
 0x329   : > { %v491_v42 = vsel %vm478_vm12, %v3853_v41, 0.0 }
 0x330   : > { %489 = vadd.xlane.f32.xlu0 %v488_v40 }
 0x338   : > { %597 = vrot.lane.b32.xlu2 %v433_v5, %s4137_s16  ;;  %492 = vadd.xlane.f32.xlu0 %v491_v42  ;;  %v720_v42 = vperm.slane %v4297_v44, 4 }
 0x393   : > { %v586_v43 = vpop.xlane.xlu2 %585 }
 0x394   : > { %3854 = vrcp.f32 %v586_v43 }
 0x39a   : > { %v3855_v45 = vpop.eup %3854 }
 0x39b   : > { %v598_v46 = vpop.permute.xlu2 %597  ;;  %v589_v47 = vpop.xlane.xlu0 %588  ;;  %v592_v49 = vmul.f32 %v3855_v45, %v3847_v29  ;;  %v723_v29 = vld [vmem:[%s5311_s1 + $0x20] sm:$0xff] }
 0x39c   : > { %3625 = vmatpush.msk.msrb.mxu2 %vm504_vm10, %v598_v46  ;;  %3856 = vrcp.f32 %v589_v47  ;;  %749 = vmatpush.msra.mxu0 %v723_v29 }
 0x39e   : > { %623 = vmatpush.msrb.mxu2 %v596_v48 }
 0x39f   : > { %3626 = vmatmul.msk.f32.vlgmr.msrb.gmra.mxu2 %vm474_vm11, %v592_v49 }
 0x3a2   : > { %v3857_v50 = vpop.eup %3856 }
 0x3a3   : > { %v490_v51 = vpop.xlane.xlu0 %489  ;;  %v593_v52 = vmul.f32 %v3857_v50, %v3849_v35 }
 0x3a4   : > { %3858 = vrcp.f32 %v490_v51 }
 0x3a7   : > { %3627 = vmatmul.msk.f32.gmra.mxu2 %vm474_vm11, %v593_v52 }
 0x3aa   : > { %v3859_v53 = vpop.eup %3858 }
 0x3ab   : > { %v493_v54 = vpop.xlane.xlu0 %492  ;;  %v496_v55 = vmul.f32 %v3859_v53, %v3851_v39  ;;  %v717_v39 = vperm.slane %v4297_v44, 3 }
 0x3ac   : > { %3860 = vrcp.f32 %v493_v54 }
 0x3ad   : > { %3619 = vmatmul.msk.f32.vlgmr.msrb.gmra.mxu0 %vm474_vm11, %v496_v55 }
 0x3b2   : > { %v3861_v56 = vpop.eup %3860 }
 0x3b3   : > { %v497_v57 = vmul.f32 %v3861_v56, %v3853_v41 }
 0x3b5   : > { %3620 = vmatmul.msk.f32.gmra.mxu0 %vm474_vm11, %v497_v57 }
 0x422   : > { %v625_v62 = vpop.f32.mrf.mxu2 }
 0x423   : > { %633 = vrot.lane.b32.xlu2 %v625_v62, %s4137_s16  ;;  %v775_v62 = vld [vmem:[%s5311_s1 + $0x28] sm:$0xff] }
 0x424   : > { %795 = vmatpush.xpose.msrb.mxu1 %v775_v62 }
 0x42a   : > { %v628_v63 = vpop.f32.mrf.mxu2  ;;  %v525_v1 = vpop.f32.mrf.mxu0 }
 0x42b   : > { %635 = vrot.lane.b32.xlu0 %v628_v63, %s4137_s16  ;;  %v727_v63 = vperm.slane %v4297_v44, 6 }
 0x432   : > { %v528_v5 = vpop.f32.mrf.mxu0 }
 0x47d   : > { %v634_v3 = vpop.permute.xlu2 %633 }
 0x47e   : > { %v639_v4 = vsel %vm436_vm9, %v525_v1, %v634_v3 }
 0x47f   : > { %661 = vmatmul.f32.vlgmr.msrb.gmra.mxu3 %v639_v4 }
 0x49d   : > { %v636_v6 = vpop.permute.xlu0 %635 }
 0x49e   : > { %v640_v7 = vsel %vm436_vm9, %v528_v5, %v636_v6 }
 0x49f   : > { %664 = vmatmul.f32.gmra.mxu3 %v640_v7 }
 0x502   : > { %v662_v9 = vpop.f32.mrf.mxu3 }
 0x503   : > { %v668_v11 = vadd.f32 %v662_v9, %v4240_v2 }
 0x505   : > { %v4354_v12 = vadd.f32 %v670_v8, %v668_v11 }
 0x507   : > { %v673_v13 = vsel %vm290_vm1, %v4354_v12, 0.0 }
 0x508   : > { %674 = vadd.xlane.f32.xlu2 %v673_v13 }
 0x522   : > { %v665_v14 = vpop.f32.mrf.mxu3 }
 0x523   : > { %v669_v15 = vadd.f32 %v665_v14, %v4236_v0 }
 0x525   : > { %v4359_v16 = vadd.f32 %v670_v8, %v669_v15 }
 0x527   : > { %v676_v17 = vsel %vm294_vm0, %v4359_v16, 0.0 }
 0x528   : > { %677 = vadd.xlane.f32.xlu1 %v676_v17 }
 0x57b   : > { %v675_v18 = vpop.xlane.xlu2 %674 }
 0x57c   : > { %v679_v19 = vmul.f32 %v675_v18, %v4244_v10 }
 0x57e   : > { %v681_v2 = vsub.f32 %v4354_v12, %v679_v19 }
 0x580   : > { %v683_v20 = vmul.f32 %v681_v2, %v681_v2 }
 0x582   : > { %v685_v21 = vsel %vm290_vm1, %v683_v20, 0.0 }
 0x583   : > { %686 = vadd.xlane.f32.xlu0 %v685_v21 }
 0x59b   : > { %v678_v22 = vpop.xlane.xlu1 %677 }
 0x59c   : > { %v680_v23 = vmul.f32 %v678_v22, %v4244_v10 }
 0x59e   : > { %v682_v0 = vsub.f32 %v4359_v16, %v680_v23 }
 0x5a0   : > { %v684_v24 = vmul.f32 %v682_v0, %v682_v0 }
 0x5a2   : > { %v688_v25 = vsel %vm294_vm0, %v684_v24, 0.0 }
 0x5a3   : > { %689 = vadd.xlane.f32.xlu2 %v688_v25  ;;  %v779_v25 = vperm.slane %v4297_v44, 5 }
 0x5f6   : > { %v687_v30 = vpop.xlane.xlu0 %686 }
 0x5f7   : > { %v691_v31 = vmul.f32 %v687_v30, %v4244_v10 }
 0x5f9   : > { %v693_v32 = vadd.f32 1e-05, %v691_v31 }
 0x5fb   : > { %3862 = vrsqrt.f32 %v693_v32  ;;  %vm701_vm14 = vweird.f32 %v693_v32 }
 0x601   : > { %v3863_v33 = vpop.eup %3862 }
 0x602   : > { %v696_v34 = vmul.f32 %v3863_v33, %v693_v32  ;;  %vm702_vm13 = vweird.f32 %v3863_v33 }
 0x603   : > { %vm703_vm15 = vmor %vm701_vm14, %vm702_vm13 }
 0x604   : > { %v697_v35 = vmul.f32 %v3863_v33, %v696_v34 }
 0x606   : > { %v698_v36 = vmul.f32 0.5, %v697_v35 }
 0x608   : > { %v699_v37 = vsub.f32 1.5, %v698_v36 }
 0x60a   : > { %v700_v38 = vmul.f32 %v3863_v33, %v699_v37 }
 0x60c   : > { %v704_v40 = vsel %vm703_vm15, %v3863_v33, %v700_v38 }
 0x60d   : > { %v715_v41 = vmul.f32 %v704_v40, %v681_v2 }
 0x60f   : > { %v718_v43 = vmul.f32 %v717_v39, %v715_v41  ;;  %v3640_v41 = vld [vmem:[%s5311_s1 + $0x188] sm:$0xff] }
 0x610   : > { %887 = vmatpush.msra.mxu2 %v3640_v41 }
 0x611   : > { %v721_v45 = vadd.f32 %v720_v42, %v718_v43  ;;  %v3642_v43 = vld [vmem:[%s5311_s1 + $0x198] sm:$0xff] }
 0x612   : > { %933 = vmatpush.msrb.mxu0 %v3642_v43 }
 0x613   : > { %3628 = vmatmul.msk.f32.vlgmr.msra.gmra.mxu0 %vm290_vm1, %v721_v45  ;;  %v3637_v45 = vld [vmem:[%s5311_s1 + $0x150] sm:$0xff] }
 0x614   : > { %888 = vmatpush.msra.mxu2 %v3637_v45 }
 0x616   : > { %v690_v46 = vpop.xlane.xlu2 %689 }
 0x617   : > { %v692_v47 = vmul.f32 %v690_v46, %v4244_v10  ;;  %v3638_v46 = vld [vmem:[%s5311_s1 + $0x158] sm:$0xff] }
 0x619   : > { %v694_v48 = vadd.f32 1e-05, %v692_v47  ;;  %v3639_v47 = vld [vmem:[%s5311_s1 + $0x160] sm:$0xff] }
 0x61a   : > { %934 = vmatpush.msrb.mxu0 %v3639_v47 }
 0x61b   : > { %3864 = vrsqrt.f32 %v694_v48  ;;  %vm711_vm3 = vweird.f32 %v694_v48 }
 0x621   : > { %v3865_v49 = vpop.eup %3864 }
 0x622   : > { %v706_v50 = vmul.f32 %v3865_v49, %v694_v48  ;;  %vm712_vm2 = vweird.f32 %v3865_v49  ;;  %v3634_v48 = vld [vmem:[%s5311_s1 + $0x118] sm:$0xff] }
 0x623   : > { %vm713_vm4 = vmor %vm711_vm3, %vm712_vm2  ;;  %889 = vmatpush.msra.mxu2 %v3634_v48 }
 0x624   : > { %v707_v51 = vmul.f32 %v3865_v49, %v706_v50  ;;  %v3636_v50 = vld [vmem:[%s5311_s1 + $0x128] sm:$0xff] }
 0x625   : > { %935 = vmatpush.msrb.mxu0 %v3636_v50 }
 0x626   : > { %v708_v52 = vmul.f32 0.5, %v707_v51  ;;  %v3631_v51 = vld [vmem:[%s5311_s1 + $0xe0] sm:$0xff] }
 0x627   : > { %890 = vmatpush.msra.mxu2 %v3631_v51 }
 0x628   : > { %v709_v53 = vsub.f32 1.5, %v708_v52  ;;  %v3632_v52 = vld [vmem:[%s5311_s1 + $0xe8] sm:$0xff] }
 0x62a   : > { %v710_v54 = vmul.f32 %v3865_v49, %v709_v53  ;;  %v3633_v53 = vld [vmem:[%s5311_s1 + $0xf0] sm:$0xff] }
 0x62b   : > { %936 = vmatpush.msrb.mxu0 %v3633_v53 }
 0x62c   : > { %v714_v55 = vsel %vm713_vm4, %v3865_v49, %v710_v54  ;;  %v3635_v49 = vld [vmem:[%s5311_s1 + $0x120] sm:$0xff] }
 0x62d   : > { %v716_v56 = vmul.f32 %v714_v55, %v682_v0 }
 0x62f   : > { %v719_v57 = vmul.f32 %v717_v39, %v716_v56 }
 0x631   : > { %v722_v58 = vadd.f32 %v720_v42, %v719_v57  ;;  %v3641_v42 = vld [vmem:[%s5311_s1 + $0x190] sm:$0xff] }
 0x632   : > { %910 = vmatpush.msra.mxu3 %v3641_v42 }
 0x633   : > { %3629 = vmatmul.msk.f32.gmra.mxu0 %vm290_vm1, %v722_v58 }
 0x634   : > { %911 = vmatpush.msra.mxu3 %v3638_v46 }
 0x636   : > { %912 = vmatpush.msra.mxu3 %v3635_v49 }
 0x638   : > { %913 = vmatpush.msra.mxu3 %v3632_v52 }
 0x690   : > { %v751_v1 = vpop.f32.mrf.mxu0 }
 0x691   : > { %v752_v3 = vadd.f32 %v751_v1, %v727_v63  ;;  %v851_v1 = vperm.slane %v4461_v61, 0 }
 0x693   : > { %v759_v4 = vmul.f32 0.044715, %v752_v3  ;;  %v757_v11 = vmul.f32 0.5, %v752_v3 }
 0x695   : > { %v761_v5 = vmul.f32 %v759_v4, %v752_v3 }
 0x697   : > { %v763_v6 = vmul.f32 %v761_v5, %v752_v3  ;;  %v854_v5 = vperm.slane %v4461_v61, 1 }
 0x699   : > { %v765_v7 = vadd.f32 %v763_v6, %v752_v3 }
 0x69b   : > { %v767_v8 = vmul.f32 0.7978846, %v765_v7 }
 0x69d   : > { %3866 = vtanh.f32 %v767_v8 }
 0x6a3   : > { %v3867_v9 = vpop.eup %3866 }
 0x6a4   : > { %v771_v13 = vadd.f32 1.0, %v3867_v9 }
 0x6a6   : > { %v773_v14 = vmul.f32 %v771_v13, %v757_v11 }
 0x6a8   : > { %796 = vmatmul.f32.vlgmr.msrb.gmra.mxu1 %v773_v14 }
 0x6b0   : > { %v754_v15 = vpop.f32.mrf.mxu0 }
 0x6b1   : > { %v755_v17 = vadd.f32 %v754_v15, %v727_v63 }
 0x6b3   : > { %v760_v18 = vmul.f32 0.044715, %v755_v17  ;;  %v758_v23 = vmul.f32 0.5, %v755_v17 }
 0x6b5   : > { %v762_v19 = vmul.f32 %v760_v18, %v755_v17 }
 0x6b7   : > { %v764_v2 = vmul.f32 %v762_v19, %v755_v17 }
 0x6b9   : > { %v766_v20 = vadd.f32 %v764_v2, %v755_v17 }
 0x6bb   : > { %v768_v21 = vmul.f32 0.7978846, %v766_v20 }
 0x6bd   : > { %3868 = vtanh.f32 %v768_v21 }
 0x6c3   : > { %v3869_v22 = vpop.eup %3868 }
 0x6c4   : > { %v772_v0 = vadd.f32 1.0, %v3869_v22 }
 0x6c6   : > { %v774_v24 = vmul.f32 %v772_v0, %v758_v23 }
 0x6c8   : > { %799 = vmatmul.f32.gmra.mxu1 %v774_v24 }
 0x725   : > { %v797_v26 = vpop.f32.mrf.mxu1 }
 0x726   : > { %v798_v27 = vadd.f32 %v797_v26, %v779_v25 }
 0x728   : > { %v4402_v28 = vadd.f32 %v798_v27, %v4354_v12 }
 0x72a   : > { %v807_v29 = vsel %vm290_vm1, %v4402_v28, 0.0 }
 0x72b   : > { %808 = vadd.xlane.f32.xlu1 %v807_v29 }
 0x745   : > { %v800_v30 = vpop.f32.mrf.mxu1 }
 0x746   : > { %v801_v31 = vadd.f32 %v800_v30, %v779_v25 }
 0x748   : > { %v4407_v32 = vadd.f32 %v801_v31, %v4359_v16 }
 0x74a   : > { %v810_v33 = vsel %vm294_vm0, %v4407_v32, 0.0 }
 0x74b   : > { %811 = vadd.xlane.f32.xlu2 %v810_v33 }
 0x79e   : > { %v809_v34 = vpop.xlane.xlu1 %808 }
 0x79f   : > { %v813_v44 = vmul.f32 %v809_v34, %v4244_v10 }
 0x7a1   : > { %v815_v35 = vsub.f32 %v4402_v28, %v813_v44 }
 0x7a3   : > { %v817_v12 = vmul.f32 %v815_v35, %v815_v35 }
 0x7a5   : > { %v819_v36 = vsel %vm290_vm1, %v817_v12, 0.0 }
 0x7a6   : > { %820 = vadd.xlane.f32.xlu1 %v819_v36 }
 0x7be   : > { %v812_v37 = vpop.xlane.xlu2 %811 }
 0x7bf   : > { %v814_v38 = vmul.f32 %v812_v37, %v4244_v10 }
 0x7c1   : > { %v4416_v39 = vsub.f32 %v4407_v32, %v814_v38 }
 0x7c3   : > { %v818_v16 = vmul.f32 %v4416_v39, %v4416_v39 }
 0x7c5   : > { %v822_v40 = vsel %vm294_vm0, %v818_v16, 0.0 }
 0x7c6   : > { %823 = vadd.xlane.f32.xlu2 %v822_v40 }
 0x819   : > { %v821_v54 = vpop.xlane.xlu1 %820 }
 0x81a   : > { %v825_v55 = vmul.f32 %v821_v54, %v4244_v10 }
 0x81c   : > { %v827_v56 = vadd.f32 1e-05, %v825_v55 }
 0x81e   : > { %3870 = vrsqrt.f32 %v827_v56  ;;  %vm835_vm6 = vweird.f32 %v827_v56 }
 0x824   : > { %v3871_v57 = vpop.eup %3870 }
 0x825   : > { %v830_v58 = vmul.f32 %v3871_v57, %v827_v56  ;;  %vm836_vm5 = vweird.f32 %v3871_v57 }
 0x826   : > { %vm837_vm7 = vmor %vm835_vm6, %vm836_vm5 }
 0x827   : > { %v831_v59 = vmul.f32 %v3871_v57, %v830_v58 }
 0x829   : > { %v832_v60 = vmul.f32 0.5, %v831_v59 }
 0x82b   : > { %v833_v62 = vsub.f32 1.5, %v832_v60 }
 0x82d   : > { %v834_v63 = vmul.f32 %v3871_v57, %v833_v62 }
 0x82f   : > { %v838_v3 = vsel %vm837_vm7, %v3871_v57, %v834_v63 }
 0x830   : > { %v849_v4 = vmul.f32 %v838_v3, %v815_v35 }
 0x832   : > { %v852_v6 = vmul.f32 %v851_v1, %v849_v4 }
 0x834   : > { %v855_v7 = vadd.f32 %v854_v5, %v852_v6 }
 0x836   : > { %3643 = vmatmul.msk.f32.vlgmr.msra.gmra.mxu2 %vm290_vm1, %v855_v7  ;;  %3645 = vmatmul.msk.f32.vlgmr.msra.gmra.mxu3 %vm290_vm1, %v855_v7 }
 0x837   : > { %3647 = vmatmul.msk.f32.vlgmr.msrb.gmra.mxu0 %vm290_vm1, %v855_v7 }
 0x839   : > { %v824_v8 = vpop.xlane.xlu2 %823 }
 0x83a   : > { %v826_v9 = vmul.f32 %v824_v8, %v4244_v10 }
 0x83c   : > { %v828_v11 = vadd.f32 1e-05, %v826_v9 }
 0x83e   : > { %3872 = vrsqrt.f32 %v828_v11  ;;  %vm845_vm13 = vweird.f32 %v828_v11 }
 0x844   : > { %v3873_v13 = vpop.eup %3872 }
 0x845   : > { %v840_v14 = vmul.f32 %v3873_v13, %v828_v11  ;;  %vm846_vm8 = vweird.f32 %v3873_v13 }
 0x846   : > { %vm847_vm14 = vmor %vm845_vm13, %vm846_vm8 }
 0x847   : > { %v841_v15 = vmul.f32 %v3873_v13, %v840_v14 }
 0x849   : > { %v842_v17 = vmul.f32 0.5, %v841_v15 }
 0x84b   : > { %v843_v18 = vsub.f32 1.5, %v842_v17 }
 0x84d   : > { %v844_v19 = vmul.f32 %v3873_v13, %v843_v18 }
 0x84f   : > { %v848_v2 = vsel %vm847_vm14, %v3873_v13, %v844_v19 }
 0x850   : > { %v850_v20 = vmul.f32 %v848_v2, %v4416_v39  ;;  %v3666_v2 = vld [vmem:[%s5311_s1 + $0x1a0] sm:$0xff] }
 0x852   : > { %v853_v21 = vmul.f32 %v851_v1, %v850_v20  ;;  %v3665_v20 = vld [vmem:[%s5311_s1 + $0x168] sm:$0xff] }
 0x854   : > { %v856_v22 = vadd.f32 %v854_v5, %v853_v21  ;;  %v3664_v21 = vld [vmem:[%s5311_s1 + $0x130] sm:$0xff] }
 0x856   : > { %3644 = vmatmul.msk.f32.gmra.mxu2 %vm290_vm1, %v856_v22  ;;  %3646 = vmatmul.msk.f32.gmra.mxu3 %vm290_vm1, %v856_v22 }
 0x857   : > { %3648 = vmatmul.msk.f32.gmra.mxu0 %vm290_vm1, %v856_v22  ;;  %v3663_v22 = vld [vmem:[%s5311_s1 + $0xf8] sm:$0xff] }
 0x8b4   : > { %v4475_v24 = vpop.f32.mrf.mxu0 }
 0x8b9   : > { %v892_v23 = vpop.f32.mrf.mxu2  ;;  %v915_v0 = vpop.f32.mrf.mxu3 }
 0x8ba   : > { %1039 = vrot.lane.b32.xlu1 %v915_v0, %s4137_s16  ;;  %1035 = vrot.lane.b32.xlu2 %v892_v23, %s4137_s16 }
 0x8d4   : > { %v941_v25 = vpop.f32.mrf.mxu0 }
 0x8d5   : > { %3653 = vmatpush.msk.msrb.mxu2 %vm504_vm10, %v941_v25 }
 0x8d7   : > { %1027 = vmatpush.msrb.mxu2 %v4475_v24 }
 0x8d9   : > { %v918_v26 = vpop.f32.mrf.mxu3  ;;  %v895_v27 = vpop.f32.mrf.mxu2 }
 0x8da   : > { %1041 = vrot.lane.b32.xlu0 %v918_v26, %s4137_s16  ;;  %3649 = vmatpush.xpose.msk.msra.mxu1 %vm436_vm9, %v918_v26 }
 0x8de   : > { %3650 = vmatpush.xpose.msk.msra.mxu1 %vm436_vm9, %v915_v0 }
 0x8e1   : > { %3651 = vmatmul.msk.f32.vlgmr.msra.gmra.mxu1 %vm436_vm9, %v892_v23 }
 0x8e2   : > { %1037 = vrot.lane.b32.xlu0 %v895_v27, %s4137_s16  ;;  %1161 = vmatpush.xpose.msrb.mxu1 %v3666_v2 }
 0x8e6   : > { %1162 = vmatpush.xpose.msrb.mxu1 %v3665_v20  ;;  %v3676_v20 = vld [vmem:[%s5311_s1 + $0x1b0] sm:$0xff] }
 0x8e9   : > { %3652 = vmatmul.msk.f32.gmra.mxu1 %vm436_vm9, %v895_v27 }
 0x8ea   : > { %1163 = vmatpush.xpose.msrb.mxu1 %v3664_v21  ;;  %v3675_v21 = vld [vmem:[%s5311_s1 + $0x178] sm:$0xff] }
 0x8ee   : > { %1164 = vmatpush.xpose.msrb.mxu1 %v3663_v22  ;;  %v3674_v22 = vld [vmem:[%s5311_s1 + $0x140] sm:$0xff] }
 0x914   : > { %v1036_v31 = vpop.permute.xlu2 %1035 }
 0x92c   : > { %v1040_v30 = vpop.permute.xlu1 %1039 }
 0x94c   : > { %v1042_v29 = vpop.permute.xlu0 %1041 }
 0x94d   : > { %3656 = vmatpush.xpose.msk.msrb.mxu3 %vm436_vm9, %v1042_v29 }
 0x951   : > { %3657 = vmatpush.xpose.msk.msrb.mxu3 %vm436_vm9, %v1040_v30 }
 0x954   : > { %3658 = vmatmul.msk.f32.vlgmr.msrb.gmra.mxu3 %vm436_vm9, %v1036_v31  ;;  %v1038_v33 = vpop.permute.xlu0 %1037  ;;  %v1174_v31 = vperm.slane %v4461_v61, 2 }
 0x955   : > { %1296 = vmatpush.xpose.msra.mxu3 %v3676_v20  ;;  %v3834_v20 = vld [vmem:[%s5313_s3 + $0x1] ss:$0 sm:$0xff] }
 0x959   : > { %1297 = vmatpush.xpose.msra.mxu3 %v3675_v21 }
 0x95c   : > { %3659 = vmatmul.msk.f32.gmra.mxu3 %vm436_vm9, %v1038_v33 }
 0x95d   : > { %1298 = vmatpush.xpose.msra.mxu3 %v3674_v22 }
 0x95e   : > { %v973_v34 = vpop.f32.mrf.mxu1 }
 0x95f   : > { %v979_v44 = vmul.f32 0.125, %v973_v34 }
 0x961   : > { %v981_v35 = vsel %vm474_vm11, %v979_v44, -inf }
 0x962   : > { %982 = vmax.xlane.f32.xlu2 %v981_v35 }
 0x966   : > { %v976_v39 = vpop.f32.mrf.mxu1 }
 0x967   : > { %v980_v40 = vmul.f32 0.125, %v976_v39 }
 0x969   : > { %v984_v45 = vsel %vm478_vm12, %v980_v40, -inf }
 0x97a   : > { %1101 = vrot.lane.b32.xlu2 %v941_v25, %s4137_s16 }
 0x9d5   : > { %v983_v12 = vpop.xlane.xlu2 %982 }
 0x9d6   : > { %v987_v52 = vsub.f32 %v979_v44, %v983_v12 }
 0x9d7   : > { %v1068_v36 = vpop.f32.mrf.mxu3 }
 0x9d8   : > { %v1074_v37 = vmul.f32 0.125, %v1068_v36  ;;  %v989_v55 = vmul.f32 1.442695, %v987_v52 }
 0x9da   : > { %v1076_v38 = vsel %vm474_vm11, %v1074_v37, -inf }
 0x9db   : > { %1077 = vmax.xlane.f32.xlu1 %v1076_v38 }
 0x9dd   : > { %v1102_v16 = vpop.permute.xlu2 %1101 }
 0x9de   : > { %3660 = vmatpush.msk.msra.mxu0 %vm504_vm10, %v1102_v16 }
 0x9df   : > { %v1071_v41 = vpop.f32.mrf.mxu3 }
 0x9e0   : > { %v1075_v42 = vmul.f32 0.125, %v1071_v41 }
 0x9e2   : > { %v1079_v43 = vsel %vm478_vm12, %v1075_v42, -inf }
 0x9e3   : > { %1080 = vmax.xlane.f32.xlu0 %v1079_v43  ;;  %985 = vmax.xlane.f32.xlu1 %v984_v45 }
 0xa4e   : > { %v1078_v46 = vpop.xlane.xlu1 %1077 }
 0xa4f   : > { %v1082_v47 = vsub.f32 %v1074_v37, %v1078_v46 }
 0xa51   : > { %v1084_v48 = vmul.f32 1.442695, %v1082_v47  ;;  %v3670_v47 = vld [vmem:[%s5311_s1 + $0x1a8] sm:$0xff] }
 0xa52   : > { %1250 = vmatpush.msra.mxu2 %v3670_v47 }
 0xa53   : > { %3874 = vpow2.f32 %v1084_v48  ;;  %v3669_v48 = vld [vmem:[%s5311_s1 + $0x170] sm:$0xff] }
 0xa54   : > { %1251 = vmatpush.msra.mxu2 %v3669_v48 }
 0xa56   : > { %v1081_v49 = vpop.xlane.xlu0 %1080  ;;  %v986_v56 = vpop.xlane.xlu1 %985 }
 0xa57   : > { %v1083_v50 = vsub.f32 %v1075_v42, %v1081_v49  ;;  %v988_v58 = vsub.f32 %v980_v40, %v986_v56  ;;  %v3668_v49 = vld [vmem:[%s5311_s1 + $0x138] sm:$0xff] }
 0xa58   : > { %1252 = vmatpush.msra.mxu2 %v3668_v49 }
 0xa59   : > { %v3875_v51 = vpop.eup %3874  ;;  %v1086_v53 = vmul.f32 1.442695, %v1083_v50  ;;  %v991_v60 = vmul.f32 1.442695, %v988_v58  ;;  %v3667_v50 = vld [vmem:[%s5311_s1 + $0x100] sm:$0xff] }
 0xa5a   : > { %v1088_v54 = vsel %vm474_vm11, %v3875_v51, 0.0  ;;  %1253 = vmatpush.msra.mxu2 %v3667_v50 }
 0xa5b   : > { %3876 = vpow2.f32 %v1086_v53  ;;  %1089 = vadd.xlane.f32.xlu0 %v1088_v54 }
 0xa5c   : > { %3878 = vpow2.f32 %v989_v55 }
 0xa5d   : > { %3880 = vpow2.f32 %v991_v60  ;;  %v1221_v60 = vperm.slane %v4461_v61, 3 }
 0xa61   : > { %v3877_v57 = vpop.eup %3876 }
 0xa62   : > { %v1091_v59 = vsel %vm478_vm12, %v3877_v57, 0.0  ;;  %v3879_v62 = vpop.eup %3878 }
 0xa63   : > { %1092 = vadd.xlane.f32.xlu1 %v1091_v59  ;;  %v993_v63 = vsel %vm474_vm11, %v3879_v62, 0.0  ;;  %v3881_v1 = vpop.eup %3880 }
 0xa64   : > { %v996_v3 = vsel %vm478_vm12, %v3881_v1, 0.0 }
 0xa6b   : > { %994 = vadd.xlane.f32.xlu1 %v993_v63 }
 0xa6f   : > { %1099 = vrot.lane.b32.xlu0 %v4475_v24, %s4137_s16 }
 0xa73   : > { %997 = vadd.xlane.f32.xlu1 %v996_v3 }
 0xace   : > { %v1090_v4 = vpop.xlane.xlu0 %1089 }
 0xacf   : > { %3882 = vrcp.f32 %v1090_v4 }
 0xad5   : > { %v3883_v6 = vpop.eup %3882 }
 0xad6   : > { %v1093_v5 = vpop.xlane.xlu1 %1092  ;;  %v1096_v8 = vmul.f32 %v3883_v6, %v3875_v51 }
 0xade   : > { %v995_v7 = vpop.xlane.xlu1 %994 }
 0xadf   : > { %3884 = vrcp.f32 %v995_v7 }
 0xae0   : > { %3886 = vrcp.f32 %v1093_v5 }
 0xae1   : > { %v1100_v9 = vpop.permute.xlu0 %1099 }
 0xae2   : > { %1127 = vmatpush.msra.mxu0 %v1100_v9 }
 0xae3   : > { %3661 = vmatmul.msk.f32.vlgmr.msra.gmra.mxu0 %vm474_vm11, %v1096_v8 }
 0xae5   : > { %v3885_v11 = vpop.eup %3884 }
 0xae6   : > { %v3887_v13 = vpop.eup %3886  ;;  %v1001_v14 = vmul.f32 %v3885_v11, %v3879_v62  ;;  %v998_v15 = vpop.xlane.xlu1 %997 }
 0xae7   : > { %3888 = vrcp.f32 %v998_v15  ;;  %v1097_v17 = vmul.f32 %v3887_v13, %v3877_v57 }
 0xae8   : > { %3654 = vmatmul.msk.f32.vlgmr.msrb.gmra.mxu2 %vm474_vm11, %v1001_v14 }
 0xaeb   : > { %3662 = vmatmul.msk.f32.gmra.mxu0 %vm474_vm11, %v1097_v17 }
 0xaed   : > { %v3889_v18 = vpop.eup %3888 }
 0xaee   : > { %v1002_v19 = vmul.f32 %v3889_v18, %v3881_v1  ;;  %v1224_v1 = vperm.slane %v4461_v61, 4 }
 0xaf0   : > { %3655 = vmatmul.msk.f32.gmra.mxu2 %vm474_vm11, %v1002_v19 }
 0xb60   : > { %v1129_v23 = vpop.f32.mrf.mxu0 }
 0xb61   : > { %1137 = vrot.lane.b32.xlu2 %v1129_v23, %s4137_s16  ;;  %v3673_v23 = vld [vmem:[%s5311_s1 + $0x108] sm:$0xff] }
 0xb62   : > { %1299 = vmatpush.xpose.msra.mxu3 %v3673_v23  ;;  %v4617_v23 = vld [vmem:[%s5313_s3 + $0x22] sm:$0xff] }
 0xb68   : > { %v1132_v0 = vpop.f32.mrf.mxu0 }
 0xb69   : > { %1139 = vrot.lane.b32.xlu0 %v1132_v0, %s4137_s16  ;;  %v1231_v0 = vperm.slane %v4461_v61, 6 }
 0xb6b   : > { %v1029_v24 = vpop.f32.mrf.mxu2 }
 0xb73   : > { %v1032_v27 = vpop.f32.mrf.mxu2 }
 0xbbb   : > { %v1138_v25 = vpop.permute.xlu2 %1137 }
 0xbbc   : > { %v1143_v26 = vsel %vm436_vm9, %v1029_v24, %v1138_v25 }
 0xbbd   : > { %1165 = vmatmul.f32.vlgmr.msrb.gmra.mxu1 %v1143_v26 }
 0xbdb   : > { %v1140_v29 = vpop.permute.xlu0 %1139 }
 0xbdc   : > { %v1144_v30 = vsel %vm436_vm9, %v1032_v27, %v1140_v29 }
 0xbdd   : > { %1168 = vmatmul.f32.gmra.mxu1 %v1144_v30 }
 0xc3a   : > { %v1166_v33 = vpop.f32.mrf.mxu1 }
 0xc3b   : > { %v1172_v34 = vadd.f32 %v1166_v33, %v4402_v28 }
 0xc3d   : > { %v4523_v44 = vadd.f32 %v1174_v31, %v1172_v34 }
 0xc3f   : > { %v1177_v35 = vsel %vm290_vm1, %v4523_v44, 0.0 }
 0xc40   : > { %1178 = vadd.xlane.f32.xlu1 %v1177_v35 }
 0xc5a   : > { %v1169_v12 = vpop.f32.mrf.mxu1 }
 0xc5b   : > { %v1173_v36 = vadd.f32 %v1169_v12, %v4407_v32 }
 0xc5d   : > { %v4528_v37 = vadd.f32 %v1174_v31, %v1173_v36 }
 0xc5f   : > { %v1180_v38 = vsel %vm294_vm0, %v4528_v37, 0.0 }
 0xc60   : > { %1181 = vadd.xlane.f32.xlu2 %v1180_v38 }
 0xcb3   : > { %v1179_v39 = vpop.xlane.xlu1 %1178 }
 0xcb4   : > { %v1183_v16 = vmul.f32 %v1179_v39, %v4244_v10 }
 0xcb6   : > { %v1185_v28 = vsub.f32 %v4523_v44, %v1183_v16 }
 0xcb8   : > { %v1187_v40 = vmul.f32 %v1185_v28, %v1185_v28 }
 0xcba   : > { %v1189_v41 = vsel %vm290_vm1, %v1187_v40, 0.0 }
 0xcbb   : > { %1190 = vadd.xlane.f32.xlu0 %v1189_v41 }
 0xcd3   : > { %v1182_v42 = vpop.xlane.xlu2 %1181 }
 0xcd4   : > { %v1184_v43 = vmul.f32 %v1182_v42, %v4244_v10 }
 0xcd6   : > { %v1186_v32 = vsub.f32 %v4528_v37, %v1184_v43 }
 0xcd8   : > { %v1188_v45 = vmul.f32 %v1186_v32, %v1186_v32 }
 0xcda   : > { %v1192_v46 = vsel %vm294_vm0, %v1188_v45, 0.0 }
 0xcdb   : > { %1193 = vadd.xlane.f32.xlu1 %v1192_v46  ;;  %v1283_v46 = vperm.slane %v4461_v61, 5 }
 0xd2e   : > { %v1191_v51 = vpop.xlane.xlu0 %1190 }
 0xd2f   : > { %v1195_v52 = vmul.f32 %v1191_v51, %v4244_v10 }
 0xd31   : > { %v1197_v53 = vadd.f32 1e-05, %v1195_v52 }
 0xd33   : > { %3890 = vrsqrt.f32 %v1197_v53  ;;  %vm1205_vm2 = vweird.f32 %v1197_v53 }
 0xd39   : > { %v3891_v54 = vpop.eup %3890 }
 0xd3a   : > { %v1200_v55 = vmul.f32 %v3891_v54, %v1197_v53  ;;  %vm1206_vm15 = vweird.f32 %v3891_v54 }
 0xd3b   : > { %vm1207_vm3 = vmor %vm1205_vm2, %vm1206_vm15 }
 0xd3c   : > { %v1201_v56 = vmul.f32 %v3891_v54, %v1200_v55 }
 0xd3e   : > { %v1202_v57 = vmul.f32 0.5, %v1201_v56 }
 0xd40   : > { %v1203_v58 = vsub.f32 1.5, %v1202_v57 }
 0xd42   : > { %v1204_v59 = vmul.f32 %v3891_v54, %v1203_v58 }
 0xd44   : > { %v1208_v62 = vsel %vm1207_vm3, %v3891_v54, %v1204_v59 }
 0xd45   : > { %v1219_v63 = vmul.f32 %v1208_v62, %v1185_v28 }
 0xd47   : > { %v1222_v3 = vmul.f32 %v1221_v60, %v1219_v63  ;;  %v1364_v63 = vld [vmem:[%s5313_s3 + $0x1a] sm:$0xff] }
 0xd48   : > { %1385 = vmatpush.msrb.mxu0 %v1364_v63 }
 0xd49   : > { %v1225_v4 = vadd.f32 %v1224_v1, %v1222_v3  ;;  %v1362_v3 = vld [vmem:[%s5313_s3 + $0xa] sm:$0xff] }
 0xd4b   : > { %3671 = vmatmul.msk.f32.vlgmr.msra.gmra.mxu2 %vm290_vm1, %v1225_v4  ;;  %v1361_v4 = vld [vmem:[%s5313_s3 + $0x2] sm:$0xff] }
 0xd4e   : > { %v1194_v5 = vpop.xlane.xlu1 %1193 }
 0xd4f   : > { %v1196_v6 = vmul.f32 %v1194_v5, %v4244_v10 }
 0xd51   : > { %v1198_v7 = vadd.f32 1e-05, %v1196_v6 }
 0xd53   : > { %3892 = vrsqrt.f32 %v1198_v7  ;;  %vm1215_vm5 = vweird.f32 %v1198_v7 }
 0xd59   : > { %v3893_v8 = vpop.eup %3892 }
 0xd5a   : > { %v1210_v9 = vmul.f32 %v3893_v8, %v1198_v7  ;;  %vm1216_vm4 = vweird.f32 %v3893_v8 }
 0xd5b   : > { %vm1217_vm6 = vmor %vm1215_vm5, %vm1216_vm4 }
 0xd5c   : > { %v1211_v11 = vmul.f32 %v3893_v8, %v1210_v9 }
 0xd5e   : > { %v1212_v13 = vmul.f32 0.5, %v1211_v11 }
 0xd60   : > { %v1213_v14 = vsub.f32 1.5, %v1212_v13 }
 0xd62   : > { %v1214_v15 = vmul.f32 %v3893_v8, %v1213_v14 }
 0xd64   : > { %v1218_v17 = vsel %vm1217_vm6, %v3893_v8, %v1214_v15 }
 0xd65   : > { %v1220_v18 = vmul.f32 %v1218_v17, %v1186_v32  ;;  %v3833_v17 = vld [vmem:[%s5313_s3] ss:$0 sm:$0xff] }
 0xd67   : > { %v1223_v19 = vmul.f32 %v1221_v60, %v1220_v18 }
 0xd69   : > { %v1226_v2 = vadd.f32 %v1224_v1, %v1223_v19  ;;  %v1363_v1 = vld [vmem:[%s5313_s3 + $0x12] sm:$0xff]  ;;  %v4601_v19 = vld [vmem:[%s5313_s3 + $0x2a] sm:$0xff] }
 0xd6a   : > { %1386 = vmatpush.msrb.mxu0 %v1363_v1  ;;  %1416 = vmatpush.msra.mxu1 %v4601_v19 }
 0xd6b   : > { %3672 = vmatmul.msk.f32.gmra.mxu2 %vm290_vm1, %v1226_v2  ;;  %1549 = vmatpush.msrb.mxu3 %v4601_v19 }
 0xd6c   : > { %1387 = vmatpush.msrb.mxu0 %v1362_v3  ;;  %1479 = vmatpush.msrb.mxu2 %v4601_v19 }
 0xd6d   : > { %1417 = vmatpush.msra.mxu1 %v4617_v23  ;;  %1550 = vmatpush.msrb.mxu3 %v4617_v23 }
 0xd6e   : > { %1388 = vmatpush.msrb.mxu0 %v1361_v4  ;;  %1480 = vmatpush.msrb.mxu2 %v4617_v23 }
 0xd6f   : > { %1619 = vmatpush.msrb.mxu1 %v4601_v19 }
 0xd70   : > { %1829 = vmatpush.msra.mxu0 %v4601_v19  ;;  %1689 = vmatpush.msra.mxu2 %v4601_v19 }
 0xd71   : > { %1620 = vmatpush.msrb.mxu1 %v4617_v23 }
 0xd72   : > { %1830 = vmatpush.msra.mxu0 %v4617_v23  ;;  %1690 = vmatpush.msra.mxu2 %v4617_v23 }
 0xdce   : > { %v1255_v24 = vpop.f32.mrf.mxu2 }
 0xdcf   : > { %v1256_v25 = vadd.f32 %v1255_v24, %v1231_v0 }
 0xdd1   : > { %v1263_v26 = vmul.f32 0.044715, %v1256_v25  ;;  %v1261_v34 = vmul.f32 0.5, %v1256_v25 }
 0xdd3   : > { %v1265_v27 = vmul.f32 %v1263_v26, %v1256_v25 }
 0xdd5   : > { %v1267_v29 = vmul.f32 %v1265_v27, %v1256_v25 }
 0xdd7   : > { %v1269_v30 = vadd.f32 %v1267_v29, %v1256_v25 }
 0xdd9   : > { %v1271_v31 = vmul.f32 0.7978846, %v1269_v30 }
 0xddb   : > { %3894 = vtanh.f32 %v1271_v31 }
 0xde1   : > { %v3895_v33 = vpop.eup %3894 }
 0xde2   : > { %v1275_v35 = vadd.f32 1.0, %v3895_v33 }
 0xde4   : > { %v1277_v12 = vmul.f32 %v1275_v35, %v1261_v34 }
 0xde6   : > { %1300 = vmatmul.f32.vlgmr.msra.gmra.mxu3 %v1277_v12 }
 0xde7   : > { %1759 = vmatpush.msra.mxu3 %v4601_v19 }
 0xde9   : > { %1760 = vmatpush.msra.mxu3 %v4617_v23 }
 0xdee   : > { %v1258_v36 = vpop.f32.mrf.mxu2 }
 0xdef   : > { %v1259_v38 = vadd.f32 %v1258_v36, %v1231_v0  ;;  %v4138_v0 = vmov 0.0  }
 0xdf0   : > { %1418 = vmatmul.f32.vlgmr.msra.gmra.mxu1 %v4138_v0 }
 0xdf1   : > { %v1264_v39 = vmul.f32 0.044715, %v1259_v38  ;;  %v1262_v43 = vmul.f32 0.5, %v1259_v38  ;;  %1899 = vmatpush.msra.mxu1 %v4601_v19 }
 0xdf3   : > { %v1266_v16 = vmul.f32 %v1264_v39, %v1259_v38  ;;  %1900 = vmatpush.msra.mxu1 %v4617_v23  ;;  %v3835_v39 = vld [vmem:[%s5313_s3 + $0x32] ss:$0 sm:$0xff] }
 0xdf5   : > { %v1268_v28 = vmul.f32 %v1266_v16, %v1259_v38 }
 0xdf7   : > { %v1270_v40 = vadd.f32 %v1268_v28, %v1259_v38 }
 0xdf9   : > { %v1272_v41 = vmul.f32 0.7978846, %v1270_v40 }
 0xdfb   : > { %3896 = vtanh.f32 %v1272_v41 }
 0xe01   : > { %v3897_v42 = vpop.eup %3896 }
 0xe02   : > { %v1276_v32 = vadd.f32 1.0, %v3897_v42 }
 0xe04   : > { %v1278_v45 = vmul.f32 %v1276_v32, %v1262_v43 }
 0xe06   : > { %1303 = vmatmul.f32.gmra.mxu3 %v1278_v45 }
 0xe69   : > { %v1301_v47 = vpop.f32.mrf.mxu3 }
 0xe6a   : > { %v1302_v48 = vadd.f32 %v1301_v47, %v1283_v46 }
 0xe6c   : > { %v1307_v49 = vadd.f32 %v1302_v48, %v4523_v44 }
 0xe6d   : > { %v1419_v41 = vpop.f32.mrf.mxu1 }
 0xe6e   : > { %v1311_v50 = vsel %vm290_vm1, %v1307_v49, 0.0 }
 0xe6f   : > { %1312 = vadd.xlane.f32.xlu1 %v1311_v50 }
 0xe89   : > { %v1304_v51 = vpop.f32.mrf.mxu3 }
 0xe8a   : > { %v1305_v52 = vadd.f32 %v1304_v51, %v1283_v46 }
 0xe8c   : > { %v1308_v53 = vadd.f32 %v1305_v52, %v4528_v37 }
 0xe8e   : > { %v1314_v54 = vsel %vm294_vm0, %v1308_v53, 0.0 }
 0xe8f   : > { %1315 = vadd.xlane.f32.xlu1 %v1314_v54 }
 0xee2   : > { %v1313_v55 = vpop.xlane.xlu1 %1312 }
 0xee3   : > { %v1317_v56 = vmul.f32 %v1313_v55, %v4244_v10 }
 0xee5   : > { %v1319_v57 = vsub.f32 %v1307_v49, %v1317_v56 }
 0xee7   : > { %v1321_v58 = vmul.f32 %v1319_v57, %v1319_v57 }
 0xee9   : > { %v1323_v61 = vsel %vm290_vm1, %v1321_v58, 0.0 }
 0xeea   : > { %1324 = vadd.xlane.f32.xlu1 %v1323_v61 }
 0xf02   : > { %v1316_v59 = vpop.xlane.xlu1 %1315 }
 0xf03   : > { %v1318_v44 = vmul.f32 %v1316_v59, %v4244_v10 }
 0xf05   : > { %v4577_v60 = vsub.f32 %v1308_v53, %v1318_v44 }
 0xf07   : > { %v1322_v62 = vmul.f32 %v4577_v60, %v4577_v60 }
 0xf09   : > { %v1326_v37 = vsel %vm294_vm0, %v1322_v62, 0.0 }
 0xf0a   : > { %1327 = vadd.xlane.f32.xlu1 %v1326_v37 }
 0xf5d   : > { %v1325_v5 = vpop.xlane.xlu1 %1324 }
 0xf5e   : > { %v1329_v6 = vmul.f32 %v1325_v5, %v4244_v10 }
 0xf60   : > { %v1331_v7 = vadd.f32 1e-05, %v1329_v6 }
 0xf62   : > { %3898 = vrsqrt.f32 %v1331_v7  ;;  %vm1339_vm8 = vweird.f32 %v1331_v7 }
 0xf68   : > { %v3899_v8 = vpop.eup %3898 }
 0xf69   : > { %v1334_v9 = vmul.f32 %v3899_v8, %v1331_v7  ;;  %vm1340_vm7 = vweird.f32 %v3899_v8 }
 0xf6a   : > { %vm1341_vm13 = vmor %vm1339_vm8, %vm1340_vm7  ;;  %vm1398_vm7 = vcmask 130048  }
 0xf6b   : > { %v1335_v11 = vmul.f32 %v3899_v8, %v1334_v9 }
 0xf6d   : > { %v1336_v13 = vmul.f32 0.5, %v1335_v11 }
 0xf6f   : > { %v1337_v14 = vsub.f32 1.5, %v1336_v13 }
 0xf71   : > { %v1338_v15 = vmul.f32 %v3899_v8, %v1337_v14 }
 0xf73   : > { %v1342_v18 = vsel %vm1341_vm13, %v3899_v8, %v1338_v15 }
 0xf74   : > { %v1353_v2 = vmul.f32 %v1342_v18, %v1319_v57 }
 0xf76   : > { %v1356_v21 = vmul.f32 %v3833_v17, %v1353_v2 }
 0xf78   : > { %v4610_v22 = vadd.f32 %v3834_v20, %v1356_v21 }
 0xf7a   : > { %3677 = vmatmul.msk.f32.vlgmr.msrb.gmra.mxu0 %vm290_vm1, %v4610_v22 }
 0xf7d   : > { %v1328_v24 = vpop.xlane.xlu1 %1327 }
 0xf7e   : > { %v1330_v25 = vmul.f32 %v1328_v24, %v4244_v10 }
 0xf80   : > { %v1332_v26 = vadd.f32 1e-05, %v1330_v25 }
 0xf82   : > { %3900 = vrsqrt.f32 %v1332_v26  ;;  %vm1349_vm15 = vweird.f32 %v1332_v26 }
 0xf88   : > { %v3901_v27 = vpop.eup %3900 }
 0xf89   : > { %v1344_v29 = vmul.f32 %v3901_v27, %v1332_v26  ;;  %vm1350_vm14 = vweird.f32 %v3901_v27 }
 0xf8a   : > { %vm1351_vm2 = vmor %vm1349_vm15, %vm1350_vm14 }
 0xf8b   : > { %v1345_v30 = vmul.f32 %v3901_v27, %v1344_v29 }
 0xf8d   : > { %v1346_v31 = vmul.f32 0.5, %v1345_v30 }
 0xf8f   : > { %v1347_v33 = vsub.f32 1.5, %v1346_v31 }
 0xf91   : > { %v1348_v34 = vmul.f32 %v3901_v27, %v1347_v33 }
 0xf93   : > { %v1352_v35 = vsel %vm1351_vm2, %v3901_v27, %v1348_v34 }
 0xf94   : > { %v1354_v12 = vmul.f32 %v1352_v35, %v4577_v60 }
 0xf96   : > { %v1357_v36 = vmul.f32 %v3833_v17, %v1354_v12 }
 0xf98   : > { %v1360_v38 = vadd.f32 %v3834_v20, %v1357_v36 }
 0xf9a   : > { %3678 = vmatmul.msk.f32.gmra.mxu0 %vm290_vm1, %v1360_v38 }
 0xff7   : > { %v1390_v16 = vpop.f32.mrf.mxu0 }
 0xff8   : > { %v4637_v28 = vadd.f32 %v3835_v39, %v1390_v16 }
0x1017   : > { %v1393_v40 = vpop.f32.mrf.mxu0 }
0x1018   : > { %v1394_v42 = vadd.f32 %v3835_v39, %v1393_v40 }
0x101a   : > { %v1422_v43 = vadd.f32 %v1419_v41, %v1394_v42 }
0x101c   : > { %3902 = vtanh.f32 %v1422_v43  ;;  %v3679_v45 = vmul.f32 -1.442695, %v1422_v43 }
0x101e   : > { %3904 = vpow2.f32 %v3679_v45 }
0x1022   : > { %v3903_v32 = vpop.eup %3902 }
0x1023   : > { %1445 = vrot.lane.b32.xlu2 %v3903_v32, %s4139_s18 }
0x1024   : > { %v3905_v46 = vpop.eup %3904 }
0x1025   : > { %v1426_v47 = vadd.f32 1.0, %v3905_v46 }
0x1027   : > { %3906 = vrcp.f32 %v1426_v47  ;;  %v1438_v53 = vand.u32 2147483648, %v1426_v47  ;;  %vm1432_vm4 = vweird.f32 %v1426_v47  ;;  %v1436_v54 = vand.u32 2147483647, %v1426_v47 }
0x1029   : > { %v1439_v56 = vor.u32 1.1754944e-38, %v1438_v53  ;;  %vm1437_vm6 = vcmp.eq.f32.partialorder %v1436_v54, 8.507059e+37 }
0x102d   : > { %v3907_v48 = vpop.eup %3906 }
0x102e   : > { %v1428_v49 = vmul.f32 %v3907_v48, %v1426_v47  ;;  %vm1433_vm3 = vweird.f32 %v3907_v48 }
0x102f   : > { %vm1434_vm5 = vmor %vm1432_vm4, %vm1433_vm3 }
0x1030   : > { %v1429_v50 = vsub.f32 1.0, %v1428_v49 }
0x1032   : > { %v1430_v51 = vmul.f32 %v3907_v48, %v1429_v50 }
0x1034   : > { %v1431_v52 = vadd.f32 %v3907_v48, %v1430_v51 }
0x1036   : > { %v1435_v55 = vsel %vm1434_vm5, %v3907_v48, %v1431_v52 }
0x1037   : > { %v1440_v58 = vsel %vm1437_vm6, %v1439_v56, %v1435_v55 }
0x1038   : > { %v1443_v59 = vmul.f32 0.0, %v1440_v58 }
0x107d   : > { %v1446_v57 = vpop.permute.xlu2 %1445 }
0x107e   : > { %v1448_v61 = vmul.f32 %v1446_v57, %v1440_v58 }
0x1080   : > { %1450 = vrot.lane.b32.xlu0 %v1448_v61, %s4140_s19 }
0x10f2   : > { %v1451_v44 = vpop.permute.xlu0 %1450 }
0x10f3   : > { %v1453_v60 = vadd.f32 %v1451_v44, %v1443_v59 }
0x10f5   : > { %3908 = vtanh.f32 %v1453_v60  ;;  %v1510_v24 = vrot.slane %v1453_v60, 1 }
0x10fb   : > { %v3909_v62 = vpop.eup %3908 }
0x10fc   : > { %1456 = vrot.lane.b32.xlu1 %v3909_v62, %s4141_s20 }
0x116e   : > { %v1457_v37 = vpop.permute.xlu1 %1456 }
0x116f   : > { %v1459_v63 = vmul.f32 %v1457_v37, %v1440_v58 }
0x1171   : > { %1461 = vrot.lane.b32.xlu0 %v1459_v63, %s4142_s21 }
0x11e3   : > { %v1462_v1 = vpop.permute.xlu0 %1461 }
0x11e4   : > { %3680 = vmatmul.msk.f32.vlgmr.msrb.gmra.mxu2 %vm1398_vm7, %v1462_v1 }
0x11e5   : > { %1969 = vmatpush.msrb.mxu2 %v4601_v19 }
0x11e7   : > { %1970 = vmatpush.msrb.mxu2 %v4617_v23 }
0x1267   : > { %v1482_v3 = vpop.f32.mrf.mxu2 }
0x1268   : > { %v1486_v4 = vrot.slane %v1482_v3, 1 }
0x126a   : > { %v1488_v5 = vadd.f32 %v1486_v4, %v4637_v28 }
0x126c   : > { %3910 = vtanh.f32 %v1488_v5  ;;  %v3681_v7 = vmul.f32 -1.442695, %v1488_v5 }
0x126e   : > { %3912 = vpow2.f32 %v3681_v7 }
0x1272   : > { %v3911_v6 = vpop.eup %3910 }
0x1273   : > { %1514 = vrot.lane.b32.xlu2 %v3911_v6, %s4139_s18 }
0x1274   : > { %v3913_v8 = vpop.eup %3912 }
0x1275   : > { %v1492_v9 = vadd.f32 1.0, %v3913_v8 }
0x1277   : > { %3914 = vrcp.f32 %v1492_v9  ;;  %v1504_v18 = vand.u32 2147483648, %v1492_v9  ;;  %vm1498_vm13 = vweird.f32 %v1492_v9  ;;  %v1502_v19 = vand.u32 2147483647, %v1492_v9 }
0x1279   : > { %v1505_v20 = vor.u32 1.1754944e-38, %v1504_v18  ;;  %vm1503_vm15 = vcmp.eq.f32.partialorder %v1502_v19, 8.507059e+37 }
0x127d   : > { %v3915_v11 = vpop.eup %3914 }
0x127e   : > { %v1494_v13 = vmul.f32 %v3915_v11, %v1492_v9  ;;  %vm1499_vm8 = vweird.f32 %v3915_v11 }
0x127f   : > { %vm1500_vm14 = vmor %vm1498_vm13, %vm1499_vm8 }
0x1280   : > { %v1495_v14 = vsub.f32 1.0, %v1494_v13 }
0x1282   : > { %v1496_v15 = vmul.f32 %v3915_v11, %v1495_v14 }
0x1284   : > { %v1497_v17 = vadd.f32 %v3915_v11, %v1496_v15 }
0x1286   : > { %v1501_v2 = vsel %vm1500_vm14, %v3915_v11, %v1497_v17 }
0x1287   : > { %v1506_v23 = vsel %vm1503_vm15, %v1505_v20, %v1501_v2 }
0x1288   : > { %v1512_v25 = vmul.f32 %v1510_v24, %v1506_v23 }
0x12cd   : > { %v1515_v21 = vpop.permute.xlu2 %1514 }
0x12ce   : > { %v1517_v0 = vmul.f32 %v1515_v21, %v1506_v23 }
0x12d0   : > { %1519 = vrot.lane.b32.xlu1 %v1517_v0, %s4140_s19 }
0x1342   : > { %v1520_v26 = vpop.permute.xlu1 %1519 }
0x1343   : > { %v1522_v27 = vadd.f32 %v1520_v26, %v1512_v25 }
0x1345   : > { %3916 = vtanh.f32 %v1522_v27  ;;  %v1580_v53 = vrot.slane %v1522_v27, 1 }
0x134b   : > { %v3917_v29 = vpop.eup %3916 }
0x134c   : > { %1525 = vrot.lane.b32.xlu0 %v3917_v29, %s4141_s20 }
0x13be   : > { %v1526_v30 = vpop.permute.xlu0 %1525 }
0x13bf   : > { %v1528_v31 = vmul.f32 %v1526_v30, %v1506_v23 }
0x13c1   : > { %v1530_v33 = vrot.slane %v1528_v31, 7 }
0x13c3   : > { %1531 = vrot.lane.b32.xlu2 %v1530_v33, %s4142_s21 }
0x141d   : > { %v1532_v34 = vpop.permute.xlu2 %1531 }
0x141e   : > { %3682 = vmatmul.msk.f32.vlgmr.msrb.gmra.mxu3 %vm1398_vm7, %v1532_v34 }
0x14a1   : > { %v1552_v35 = vpop.f32.mrf.mxu3 }
0x14a2   : > { %v1556_v12 = vrot.slane %v1552_v35, 2 }
0x14a4   : > { %v1558_v36 = vadd.f32 %v1556_v12, %v4637_v28 }
0x14a6   : > { %3918 = vtanh.f32 %v1558_v36  ;;  %v3683_v39 = vmul.f32 -1.442695, %v1558_v36 }
0x14a8   : > { %3920 = vpow2.f32 %v3683_v39 }
0x14ac   : > { %v3919_v38 = vpop.eup %3918 }
0x14ad   : > { %1584 = vrot.lane.b32.xlu1 %v3919_v38, %s4139_s18 }
0x14ae   : > { %v3921_v16 = vpop.eup %3920 }
0x14af   : > { %v1562_v40 = vadd.f32 1.0, %v3921_v16 }
0x14b1   : > { %3922 = vrcp.f32 %v1562_v40  ;;  %v1574_v46 = vand.u32 2147483648, %v1562_v40  ;;  %vm1568_vm3 = vweird.f32 %v1562_v40  ;;  %v1572_v47 = vand.u32 2147483647, %v1562_v40 }
0x14b3   : > { %v1575_v49 = vor.u32 1.1754944e-38, %v1574_v46  ;;  %vm1573_vm5 = vcmp.eq.f32.partialorder %v1572_v47, 8.507059e+37 }
0x14b7   : > { %v3923_v41 = vpop.eup %3922 }
0x14b8   : > { %v1564_v42 = vmul.f32 %v3923_v41, %v1562_v40  ;;  %vm1569_vm2 = vweird.f32 %v3923_v41 }
0x14b9   : > { %vm1570_vm4 = vmor %vm1568_vm3, %vm1569_vm2 }
0x14ba   : > { %v1565_v43 = vsub.f32 1.0, %v1564_v42 }
0x14bc   : > { %v1566_v32 = vmul.f32 %v3923_v41, %v1565_v43 }
0x14be   : > { %v1567_v45 = vadd.f32 %v3923_v41, %v1566_v32 }
0x14c0   : > { %v1571_v48 = vsel %vm1570_vm4, %v3923_v41, %v1567_v45 }
0x14c1   : > { %v1576_v51 = vsel %vm1573_vm5, %v1575_v49, %v1571_v48 }
0x14c2   : > { %v1582_v54 = vmul.f32 %v1580_v53, %v1576_v51 }
0x151f   : > { %v1585_v50 = vpop.permute.xlu1 %1584 }
0x1520   : > { %v1587_v52 = vmul.f32 %v1585_v50, %v1576_v51 }
0x1522   : > { %1589 = vrot.lane.b32.xlu0 %v1587_v52, %s4140_s19 }
0x1594   : > { %v1590_v55 = vpop.permute.xlu0 %1589 }
0x1595   : > { %v1592_v56 = vadd.f32 %v1590_v55, %v1582_v54 }
0x1597   : > { %3924 = vtanh.f32 %v1592_v56  ;;  %v1650_v2 = vrot.slane %v1592_v56, 1 }
0x159d   : > { %v3925_v57 = vpop.eup %3924 }
0x159e   : > { %1595 = vrot.lane.b32.xlu2 %v3925_v57, %s4141_s20 }
0x15f8   : > { %v1596_v58 = vpop.permute.xlu2 %1595 }
0x15f9   : > { %v1598_v61 = vmul.f32 %v1596_v58, %v1576_v51 }
0x15fb   : > { %v1600_v59 = vrot.slane %v1598_v61, 6 }
0x15fd   : > { %1601 = vrot.lane.b32.xlu1 %v1600_v59, %s4142_s21 }
0x166f   : > { %v1602_v44 = vpop.permute.xlu1 %1601 }
0x1670   : > { %3684 = vmatmul.msk.f32.vlgmr.msrb.gmra.mxu1 %vm1398_vm7, %v1602_v44 }
0x16ed   : > { %v1622_v60 = vpop.f32.mrf.mxu1 }
0x16ee   : > { %v1626_v62 = vrot.slane %v1622_v60, 3 }
0x16f0   : > { %v1628_v37 = vadd.f32 %v1626_v62, %v4637_v28 }
0x16f2   : > { %3926 = vtanh.f32 %v1628_v37  ;;  %v3685_v1 = vmul.f32 -1.442695, %v1628_v37 }
0x16f4   : > { %3928 = vpow2.f32 %v3685_v1 }
0x16f8   : > { %v3927_v63 = vpop.eup %3926 }
0x16f9   : > { %1654 = vrot.lane.b32.xlu0 %v3927_v63, %s4139_s18 }
0x16fa   : > { %v3929_v3 = vpop.eup %3928 }
0x16fb   : > { %v1632_v4 = vadd.f32 1.0, %v3929_v3 }
0x16fd   : > { %3930 = vrcp.f32 %v1632_v4  ;;  %v1644_v11 = vand.u32 2147483648, %v1632_v4  ;;  %vm1638_vm8 = vweird.f32 %v1632_v4  ;;  %v1642_v13 = vand.u32 2147483647, %v1632_v4 }
0x16ff   : > { %v1645_v15 = vor.u32 1.1754944e-38, %v1644_v11  ;;  %vm1643_vm14 = vcmp.eq.f32.partialorder %v1642_v13, 8.507059e+37 }
0x1703   : > { %v3931_v5 = vpop.eup %3930 }
0x1704   : > { %v1634_v6 = vmul.f32 %v3931_v5, %v1632_v4  ;;  %vm1639_vm6 = vweird.f32 %v3931_v5 }
0x1705   : > { %vm1640_vm13 = vmor %vm1638_vm8, %vm1639_vm6 }
0x1706   : > { %v1635_v7 = vsub.f32 1.0, %v1634_v6 }
0x1708   : > { %v1636_v8 = vmul.f32 %v3931_v5, %v1635_v7 }
0x170a   : > { %v1637_v9 = vadd.f32 %v3931_v5, %v1636_v8 }
0x170c   : > { %v1641_v14 = vsel %vm1640_vm13, %v3931_v5, %v1637_v9 }
0x170d   : > { %v1646_v18 = vsel %vm1643_vm14, %v1645_v15, %v1641_v14 }
0x170e   : > { %v1652_v20 = vmul.f32 %v1650_v2, %v1646_v18 }
0x176b   : > { %v1655_v17 = vpop.permute.xlu0 %1654 }
0x176c   : > { %v1657_v19 = vmul.f32 %v1655_v17, %v1646_v18 }
0x176e   : > { %1659 = vrot.lane.b32.xlu2 %v1657_v19, %s4140_s19 }
0x17c8   : > { %v1660_v21 = vpop.permute.xlu2 %1659 }
0x17c9   : > { %v1662_v23 = vadd.f32 %v1660_v21, %v1652_v20 }
0x17cb   : > { %3932 = vtanh.f32 %v1662_v23  ;;  %v1720_v48 = vrot.slane %v1662_v23, 1 }
0x17d1   : > { %v3933_v0 = vpop.eup %3932 }
0x17d2   : > { %1665 = vrot.lane.b32.xlu1 %v3933_v0, %s4141_s20 }
0x1844   : > { %v1666_v24 = vpop.permute.xlu1 %1665 }
0x1845   : > { %v1668_v25 = vmul.f32 %v1666_v24, %v1646_v18 }
0x1847   : > { %v1670_v26 = vrot.slane %v1668_v25, 5 }
0x1849   : > { %1671 = vrot.lane.b32.xlu0 %v1670_v26, %s4142_s21 }
0x18bb   : > { %v1672_v27 = vpop.permute.xlu0 %1671 }
0x18bc   : > { %3686 = vmatmul.msk.f32.vlgmr.msra.gmra.mxu2 %vm1398_vm7, %v1672_v27 }
0x193f   : > { %v1692_v29 = vpop.f32.mrf.mxu2 }
0x1940   : > { %v1696_v30 = vrot.slane %v1692_v29, 4 }
0x1942   : > { %v1698_v31 = vadd.f32 %v1696_v30, %v4637_v28 }
0x1944   : > { %3934 = vtanh.f32 %v1698_v31  ;;  %v3687_v34 = vmul.f32 -1.442695, %v1698_v31 }
0x1946   : > { %3936 = vpow2.f32 %v3687_v34 }
0x194a   : > { %v3935_v33 = vpop.eup %3934 }
0x194b   : > { %1724 = vrot.lane.b32.xlu2 %v3935_v33, %s4139_s18 }
0x194c   : > { %v3937_v35 = vpop.eup %3936 }
0x194d   : > { %v1702_v12 = vadd.f32 1.0, %v3937_v35 }
0x194f   : > { %3938 = vrcp.f32 %v1702_v12  ;;  %v1714_v41 = vand.u32 2147483648, %v1702_v12  ;;  %vm1708_vm2 = vweird.f32 %v1702_v12  ;;  %v1712_v42 = vand.u32 2147483647, %v1702_v12 }
0x1951   : > { %v1715_v32 = vor.u32 1.1754944e-38, %v1714_v41  ;;  %vm1713_vm4 = vcmp.eq.f32.partialorder %v1712_v42, 8.507059e+37 }
0x1955   : > { %v3939_v36 = vpop.eup %3938 }
0x1956   : > { %v1704_v38 = vmul.f32 %v3939_v36, %v1702_v12  ;;  %vm1709_vm15 = vweird.f32 %v3939_v36 }
0x1957   : > { %vm1710_vm3 = vmor %vm1708_vm2, %vm1709_vm15 }
0x1958   : > { %v1705_v39 = vsub.f32 1.0, %v1704_v38 }
0x195a   : > { %v1706_v16 = vmul.f32 %v3939_v36, %v1705_v39 }
0x195c   : > { %v1707_v40 = vadd.f32 %v3939_v36, %v1706_v16 }
0x195e   : > { %v1711_v43 = vsel %vm1710_vm3, %v3939_v36, %v1707_v40 }
0x195f   : > { %v1716_v46 = vsel %vm1713_vm4, %v1715_v32, %v1711_v43 }
0x1960   : > { %v1722_v49 = vmul.f32 %v1720_v48, %v1716_v46 }
0x19a5   : > { %v1725_v45 = vpop.permute.xlu2 %1724 }
0x19a6   : > { %v1727_v47 = vmul.f32 %v1725_v45, %v1716_v46 }
0x19a8   : > { %1729 = vrot.lane.b32.xlu1 %v1727_v47, %s4140_s19 }
0x1a1a   : > { %v1730_v50 = vpop.permute.xlu1 %1729 }
0x1a1b   : > { %v1732_v51 = vadd.f32 %v1730_v50, %v1722_v49 }
0x1a1d   : > { %3940 = vtanh.f32 %v1732_v51  ;;  %v1790_v14 = vrot.slane %v1732_v51, 1 }
0x1a23   : > { %v3941_v52 = vpop.eup %3940 }
0x1a24   : > { %1735 = vrot.lane.b32.xlu0 %v3941_v52, %s4141_s20 }
0x1a96   : > { %v1736_v53 = vpop.permute.xlu0 %1735 }
0x1a97   : > { %v1738_v54 = vmul.f32 %v1736_v53, %v1716_v46 }
0x1a99   : > { %v1740_v55 = vrot.slane %v1738_v54, 4 }
0x1a9b   : > { %1741 = vrot.lane.b32.xlu2 %v1740_v55, %s4142_s21 }
0x1af5   : > { %v1742_v56 = vpop.permute.xlu2 %1741 }
0x1af6   : > { %3688 = vmatmul.msk.f32.vlgmr.msra.gmra.mxu3 %vm1398_vm7, %v1742_v56 }
0x1b79   : > { %v1762_v57 = vpop.f32.mrf.mxu3 }
0x1b7a   : > { %v1766_v58 = vrot.slane %v1762_v57, 5 }
0x1b7c   : > { %v1768_v61 = vadd.f32 %v1766_v58, %v4637_v28 }
0x1b7e   : > { %3942 = vtanh.f32 %v1768_v61  ;;  %v3689_v44 = vmul.f32 -1.442695, %v1768_v61 }
0x1b80   : > { %3944 = vpow2.f32 %v3689_v44 }
0x1b84   : > { %v3943_v59 = vpop.eup %3942 }
0x1b85   : > { %1794 = vrot.lane.b32.xlu1 %v3943_v59, %s4139_s18 }
0x1b86   : > { %v3945_v60 = vpop.eup %3944 }
0x1b87   : > { %v1772_v62 = vadd.f32 1.0, %v3945_v60 }
0x1b89   : > { %3946 = vrcp.f32 %v1772_v62  ;;  %v1784_v5 = vand.u32 2147483648, %v1772_v62  ;;  %vm1778_vm6 = vweird.f32 %v1772_v62  ;;  %v1782_v6 = vand.u32 2147483647, %v1772_v62 }
0x1b8b   : > { %v1785_v8 = vor.u32 1.1754944e-38, %v1784_v5  ;;  %vm1783_vm13 = vcmp.eq.f32.partialorder %v1782_v6, 8.507059e+37 }
0x1b8f   : > { %v3947_v37 = vpop.eup %3946 }
0x1b90   : > { %v1774_v63 = vmul.f32 %v3947_v37, %v1772_v62  ;;  %vm1779_vm5 = vweird.f32 %v3947_v37 }
0x1b91   : > { %vm1780_vm8 = vmor %vm1778_vm6, %vm1779_vm5 }
0x1b92   : > { %v1775_v1 = vsub.f32 1.0, %v1774_v63 }
0x1b94   : > { %v1776_v3 = vmul.f32 %v3947_v37, %v1775_v1 }
0x1b96   : > { %v1777_v4 = vadd.f32 %v3947_v37, %v1776_v3 }
0x1b98   : > { %v1781_v7 = vsel %vm1780_vm8, %v3947_v37, %v1777_v4 }
0x1b99   : > { %v1786_v11 = vsel %vm1783_vm13, %v1785_v8, %v1781_v7 }
0x1b9a   : > { %v1792_v15 = vmul.f32 %v1790_v14, %v1786_v11 }
0x1bf7   : > { %v1795_v9 = vpop.permute.xlu1 %1794 }
0x1bf8   : > { %v1797_v13 = vmul.f32 %v1795_v9, %v1786_v11 }
0x1bfa   : > { %1799 = vrot.lane.b32.xlu0 %v1797_v13, %s4140_s19 }
0x1c6c   : > { %v1800_v17 = vpop.permute.xlu0 %1799 }
0x1c6d   : > { %v1802_v18 = vadd.f32 %v1800_v17, %v1792_v15 }
0x1c6f   : > { %3948 = vtanh.f32 %v1802_v18  ;;  %v1860_v43 = vrot.slane %v1802_v18, 1 }
0x1c75   : > { %v3949_v19 = vpop.eup %3948 }
0x1c76   : > { %1805 = vrot.lane.b32.xlu2 %v3949_v19, %s4141_s20 }
0x1cd0   : > { %v1806_v2 = vpop.permute.xlu2 %1805 }
0x1cd1   : > { %v1808_v20 = vmul.f32 %v1806_v2, %v1786_v11 }
0x1cd3   : > { %v1810_v21 = vrot.slane %v1808_v20, 3 }
0x1cd5   : > { %1811 = vrot.lane.b32.xlu1 %v1810_v21, %s4142_s21 }
0x1d47   : > { %v1812_v23 = vpop.permute.xlu1 %1811 }
0x1d48   : > { %3690 = vmatmul.msk.f32.vlgmr.msra.gmra.mxu0 %vm1398_vm7, %v1812_v23 }
0x1dc5   : > { %v1832_v0 = vpop.f32.mrf.mxu0 }
0x1dc6   : > { %v1836_v24 = vrot.slane %v1832_v0, 6 }
0x1dc8   : > { %v1838_v25 = vadd.f32 %v1836_v24, %v4637_v28 }
0x1dca   : > { %3950 = vtanh.f32 %v1838_v25  ;;  %v3691_v27 = vmul.f32 -1.442695, %v1838_v25 }
0x1dcc   : > { %3952 = vpow2.f32 %v3691_v27 }
0x1dd0   : > { %v3951_v26 = vpop.eup %3950 }
0x1dd1   : > { %1864 = vrot.lane.b32.xlu0 %v3951_v26, %s4139_s18 }
0x1dd2   : > { %v3953_v29 = vpop.eup %3952 }
0x1dd3   : > { %v1842_v30 = vadd.f32 1.0, %v3953_v29 }
0x1dd5   : > { %3954 = vrcp.f32 %v1842_v30  ;;  %v1854_v36 = vand.u32 2147483648, %v1842_v30  ;;  %vm1848_vm15 = vweird.f32 %v1842_v30  ;;  %v1852_v38 = vand.u32 2147483647, %v1842_v30 }
0x1dd7   : > { %v1855_v16 = vor.u32 1.1754944e-38, %v1854_v36  ;;  %vm1853_vm3 = vcmp.eq.f32.partialorder %v1852_v38, 8.507059e+37 }
0x1ddb   : > { %v3955_v31 = vpop.eup %3954 }
0x1ddc   : > { %v1844_v33 = vmul.f32 %v3955_v31, %v1842_v30  ;;  %vm1849_vm14 = vweird.f32 %v3955_v31 }
0x1ddd   : > { %vm1850_vm2 = vmor %vm1848_vm15, %vm1849_vm14 }
0x1dde   : > { %v1845_v34 = vsub.f32 1.0, %v1844_v33 }
0x1de0   : > { %v1846_v35 = vmul.f32 %v3955_v31, %v1845_v34 }
0x1de2   : > { %v1847_v12 = vadd.f32 %v3955_v31, %v1846_v35 }
0x1de4   : > { %v1851_v39 = vsel %vm1850_vm2, %v3955_v31, %v1847_v12 }
0x1de5   : > { %v1856_v41 = vsel %vm1853_vm3, %v1855_v16, %v1851_v39  ;;  %vm2126_vm3 = vcmask 1046528  }
0x1de6   : > { %v1862_v32 = vmul.f32 %v1860_v43, %v1856_v41 }
0x1e43   : > { %v1865_v40 = vpop.permute.xlu0 %1864 }
0x1e44   : > { %v1867_v42 = vmul.f32 %v1865_v40, %v1856_v41 }
0x1e46   : > { %1869 = vrot.lane.b32.xlu2 %v1867_v42, %s4140_s19  ;;  %v2022_v42 = vld [vmem:[%s5314_s4] sm:$0xff] }
0x1ea0   : > { %v1870_v45 = vpop.permute.xlu2 %1869 }
0x1ea1   : > { %v1872_v46 = vadd.f32 %v1870_v45, %v1862_v32  ;;  %v2354_v45 = vld [vmem:[%s5315_s5 + $0x39] sm:$0xff] }
0x1ea3   : > { %3956 = vtanh.f32 %v1872_v46  ;;  %v1930_v7 = vrot.slane %v1872_v46, 1  ;;  %v2353_v46 = vld [vmem:[%s5315_s5 + $0x31] sm:$0xff] }
0x1ea9   : > { %v3957_v47 = vpop.eup %3956 }
0x1eaa   : > { %1875 = vrot.lane.b32.xlu1 %v3957_v47, %s4141_s20  ;;  %v2352_v47 = vld [vmem:[%s5315_s5 + $0x29] sm:$0xff] }
0x1f1c   : > { %v1876_v48 = vpop.permute.xlu1 %1875 }
0x1f1d   : > { %v1878_v49 = vmul.f32 %v1876_v48, %v1856_v41  ;;  %v2023_v41 = vld [vmem:[%s5314_s4 + $0x10] sm:$0xff]  ;;  %v2351_v48 = vld [vmem:[%s5315_s5 + $0x21] sm:$0xff] }
0x1f1e   : > { %2041 = vmatpush.msrb.mxu3 %v2023_v41 }
0x1f1f   : > { %v1880_v50 = vrot.slane %v1878_v49, 2  ;;  %v2086_v49 = vld [vmem:[%s5314_s4 + $0x110] sm:$0xff] }
0x1f20   : > { %2042 = vmatpush.msrb.mxu3 %v2022_v42 }
0x1f21   : > { %1881 = vrot.lane.b32.xlu0 %v1880_v50, %s4142_s21  ;;  %v2088_v50 = vld [vmem:[%s5314_s4 + $0x120] sm:$0x1] }
0x1f22   : > { %2368 = vmatpush.msra.mxu3 %v2354_v45 }
0x1f24   : > { %2369 = vmatpush.msra.mxu3 %v2353_v46 }
0x1f26   : > { %2370 = vmatpush.msra.mxu3 %v2352_v47 }
0x1f28   : > { %2371 = vmatpush.msra.mxu3 %v2351_v48 }
0x1f93   : > { %v1882_v51 = vpop.permute.xlu0 %1881 }
0x1f94   : > { %3692 = vmatmul.msk.f32.vlgmr.msra.gmra.mxu1 %vm1398_vm7, %v1882_v51  ;;  %v2087_v51 = vld [vmem:[%s5314_s4 + $0x118] sm:$0xff] }
0x2011   : > { %v1902_v52 = vpop.f32.mrf.mxu1 }
0x2012   : > { %v1906_v53 = vrot.slane %v1902_v52, 7  ;;  %v2185_v52 = vrot.slane %v2086_v49, 1  ;;  %v2066_v49 = vld [vmem:[%s5314_s4 + $0x70] sm:$0xff] }
0x2014   : > { %v1908_v54 = vadd.f32 %v1906_v53, %v4637_v28  ;;  %v2189_v53 = vrot.slane %v2088_v50, 1  ;;  %v2067_v50 = vld [vmem:[%s5314_s4 + $0x78] sm:$0xff] }
0x2016   : > { %3958 = vtanh.f32 %v1908_v54  ;;  %v3693_v56 = vmul.f32 -1.442695, %v1908_v54  ;;  %v2089_v54 = vld [vmem:[%s5314_s4 + $0x128] sm:$0x1] }
0x2018   : > { %3960 = vpow2.f32 %v3693_v56  ;;  %v2084_v56 = vld [vmem:[%s5314_s4 + $0x100] sm:$0xff] }
0x201c   : > { %v3959_v55 = vpop.eup %3958 }
0x201d   : > { %1934 = vrot.lane.b32.xlu2 %v3959_v55, %s4139_s18  ;;  %v2187_v55 = vrot.slane %v2087_v51, 1  ;;  %v2064_v51 = vld [vmem:[%s5314_s4 + $0x60] sm:$0xff] }
0x201e   : > { %v3961_v57 = vpop.eup %3960 }
0x201f   : > { %v1912_v58 = vadd.f32 1.0, %v3961_v57  ;;  %v2191_v57 = vrot.slane %v2089_v54, 1  ;;  %v2141_v54 = vrot.slane %v2064_v51, 1 }
0x2021   : > { %3962 = vrcp.f32 %v1912_v58  ;;  %v1924_v37 = vand.u32 2147483648, %v1912_v58  ;;  %vm1918_vm5 = vweird.f32 %v1912_v58  ;;  %v1922_v63 = vand.u32 2147483647, %v1912_v58 }
0x2023   : > { %v1925_v3 = vor.u32 1.1754944e-38, %v1924_v37  ;;  %vm1923_vm8 = vcmp.eq.f32.partialorder %v1922_v63, 8.507059e+37 }
0x2027   : > { %v3963_v61 = vpop.eup %3962 }
0x2028   : > { %v1914_v59 = vmul.f32 %v3963_v61, %v1912_v58  ;;  %vm1919_vm4 = vweird.f32 %v3963_v61  ;;  %v2181_v58 = vrot.slane %v2084_v56, 1  ;;  %v2062_v56 = vld [vmem:[%s5314_s4 + $0x50] sm:$0xff] }
0x2029   : > { %vm1920_vm6 = vmor %vm1918_vm5, %vm1919_vm4  ;;  %vm2020_vm4 = vcmask 122880  }
0x202a   : > { %v1915_v44 = vsub.f32 1.0, %v1914_v59  ;;  %v2082_v59 = vld [vmem:[%s5314_s4 + $0xf0] sm:$0xff] }
0x202b   : > { %v2177_v37 = vrot.slane %v2082_v59, 1 }
0x202c   : > { %v1916_v60 = vmul.f32 %v3963_v61, %v1915_v44  ;;  %v2083_v44 = vld [vmem:[%s5314_s4 + $0xf8] sm:$0xff] }
0x202d   : > { %v2179_v63 = vrot.slane %v2083_v44, 1  ;;  %v2137_v44 = vrot.slane %v2062_v56, 1 }
0x202e   : > { %v1917_v62 = vadd.f32 %v3963_v61, %v1916_v60  ;;  %v2190_v60 = vsel %vm2126_vm3, %v2185_v52, %v2189_v53  ;;  %v2147_v53 = vrot.slane %v2067_v50, 1 }
0x202f   : > { %2230 = vmatpush.msrb.mxu0 %v2190_v60  ;;  %v2060_v60 = vld [vmem:[%s5314_s4 + $0x40] sm:$0xff] }
0x2030   : > { %v1921_v1 = vsel %vm1920_vm6, %v3963_v61, %v1917_v62  ;;  %v2085_v61 = vld [vmem:[%s5314_s4 + $0x108] sm:$0xff]  ;;  %vm2311_vm6 = vcmask 1041408  }
0x2031   : > { %v1926_v5 = vsel %vm1923_vm8, %v1925_v3, %v1921_v1  ;;  %v2183_v62 = vrot.slane %v2085_v61, 1  ;;  %v2080_v1 = vld [vmem:[%s5314_s4 + $0xe0] sm:$0xff]  ;;  %v2081_v3 = vld [vmem:[%s5314_s4 + $0xe8] sm:$0xff]  ;;  %vm2313_vm8 = vcmask 1042432  }
0x2032   : > { %v1932_v8 = vmul.f32 %v1930_v7, %v1926_v5  ;;  %v2175_v7 = vrot.slane %v2081_v3, 1  ;;  %v2058_v3 = vld [vmem:[%s5314_s4 + $0x30] sm:$0xff] }
0x2077   : > { %v1935_v4 = vpop.permute.xlu2 %1934 }
0x2078   : > { %v1937_v6 = vmul.f32 %v1935_v4, %v1926_v5  ;;  %v2192_v4 = vsel %vm2126_vm3, %v2187_v55, %v2191_v57  ;;  %v2063_v57 = vld [vmem:[%s5314_s4 + $0x58] sm:$0xff] }
0x2079   : > { %2250 = vmatpush.msrb.mxu1 %v2192_v4  ;;  %v2059_v4 = vld [vmem:[%s5314_s4 + $0x38] sm:$0xff] }
0x207a   : > { %1939 = vrot.lane.b32.xlu1 %v1937_v6, %s4140_s19  ;;  %v2173_v6 = vrot.slane %v2080_v1, 1  ;;  %v2139_v1 = vrot.slane %v2063_v57, 1 }
0x20ec   : > { %v1940_v9 = vpop.permute.xlu1 %1939 }
0x20ed   : > { %v1942_v11 = vadd.f32 %v1940_v9, %v1932_v8  ;;  %v2188_v8 = vsel %vm2126_vm3, %v2183_v62, %v2187_v55  ;;  %v2182_v9 = vsel %vm2126_vm3, %v2177_v37, %v2181_v58  ;;  %v2065_v55 = vld [vmem:[%s5314_s4 + $0x68] sm:$0xff] }
0x20ee   : > { %2251 = vmatpush.msrb.mxu1 %v2188_v8  ;;  %v2143_v59 = vrot.slane %v2065_v55, 1 }
0x20ef   : > { %3964 = vtanh.f32 %v1942_v11  ;;  %v1997_v36 = vrot.slane %v1942_v11, 1  ;;  %v2184_v11 = vsel %vm2126_vm3, %v2179_v63, %v2183_v62  ;;  %v2061_v62 = vld [vmem:[%s5314_s4 + $0x48] sm:$0xff] }
0x20f0   : > { %2252 = vmatpush.msrb.mxu1 %v2184_v11  ;;  %v2135_v8 = vrot.slane %v2061_v62, 1  ;;  %v2057_v11 = vld [vmem:[%s5314_s4 + $0x28] sm:$0xfe] }
0x20f5   : > { %v3965_v13 = vpop.eup %3964 }
0x20f6   : > { %1945 = vrot.lane.b32.xlu0 %v3965_v13, %s4141_s20  ;;  %v2178_v13 = vsel %vm2126_vm3, %v2173_v6, %v2177_v37 }
0x2168   : > { %v1946_v14 = vpop.permute.xlu0 %1945 }
0x2169   : > { %v1948_v15 = vmul.f32 %v1946_v14, %v1926_v5  ;;  %v2186_v5 = vsel %vm2126_vm3, %v2181_v58, %v2185_v52  ;;  %v2180_v14 = vsel %vm2126_vm3, %v2175_v7, %v2179_v63  ;;  %v2145_v52 = vrot.slane %v2066_v49, 1 }
0x216a   : > { %2231 = vmatpush.msrb.mxu0 %v2186_v5  ;;  %2253 = vmatpush.msrb.mxu1 %v2180_v14  ;;  %v2144_v14 = vsel %vm2126_vm3, %v2139_v1, %v2143_v59 }
0x216b   : > { %v1950_v17 = vrot.slane %v1948_v15, 1  ;;  %v2146_v5 = vsel %vm2126_vm3, %v2141_v54, %v2145_v52 }
0x216c   : > { %2232 = vmatpush.msrb.mxu0 %v2182_v9  ;;  %v2056_v9 = vld [vmem:[%s5314_s4 + $0x20] sm:$0xfe] }
0x216d   : > { %1951 = vrot.lane.b32.xlu2 %v1950_v17, %s4142_s21  ;;  %v2078_v17 = vld [vmem:[%s5314_s4 + $0xd0] sm:$0xff] }
0x216e   : > { %2233 = vmatpush.msrb.mxu0 %v2178_v13  ;;  %v2142_v13 = vsel %vm2126_vm3, %v2137_v44, %v2141_v54 }
0x21c7   : > { %v1952_v18 = vpop.permute.xlu2 %1951 }
0x21c8   : > { %3694 = vmatmul.msk.f32.vlgmr.msrb.gmra.mxu2 %vm1398_vm7, %v1952_v18  ;;  %v2079_v18 = vld [vmem:[%s5314_s4 + $0xd8] sm:$0xff] }
0x224b   : > { %v1972_v19 = vpop.f32.mrf.mxu2 }
0x224c   : > { %v1975_v2 = vadd.f32 %v1972_v19, %v4637_v28  ;;  %v2169_v19 = vrot.slane %v2078_v17, 1  ;;  %v2131_v17 = vrot.slane %v2059_v4, 1 }
0x224e   : > { %3966 = vtanh.f32 %v1975_v2  ;;  %v3695_v21 = vmul.f32 -1.442695, %v1975_v2  ;;  %v2171_v2 = vrot.slane %v2079_v18, 1 }
0x2250   : > { %3968 = vpow2.f32 %v3695_v21  ;;  %v2077_v21 = vld [vmem:[%s5314_s4 + $0xc8] sm:$0xff] }
0x2254   : > { %v3967_v20 = vpop.eup %3966 }
0x2255   : > { %2001 = vrot.lane.b32.xlu1 %v3967_v20, %s4139_s18  ;;  %v2076_v20 = vld [vmem:[%s5314_s4 + $0xc0] sm:$0xff] }
0x2256   : > { %v3969_v23 = vpop.eup %3968 }
0x2257   : > { %v1979_v0 = vadd.f32 1.0, %v3969_v23  ;;  %v2176_v23 = vsel %vm2126_vm3, %v2171_v2, %v2175_v7  ;;  %v2133_v7 = vrot.slane %v2060_v60, 1  ;;  %v2322_v60 = vld [vmem:[%s5315_s5] sm:$0xff] }
0x2258   : > { %2254 = vmatpush.msrb.mxu1 %v2176_v23 }
0x2259   : > { %3970 = vrcp.f32 %v1979_v0  ;;  %v1991_v30 = vand.u32 2147483648, %v1979_v0  ;;  %vm1985_vm14 = vweird.f32 %v1979_v0  ;;  %v1989_v31 = vand.u32 2147483647, %v1979_v0 }
0x225a   : > { %v2138_v18 = vsel %vm2126_vm3, %v2133_v7, %v2137_v44  ;;  %v2323_v44 = vld [vmem:[%s5315_s5 + $0x8] sm:$0xff] }
0x225b   : > { %v1992_v33 = vor.u32 1.1754944e-38, %v1991_v30  ;;  %vm1990_vm2 = vcmp.eq.f32.partialorder %v1989_v31, 8.507059e+37 }
0x225f   : > { %v3971_v24 = vpop.eup %3970 }
0x2260   : > { %v1981_v25 = vmul.f32 %v3971_v24, %v1979_v0  ;;  %vm1986_vm13 = vweird.f32 %v3971_v24  ;;  %v2165_v0 = vrot.slane %v2076_v20, 1  ;;  %v2130_v20 = vrot.slane %v2057_v11, 1 }
0x2261   : > { %vm1987_vm15 = vmor %vm1985_vm14, %vm1986_vm13  ;;  %vm2315_vm13 = vcmask 1043456   ;;  %vm2317_vm14 = vcmask 1044480  }
0x2262   : > { %v1982_v26 = vsub.f32 1.0, %v1981_v25  ;;  %v2074_v25 = vld [vmem:[%s5314_s4 + $0xb0] sm:$0xff] }
0x2263   : > { %v2161_v30 = vrot.slane %v2074_v25, 1 }
0x2264   : > { %v1983_v27 = vmul.f32 %v3971_v24, %v1982_v26  ;;  %v2075_v26 = vld [vmem:[%s5314_s4 + $0xb8] sm:$0xff] }
0x2265   : > { %v2163_v31 = vrot.slane %v2075_v26, 1 }
0x2266   : > { %v1984_v29 = vadd.f32 %v3971_v24, %v1983_v27  ;;  %v2170_v27 = vsel %vm2126_vm3, %v2165_v0, %v2169_v19 }
0x2268   : > { %v1988_v28 = vsel %vm1987_vm15, %v3971_v24, %v1984_v29  ;;  %v2167_v24 = vrot.slane %v2077_v21, 1  ;;  %vm2319_vm15 = vcmask 1045504  }
0x2269   : > { %v1993_v35 = vsel %vm1990_vm2, %v1992_v33, %v1988_v28  ;;  %v2072_v28 = vld [vmem:[%s5314_s4 + $0xa0] sm:$0xff]  ;;  %v2073_v33 = vld [vmem:[%s5314_s4 + $0xa8] sm:$0xff] }
0x226a   : > { %v1999_v38 = vmul.f32 %v1997_v36, %v1993_v35  ;;  %v2172_v29 = vsel %vm2126_vm3, %v2167_v24, %v2171_v2  ;;  %v2159_v36 = vrot.slane %v2073_v33, 1  ;;  %v2127_v2 = vrot.slane %v2056_v9, 1 }
0x226b   : > { %2255 = vmatpush.msrb.mxu1 %v2172_v29 }
0x22c7   : > { %v2002_v34 = vpop.permute.xlu1 %2001 }
0x22c8   : > { %v2004_v12 = vmul.f32 %v2002_v34, %v1993_v35  ;;  %v2166_v34 = vsel %vm2126_vm3, %v2161_v30, %v2165_v0  ;;  %v2132_v0 = vsel %vm2126_vm3, %v2130_v20, %v2131_v17  ;;  %v2381_v20 = vld [vmem:[%s5315_s5 + $0x4a] sm:$0x1] }
0x22ca   : > { %2006 = vrot.lane.b32.xlu0 %v2004_v12, %s4140_s19  ;;  %v2157_v12 = vrot.slane %v2072_v28, 1 }
0x233c   : > { %v2007_v39 = vpop.permute.xlu0 %2006 }
0x233d   : > { %v2009_v16 = vadd.f32 %v2007_v39, %v1999_v38  ;;  %v2070_v38 = vld [vmem:[%s5314_s4 + $0x90] sm:$0xff]  ;;  %v2071_v39 = vld [vmem:[%s5314_s4 + $0x98] sm:$0xff] }
0x233e   : > { %v2153_v41 = vrot.slane %v2070_v38, 1  ;;  %v2155_v42 = vrot.slane %v2071_v39, 1 }
0x233f   : > { %3972 = vtanh.f32 %v2009_v16  ;;  %v2162_v16 = vsel %vm2126_vm3, %v2157_v12, %v2161_v30 }
0x2340   : > { %v2158_v45 = vsel %vm2126_vm3, %v2153_v41, %v2157_v12  ;;  %v2160_v46 = vsel %vm2126_vm3, %v2155_v42, %v2159_v36 }
0x2345   : > { %v3973_v40 = vpop.eup %3972 }
0x2346   : > { %2012 = vrot.lane.b32.xlu2 %v3973_v40, %s4141_s20  ;;  %v2164_v40 = vsel %vm2126_vm3, %v2159_v36, %v2163_v31  ;;  %v3697_v36 = vld [vmem:[%s5314_s4 + $0x121] ss:$8 sm:$0x3] }
0x2347   : > { %v2226_v38 = vperm.slane %v3697_v36, 0  ;;  %v2227_v39 = vperm.slane %v3697_v36, 1 }
0x23a0   : > { %v2013_v43 = vpop.permute.xlu2 %2012 }
0x23a1   : > { %v2015_v32 = vmul.f32 %v2013_v43, %v1993_v35  ;;  %v2168_v35 = vsel %vm2126_vm3, %v2163_v31, %v2167_v24  ;;  %v2068_v43 = vld [vmem:[%s5314_s4 + $0x80] sm:$0xff] }
0x23a2   : > { %2256 = vmatpush.msrb.mxu1 %v2168_v35  ;;  %v2149_v47 = vrot.slane %v2068_v43, 1  ;;  %v2024_v24 = vld [vmem:[%s5314_s4 + $0x20] ss:$0 sm:$0xff] }
0x23a3   : > { %2017 = vrot.lane.b32.xlu1 %v2015_v32, %s4142_s21  ;;  %v2069_v32 = vld [vmem:[%s5314_s4 + $0x88] sm:$0xff]  ;;  %s4060_s21 = scalar_lea.hbm %s5317_s7, 2 }
0x23a4   : > { %2257 = vmatpush.msrb.mxu1 %v2164_v40  ;;  %v2151_v48 = vrot.slane %v2069_v32, 1  ;;  %v2154_v58 = vsel %vm2126_vm3, %v2149_v47, %v2153_v41  ;;  %v2150_v37 = vsel %vm2126_vm3, %v2145_v52, %v2149_v47 }
0x23a6   : > { %2258 = vmatpush.msrb.mxu1 %v2160_v46  ;;  %v2156_v61 = vsel %vm2126_vm3, %v2151_v48, %v2155_v42  ;;  %v2152_v63 = vsel %vm2126_vm3, %v2147_v53, %v2151_v48 }
0x23a8   : > { %2259 = vmatpush.msrb.mxu1 %v2156_v61  ;;  %v2325_v61 = vld [vmem:[%s5315_s5 + $0x18] sm:$0xff] }
0x23a9   : > { %2343 = vmatpush.msra.mxu2 %v2325_v61 }
0x23aa   : > { %2260 = vmatpush.msrb.mxu1 %v2152_v63 }
0x2415   : > { %v2018_v15 = vpop.permute.xlu1 %2017 }
0x2416   : > { %2021 = vst.msk [vmem:[%s281_s23] sm:$0x1] %vm2020_vm4, %v2018_v15  ;;  %3696 = vmatmul.msk.f32.vlgmr.msrb.gmra.mxu3 %vm1398_vm7, %v2018_v15  ;;  %v2128_v15 = vrot.slane %v2058_v3, 1 }
0x2418   : > { %v2134_v21 = vsel %vm2126_vm3, %v2128_v15, %v2133_v7  ;;  %v2129_v23 = vsel %vm2126_vm3, %v2127_v2, %v2128_v15  ;;  %v3836_v15 = vld [vmem:[%s5315_s5 + $0x20] ss:$0 sm:$0xff] }
0x241e   : > { %3701 = vmatmul.msk.f32.vlgmr.msra.gmra.mxu3 %vm290_vm1, %v4610_v22  ;;  %v2174_v22 = vsel %vm2126_vm3, %v2169_v19, %v2173_v6  ;;  %v2148_v6 = vsel %vm2126_vm3, %v2143_v59, %v2147_v53  ;;  %v2140_v19 = vsel %vm2126_vm3, %v2135_v8, %v2139_v1  ;;  %v2324_v59 = vld [vmem:[%s5315_s5 + $0x10] sm:$0xff] }
0x241f   : > { %2234 = vmatpush.msrb.mxu0 %v2174_v22  ;;  %2261 = vmatpush.msrb.mxu1 %v2148_v6  ;;  %v2136_v22 = vsel %vm2126_vm3, %v2131_v17, %v2135_v8  ;;  %v2355_v17 = vld [vmem:[%s5315_s5 + $0x41] sm:$0x1] }
0x2420   : > { %2344 = vmatpush.msra.mxu2 %v2324_v59 }
0x2421   : > { %2235 = vmatpush.msrb.mxu0 %v2170_v27  ;;  %2262 = vmatpush.msrb.mxu1 %v2144_v14 }
0x2422   : > { %2345 = vmatpush.msra.mxu2 %v2323_v44 }
0x2423   : > { %2236 = vmatpush.msrb.mxu0 %v2166_v34  ;;  %2263 = vmatpush.msrb.mxu1 %v2140_v19 }
0x2424   : > { %2346 = vmatpush.msra.mxu2 %v2322_v60 }
0x2425   : > { %2237 = vmatpush.msrb.mxu0 %v2162_v16  ;;  %2264 = vmatpush.msrb.mxu1 %v2136_v22 }
0x2427   : > { %2238 = vmatpush.msrb.mxu0 %v2158_v45  ;;  %2265 = vmatpush.msrb.mxu1 %v2132_v0 }
0x2429   : > { %2239 = vmatpush.msrb.mxu0 %v2154_v58 }
0x242b   : > { %2240 = vmatpush.msrb.mxu0 %v2150_v37 }
0x242d   : > { %2241 = vmatpush.msrb.mxu0 %v2146_v5 }
0x242f   : > { %2242 = vmatpush.msrb.mxu0 %v2142_v13 }
0x2431   : > { %2243 = vmatpush.msrb.mxu0 %v2138_v18 }
0x2433   : > { %2244 = vmatpush.msrb.mxu0 %v2134_v21 }
0x2435   : > { %2245 = vmatpush.msrb.mxu0 %v2129_v23  ;;  %v2380_v23 = vld [vmem:[%s5315_s5 + $0x42] sm:$0xff] }
0x2499   : > { %v2044_v25 = vpop.f32.mrf.mxu3 }
0x249a   : > { %v2045_v26 = vadd.f32 %v2044_v25, %v2024_v24 }
0x249c   : > { %v2048_v27 = vmul.f32 0.044715, %v2045_v26  ;;  %v2047_v34 = vmul.f32 0.5, %v2045_v26 }
0x249e   : > { %v2049_v29 = vmul.f32 %v2048_v27, %v2045_v26 }
0x24a0   : > { %v2050_v30 = vmul.f32 %v2049_v29, %v2045_v26 }
0x24a1   : > { %v2373_v18 = vpop.f32.mrf.mxu3 }
0x24a2   : > { %v2051_v31 = vadd.f32 %v2050_v30, %v2045_v26  ;;  %v2374_v21 = vadd.f32 %v2373_v18, %v2355_v17 }
0x24a4   : > { %v2052_v28 = vmul.f32 0.7978846, %v2051_v31 }
0x24a6   : > { %3974 = vtanh.f32 %v2052_v28 }
0x24ac   : > { %v3975_v33 = vpop.eup %3974 }
0x24ad   : > { %v2054_v35 = vadd.f32 1.0, %v3975_v33 }
0x24af   : > { %v2055_v12 = vmul.f32 %v2054_v35, %v2047_v34 }
0x24b1   : > { %2246 = vmatmul.f32.vlgmr.msrb.gmra.mxu0 %v2055_v12  ;;  %2266 = vmatmul.f32.vlgmr.msrb.gmra.mxu1 %v2055_v12 }
0x252e   : > { %v2247_v16 = vpop.f32.mrf.mxu0  ;;  %v2267_v40 = vpop.f32.mrf.mxu1 }
0x252f   : > { %v2248_v41 = vadd.f32 %v2247_v16, %v2226_v38  ;;  %v2268_v42 = vadd.f32 %v2267_v40, %v2227_v39  ;;  %v2444_v39 = vld [vmem:[%s5312_s2 + $0xa8] sm:$0xff]  ;;  %v2445_v16 = vld [vmem:[%s5312_s2 + $0xb0] sm:$0xff] }
0x2530   : > { %2465 = vmatpush.msrb.mxu2 %v2444_v39  ;;  %2488 = vmatpush.msrb.mxu3 %v2445_v16  ;;  %v2441_v40 = vld [vmem:[%s5312_s2 + $0x70] sm:$0xff] }
0x2531   : > { %v2272_v43 = vmin.f32 %v2248_v41, 0.0  ;;  %v2273_v32 = vmin.f32 %v2268_v42, 0.0  ;;  %vm2270_vm7 = vcmp.gt.f32.partialorder %v2248_v41, 0.0  ;;  %vm2271_vm5 = vcmp.gt.f32.partialorder %v2268_v42, 0.0 }
0x2532   : > { %2466 = vmatpush.msrb.mxu2 %v2441_v40 }
0x2533   : > { %v2274_v45 = vmul.f32 1.442695, %v2272_v43  ;;  %v2276_v46 = vmul.f32 1.442695, %v2273_v32  ;;  %v2439_v43 = vld [vmem:[%s5312_s2 + $0x40] sm:$0xff] }
0x2534   : > { %v2435_v32 = vld [vmem:[%s5312_s2] sm:$0xff] }
0x2535   : > { %3976 = vpow2.f32 %v2274_v45  ;;  %v2436_v45 = vld [vmem:[%s5312_s2 + $0x8] sm:$0xff] }
0x2536   : > { %3978 = vpow2.f32 %v2276_v46 }
0x253b   : > { %v3977_v47 = vpop.eup %3976 }
0x253c   : > { %v3698_v48 = vadd.f32 -1.0, %v3977_v47  ;;  %v3979_v49 = vpop.eup %3978 }
0x253d   : > { %v3699_v54 = vadd.f32 -1.0, %v3979_v49 }
0x253e   : > { %v2280_v50 = vsel %vm2270_vm7, %v2248_v41, %v3698_v48  ;;  %v2442_v41 = vld [vmem:[%s5312_s2 + $0x78] sm:$0xff] }
0x253f   : > { %v2291_v51 = vrot.slane %v2280_v50, 5  ;;  %v2287_v52 = vrot.slane %v2280_v50, 6  ;;  %v2283_v53 = vrot.slane %v2280_v50, 7  ;;  %v2281_v55 = vsel %vm2271_vm5, %v2268_v42, %v3699_v54  ;;  %2489 = vmatpush.msrb.mxu3 %v2442_v41  ;;  %v2438_v42 = vld [vmem:[%s5312_s2 + $0x38] sm:$0xff]  ;;  %v2440_v54 = vld [vmem:[%s5312_s2 + $0x48] sm:$0xff] }
0x2540   : > { %v2306_v56 = vrot.slane %v2281_v55, 1  ;;  %v2302_v57 = vrot.slane %v2281_v55, 2  ;;  %v2298_v58 = vrot.slane %v2281_v55, 3  ;;  %v2296_v5 = vrot.slane %v2281_v55, 4  ;;  %2467 = vmatpush.msrb.mxu2 %v2438_v42  ;;  %v2437_v55 = vld [vmem:[%s5312_s2 + $0x10] sm:$0xff] }
0x2541   : > { %2292 = vrot.lane.b32.xlu1 %v2291_v51, %s4141_s20  ;;  %2288 = vrot.lane.b32.xlu2 %v2287_v52, %s4137_s16  ;;  %v2446_v52 = vld [vmem:[%s5312_s2 + $0xb8] sm:$0xff] }
0x2542   : > { %2284 = vrot.lane.b32.xlu0 %v2283_v53, %s4139_s18  ;;  %2490 = vmatpush.msrb.mxu3 %v2439_v43  ;;  %v2443_v53 = vld [vmem:[%s5312_s2 + $0x80] sm:$0xff] }
0x2543   : > { %2468 = vmatpush.msrb.mxu2 %v2435_v32 }
0x2544   : > { %2491 = vmatpush.msrb.mxu3 %v2436_v45 }
0x2549   : > { %2307 = vrot.lane.b32.xlu1 %v2306_v56, %s4141_s20  ;;  %2303 = vrot.lane.b32.xlu2 %v2302_v57, %s4137_s16  ;;  %s3509_s20 = scalar_lea.hbm %s5317_s7, %s4204_s28 }
0x254a   : > { %2299 = vrot.lane.b32.xlu0 %v2298_v58, %s4139_s18  ;;  %s3513_s18 = sshll.u32 %s3509_s20, 4  ;;  %s3514_s18 = int_to_ptr.hbm [resolvable:$true] %s3513_s18 }
0x254b   : > { %s4054_s15 = sshra.s32 %s3514_s18, 4  ;;  %s4055_s15 = int_to_ptr.hbm [resolvable:$true] %s4054_s15 }
0x254c   : > { %s4056_s17 = scalar_lea.hbm %s4055_s15, 1  ;;  %p4061_p0 = scmp.lt.s32.totalorder %s4055_s15, %s5317_s7 }
0x254d   : > { %p4057_p11 = scmp.ne.s32.totalorder %s4055_s15, %s4056_s17  ;;  %p4062_p1 = scmp.lt.s32.totalorder %s4060_s21, %s4056_s17 }
0x254f   : > { %p4058_p12 = pnand %p4057_p11, %p4221_p5  ;;  %p4063_p2 = por %p4062_p1, %p4061_p0 }
0x2551   : > { %p4059_p13 = pneg %p4058_p12 }
0x2553   : > { %p4064_p3 = pnand %p4063_p2, %p4059_p13 }
0x259b   : > { %v2289_v62 = vpop.permute.xlu2 %2288 }
0x25a3   : > { %v2304_v8 = vpop.permute.xlu2 %2303 }
0x25b3   : > { %v2293_v37 = vpop.permute.xlu1 %2292 }
0x25b4   : > { %v2285_v63 = vpop.permute.xlu0 %2284 }
0x25b5   : > { %v2310_v1 = vsel %vm504_vm10, %v2280_v50, %v2285_v63  ;;  %v4953_v63 = vld [vmem:[%s5312_s2 + $0x30] sm:$0xff] }
0x25b6   : > { %v2312_v3 = vsel %vm2311_vm6, %v2310_v1, %v2289_v62 }
0x25b7   : > { %v2314_v4 = vsel %vm2313_vm8, %v2312_v3, %v2293_v37 }
0x25b8   : > { %v2316_v6 = vsel %vm2315_vm13, %v2314_v4, %v2296_v5  ;;  %v2429_v5 = vperm.slane %v4953_v63, 0 }
0x25bb   : > { %v2308_v11 = vpop.permute.xlu1 %2307 }
0x25bc   : > { %v2300_v7 = vpop.permute.xlu0 %2299 }
0x25bd   : > { %v2318_v9 = vsel %vm2317_vm14, %v2316_v6, %v2300_v7 }
0x25be   : > { %v2320_v13 = vsel %vm2319_vm15, %v2318_v9, %v2304_v8  ;;  %v2432_v8 = vperm.slane %v4953_v63, 1 }
0x25bf   : > { %v2321_v14 = vsel %vm2126_vm3, %v2320_v13, %v2308_v11 }
0x25c0   : > { %3700 = vmatmul.msk.f32.vlgmr.msra.gmra.mxu2 %vm290_vm1, %v2321_v14 }
0x25c1   : > { %2511 = vmatpush.msra.mxu2 %v2446_v52 }
0x25c3   : > { %2512 = vmatpush.msra.mxu2 %v2443_v53 }
0x25c5   : > { %2513 = vmatpush.msra.mxu2 %v2440_v54 }
0x25c7   : > { %2514 = vmatpush.msra.mxu2 %v2437_v55 }
0x2643   : > { %v2348_v19 = vpop.f32.mrf.mxu2 }
0x2644   : > { %v2349_v2 = vadd.f32 %v3836_v15, %v2348_v19 }
0x2646   : > { %v2377_v22 = vrot.slane %v2349_v2, 7 }
0x2648   : > { %v2379_v0 = vsel %vm504_vm10, %v2374_v21, %v2377_v22  ;;  %v4894_v24 = vadd.f32 %v2381_v20, %v2377_v22 }
0x2649   : > { %v4896_v25 = vadd.f32 %v2380_v23, %v2379_v0 }
0x264a   : > { %v2388_v26 = vsel %vm294_vm0, %v4894_v24, 0.0 }
0x264b   : > { %2389 = vadd.xlane.f32.xlu2 %v2388_v26  ;;  %v2385_v27 = vsel %vm290_vm1, %v4896_v25, 0.0 }
0x264c   : > { %2386 = vadd.xlane.f32.xlu0 %v2385_v27 }
0x26be   : > { %v2390_v29 = vpop.xlane.xlu2 %2389 }
0x26bf   : > { %v2392_v30 = vmul.f32 %v2390_v29, %v4244_v10  ;;  %v2387_v31 = vpop.xlane.xlu0 %2386 }
0x26c0   : > { %v2391_v28 = vmul.f32 %v2387_v31, %v4244_v10 }
0x26c1   : > { %v4905_v33 = vsub.f32 %v4894_v24, %v2392_v30 }
0x26c2   : > { %v2393_v34 = vsub.f32 %v4896_v25, %v2391_v28 }
0x26c3   : > { %v2396_v35 = vmul.f32 %v4905_v33, %v4905_v33 }
0x26c4   : > { %v2395_v12 = vmul.f32 %v2393_v34, %v2393_v34 }
0x26c5   : > { %v2400_v36 = vsel %vm294_vm0, %v2396_v35, 0.0 }
0x26c6   : > { %2401 = vadd.xlane.f32.xlu2 %v2400_v36  ;;  %v2397_v38 = vsel %vm290_vm1, %v2395_v12, 0.0 }
0x26c7   : > { %2398 = vadd.xlane.f32.xlu1 %v2397_v38 }
0x2739   : > { %v2402_v46 = vpop.xlane.xlu2 %2401 }
0x273a   : > { %v2404_v47 = vmul.f32 %v2402_v46, %v4244_v10  ;;  %v2399_v48 = vpop.xlane.xlu1 %2398 }
0x273b   : > { %v2403_v49 = vmul.f32 %v2399_v48, %v4244_v10 }
0x273c   : > { %v2406_v50 = vadd.f32 1e-05, %v2404_v47 }
0x273d   : > { %v2405_v51 = vadd.f32 1e-05, %v2403_v49 }
0x273e   : > { %3980 = vrsqrt.f32 %v2406_v50  ;;  %vm2423_vm5 = vweird.f32 %v2406_v50 }
0x273f   : > { %3982 = vrsqrt.f32 %v2405_v51  ;;  %vm2413_vm4 = vweird.f32 %v2405_v51 }
0x2744   : > { %v3981_v56 = vpop.eup %3980 }
0x2745   : > { %v3983_v57 = vpop.eup %3982  ;;  %v2418_v58 = vmul.f32 %v3981_v56, %v2406_v50  ;;  %vm2424_vm3 = vweird.f32 %v3981_v56 }
0x2746   : > { %v2408_v61 = vmul.f32 %v3983_v57, %v2405_v51  ;;  %vm2414_vm2 = vweird.f32 %v3983_v57  ;;  %vm2425_vm6 = vmor %vm2423_vm5, %vm2424_vm3 }
0x2747   : > { %v2419_v59 = vmul.f32 %v3981_v56, %v2418_v58  ;;  %vm2415_vm7 = vmor %vm2413_vm4, %vm2414_vm2 }
0x2748   : > { %v2409_v44 = vmul.f32 %v3983_v57, %v2408_v61 }
0x2749   : > { %v2420_v60 = vmul.f32 0.5, %v2419_v59 }
0x274a   : > { %v2410_v62 = vmul.f32 0.5, %v2409_v44 }
0x274b   : > { %v2421_v37 = vsub.f32 1.5, %v2420_v60 }
0x274c   : > { %v2411_v1 = vsub.f32 1.5, %v2410_v62 }
0x274d   : > { %v2422_v3 = vmul.f32 %v3981_v56, %v2421_v37 }
0x274e   : > { %v2412_v4 = vmul.f32 %v3983_v57, %v2411_v1 }
0x274f   : > { %v2426_v9 = vsel %vm2425_vm6, %v3981_v56, %v2422_v3 }
0x2750   : > { %v2416_v6 = vsel %vm2415_vm7, %v3983_v57, %v2412_v4  ;;  %v2428_v14 = vmul.f32 %v2426_v9, %v4905_v33 }
0x2751   : > { %v2427_v7 = vmul.f32 %v2416_v6, %v2393_v34 }
0x2752   : > { %v2431_v15 = vmul.f32 %v2429_v5, %v2428_v14  ;;  %v2725_v14 = vld [vmem:[%s5312_s2 + $0x88] sm:$0xff] }
0x2753   : > { %v2430_v11 = vmul.f32 %v2429_v5, %v2427_v7 }
0x2754   : > { %v2434_v17 = vadd.f32 %v2432_v8, %v2431_v15  ;;  %v2724_v15 = vld [vmem:[%s5312_s2 + $0x50] sm:$0xff] }
0x2755   : > { %v2433_v13 = vadd.f32 %v2432_v8, %v2430_v11 }
0x2757   : > { %3702 = vmatmul.msk.f32.vlgmr.msrb.gmra.mxu2 %vm290_vm1, %v2433_v13  ;;  %3704 = vmatmul.msk.f32.vlgmr.msrb.gmra.mxu3 %vm290_vm1, %v2433_v13 }
0x275f   : > { %3703 = vmatmul.msk.f32.gmra.mxu2 %vm290_vm1, %v2434_v17  ;;  %3705 = vmatmul.msk.f32.gmra.mxu3 %vm290_vm1, %v2434_v17 }
0x2767   : > { %3706 = vmatmul.msk.f32.vlgmr.msra.gmra.mxu2 %vm290_vm1, %v2433_v13  ;;  %v2726_v13 = vld [vmem:[%s5312_s2 + $0xc0] sm:$0xff] }
0x276f   : > { %3707 = vmatmul.msk.f32.gmra.mxu2 %vm290_vm1, %v2434_v17  ;;  %v2723_v17 = vld [vmem:[%s5312_s2 + $0x18] sm:$0xff] }
0x27da   : > { %v2470_v18 = vpop.f32.mrf.mxu2  ;;  %v2493_v19 = vpop.f32.mrf.mxu3 }
0x27db   : > { %2617 = vrot.lane.b32.xlu1 %v2493_v19, %s4137_s16  ;;  %2613 = vrot.lane.b32.xlu2 %v2470_v18, %s4137_s16 }
0x27e2   : > { %v2473_v2 = vpop.f32.mrf.mxu2  ;;  %v2496_v20 = vpop.f32.mrf.mxu3 }
0x27e3   : > { %2619 = vrot.lane.b32.xlu0 %v2496_v20, %s4137_s16  ;;  %3708 = vmatpush.xpose.msk.msra.mxu3 %vm436_vm9, %v2496_v20 }
0x27e7   : > { %3709 = vmatpush.xpose.msk.msra.mxu3 %vm436_vm9, %v2493_v19 }
0x27ea   : > { %v2516_v21 = vpop.f32.mrf.mxu2  ;;  %3710 = vmatmul.msk.f32.vlgmr.msra.gmra.mxu3 %vm436_vm9, %v2470_v18 }
0x27eb   : > { %2615 = vrot.lane.b32.xlu0 %v2473_v2, %s4137_s16  ;;  %2739 = vmatpush.xpose.msrb.mxu3 %v2726_v13 }
0x27ef   : > { %2740 = vmatpush.xpose.msrb.mxu3 %v2725_v14  ;;  %v2860_v14 = vld [vmem:[%s5312_s2 + $0xd0] sm:$0xff] }
0x27f2   : > { %v2519_v22 = vpop.f32.mrf.mxu2  ;;  %3711 = vmatmul.msk.f32.gmra.mxu3 %vm436_vm9, %v2473_v2 }
0x27f3   : > { %3712 = vmatpush.msk.msra.mxu0 %vm504_vm10, %v2519_v22  ;;  %2741 = vmatpush.xpose.msrb.mxu3 %v2724_v15  ;;  %v2859_v15 = vld [vmem:[%s5312_s2 + $0x98] sm:$0xff] }
0x27f5   : > { %2605 = vmatpush.msra.mxu0 %v2516_v21 }
0x27f7   : > { %2742 = vmatpush.xpose.msrb.mxu3 %v2723_v17  ;;  %v2858_v17 = vld [vmem:[%s5312_s2 + $0x60] sm:$0xff] }
0x2835   : > { %v2614_v26 = vpop.permute.xlu2 %2613 }
0x284d   : > { %v2618_v0 = vpop.permute.xlu1 %2617 }
0x2855   : > { %v2620_v23 = vpop.permute.xlu0 %2619 }
0x2856   : > { %3715 = vmatpush.xpose.msk.msra.mxu1 %vm436_vm9, %v2620_v23 }
0x285a   : > { %3716 = vmatpush.xpose.msk.msra.mxu1 %vm436_vm9, %v2618_v0 }
0x285d   : > { %3717 = vmatmul.msk.f32.vlgmr.msra.gmra.mxu1 %vm436_vm9, %v2614_v26  ;;  %v2616_v27 = vpop.permute.xlu0 %2615  ;;  %v2752_v26 = vperm.slane %v4953_v63, 2 }
0x285e   : > { %2874 = vmatpush.xpose.msrb.mxu1 %v2860_v14 }
0x2862   : > { %2875 = vmatpush.xpose.msrb.mxu1 %v2859_v15 }
0x2865   : > { %3718 = vmatmul.msk.f32.gmra.mxu1 %vm436_vm9, %v2616_v27 }
0x2866   : > { %2876 = vmatpush.xpose.msrb.mxu1 %v2858_v17 }
0x286d   : > { %v2551_v29 = vpop.f32.mrf.mxu3 }
0x286e   : > { %v2557_v30 = vmul.f32 0.125, %v2551_v29 }
0x2870   : > { %v2559_v31 = vsel %vm474_vm11, %v2557_v30, -inf }
0x2871   : > { %2560 = vmax.xlane.f32.xlu2 %v2559_v31 }
0x2875   : > { %v2554_v28 = vpop.f32.mrf.mxu3 }
0x2876   : > { %v2558_v33 = vmul.f32 0.125, %v2554_v28 }
0x2878   : > { %v2562_v34 = vsel %vm478_vm12, %v2558_v33, -inf }
0x2879   : > { %2563 = vmax.xlane.f32.xlu2 %v2562_v34 }
0x2891   : > { %2677 = vrot.lane.b32.xlu2 %v2516_v21, %s4137_s16 }
0x28da   : > { %v2646_v35 = vpop.f32.mrf.mxu1 }
0x28db   : > { %v2652_v12 = vmul.f32 0.125, %v2646_v35 }
0x28dd   : > { %v2654_v36 = vsel %vm474_vm11, %v2652_v12, -inf }
0x28de   : > { %2655 = vmax.xlane.f32.xlu0 %v2654_v36 }
0x28e2   : > { %v2649_v38 = vpop.f32.mrf.mxu1 }
0x28e3   : > { %v2653_v39 = vmul.f32 0.125, %v2649_v38 }
0x28e4   : > { %v2561_v43 = vpop.xlane.xlu2 %2560 }
0x28e5   : > { %v2657_v16 = vsel %vm478_vm12, %v2653_v39, -inf  ;;  %v2565_v47 = vsub.f32 %v2557_v30, %v2561_v43  ;;  %v2808_v43 = vld [vmem:[%s5312_s2 + $0xc8] sm:$0xff] }
0x28e6   : > { %2658 = vmax.xlane.f32.xlu1 %v2657_v16  ;;  %2828 = vmatpush.msrb.mxu0 %v2808_v43 }
0x28e7   : > { %v2567_v50 = vmul.f32 1.442695, %v2565_v47 }
0x28ec   : > { %v2564_v51 = vpop.xlane.xlu2 %2563 }
0x28ed   : > { %v2566_v53 = vsub.f32 %v2558_v33, %v2564_v51 }
0x28ef   : > { %v2569_v55 = vmul.f32 1.442695, %v2566_v53 }
0x28f4   : > { %v2678_v59 = vpop.permute.xlu2 %2677 }
0x28ff   : > { %2679 = vrot.lane.b32.xlu1 %v2519_v22, %s4137_s16 }
0x2951   : > { %v2656_v40 = vpop.xlane.xlu0 %2655 }
0x2952   : > { %v2660_v41 = vsub.f32 %v2652_v12, %v2656_v40 }
0x2954   : > { %v2662_v42 = vmul.f32 1.442695, %v2660_v41 }
0x2956   : > { %3984 = vpow2.f32 %v2662_v42 }
0x2959   : > { %v2659_v32 = vpop.xlane.xlu1 %2658 }
0x295a   : > { %v2661_v45 = vsub.f32 %v2653_v39, %v2659_v32  ;;  %v2807_v32 = vld [vmem:[%s5312_s2 + $0x90] sm:$0xff] }
0x295b   : > { %2829 = vmatpush.msrb.mxu0 %v2807_v32 }
0x295c   : > { %v3985_v46 = vpop.eup %3984  ;;  %v2664_v48 = vmul.f32 1.442695, %v2661_v45  ;;  %v2806_v45 = vld [vmem:[%s5312_s2 + $0x58] sm:$0xff] }
0x295d   : > { %v2666_v49 = vsel %vm474_vm11, %v3985_v46, 0.0  ;;  %2830 = vmatpush.msrb.mxu0 %v2806_v45 }
0x295e   : > { %3986 = vpow2.f32 %v2664_v48  ;;  %2667 = vadd.xlane.f32.xlu0 %v2666_v49 }
0x295f   : > { %3988 = vpow2.f32 %v2567_v50 }
0x2960   : > { %3990 = vpow2.f32 %v2569_v55 }
0x2964   : > { %v3987_v52 = vpop.eup %3986 }
0x2965   : > { %v2669_v54 = vsel %vm478_vm12, %v3987_v52, 0.0  ;;  %v3989_v56 = vpop.eup %3988 }
0x2966   : > { %2670 = vadd.xlane.f32.xlu0 %v2669_v54  ;;  %v2571_v57 = vsel %vm474_vm11, %v3989_v56, 0.0  ;;  %v3991_v61 = vpop.eup %3990 }
0x2967   : > { %v2574_v44 = vsel %vm478_vm12, %v3991_v61, 0.0 }
0x296e   : > { %2572 = vadd.xlane.f32.xlu0 %v2571_v57 }
0x2971   : > { %v2680_v58 = vpop.permute.xlu1 %2679 }
0x2972   : > { %3719 = vmatpush.msk.msrb.mxu2 %vm504_vm10, %v2680_v58 }
0x2974   : > { %2705 = vmatpush.msrb.mxu2 %v2678_v59 }
0x2976   : > { %2575 = vadd.xlane.f32.xlu0 %v2574_v44  ;;  %v2799_v44 = vperm.slane %v4953_v63, 3 }
0x29d1   : > { %v2668_v60 = vpop.xlane.xlu0 %2667 }
0x29d2   : > { %3992 = vrcp.f32 %v2668_v60 }
0x29d8   : > { %v3993_v62 = vpop.eup %3992 }
0x29d9   : > { %v2674_v37 = vmul.f32 %v3993_v62, %v3985_v46  ;;  %v2671_v1 = vpop.xlane.xlu0 %2670  ;;  %v2805_v46 = vld [vmem:[%s5312_s2 + $0x20] sm:$0xff] }
0x29da   : > { %3994 = vrcp.f32 %v2671_v1  ;;  %2831 = vmatpush.msrb.mxu0 %v2805_v46  ;;  %v2802_v1 = vperm.slane %v4953_v63, 4 }
0x29db   : > { %3720 = vmatmul.msk.f32.vlgmr.msrb.gmra.mxu2 %vm474_vm11, %v2674_v37 }
0x29e0   : > { %v3995_v3 = vpop.eup %3994 }
0x29e1   : > { %v2573_v4 = vpop.xlane.xlu0 %2572  ;;  %v2675_v5 = vmul.f32 %v3995_v3, %v3987_v52 }
0x29e2   : > { %3996 = vrcp.f32 %v2573_v4 }
0x29e3   : > { %3721 = vmatmul.msk.f32.gmra.mxu2 %vm474_vm11, %v2675_v5 }
0x29e8   : > { %v3997_v6 = vpop.eup %3996 }
0x29e9   : > { %v2579_v7 = vmul.f32 %v3997_v6, %v3989_v56  ;;  %v2576_v8 = vpop.xlane.xlu0 %2575 }
0x29ea   : > { %3998 = vrcp.f32 %v2576_v8 }
0x29eb   : > { %3713 = vmatmul.msk.f32.vlgmr.msra.gmra.mxu0 %vm474_vm11, %v2579_v7 }
0x29f0   : > { %v3999_v9 = vpop.eup %3998 }
0x29f1   : > { %v2580_v11 = vmul.f32 %v3999_v9, %v3991_v61 }
0x29f3   : > { %3714 = vmatmul.msk.f32.gmra.mxu0 %vm474_vm11, %v2580_v11 }
0x2a5e   : > { %v2707_v18 = vpop.f32.mrf.mxu2 }
0x2a5f   : > { %2715 = vrot.lane.b32.xlu1 %v2707_v18, %s4137_s16  ;;  %v2857_v18 = vld [vmem:[%s5312_s2 + $0x28] sm:$0xff] }
0x2a60   : > { %2877 = vmatpush.xpose.msrb.mxu1 %v2857_v18 }
0x2a66   : > { %v2710_v19 = vpop.f32.mrf.mxu2 }
0x2a67   : > { %2717 = vrot.lane.b32.xlu0 %v2710_v19, %s4137_s16  ;;  %v2809_v19 = vperm.slane %v4953_v63, 6 }
0x2a68   : > { %v2607_v2 = vpop.f32.mrf.mxu0 }
0x2a70   : > { %v2610_v22 = vpop.f32.mrf.mxu0 }
0x2ad1   : > { %v2716_v20 = vpop.permute.xlu1 %2715 }
0x2ad2   : > { %v2721_v21 = vsel %vm436_vm9, %v2607_v2, %v2716_v20 }
0x2ad3   : > { %2743 = vmatmul.f32.vlgmr.msrb.gmra.mxu3 %v2721_v21 }
0x2ad9   : > { %v2718_v23 = vpop.permute.xlu0 %2717 }
0x2ada   : > { %v2722_v0 = vsel %vm436_vm9, %v2610_v22, %v2718_v23 }
0x2adb   : > { %2746 = vmatmul.f32.gmra.mxu3 %v2722_v0 }
0x2b56   : > { %v2744_v27 = vpop.f32.mrf.mxu3 }
0x2b57   : > { %v2750_v29 = vadd.f32 %v2744_v27, %v4896_v25 }
0x2b59   : > { %v5010_v30 = vadd.f32 %v2752_v26, %v2750_v29 }
0x2b5b   : > { %v2755_v31 = vsel %vm290_vm1, %v5010_v30, 0.0 }
0x2b5c   : > { %2756 = vadd.xlane.f32.xlu2 %v2755_v31 }
0x2b5e   : > { %v2747_v28 = vpop.f32.mrf.mxu3 }
0x2b5f   : > { %v2751_v33 = vadd.f32 %v2747_v28, %v4894_v24 }
0x2b61   : > { %v5015_v34 = vadd.f32 %v2752_v26, %v2751_v33 }
0x2b63   : > { %v2758_v35 = vsel %vm294_vm0, %v5015_v34, 0.0 }
0x2b64   : > { %2759 = vadd.xlane.f32.xlu1 %v2758_v35 }
0x2bcf   : > { %v2757_v12 = vpop.xlane.xlu2 %2756 }
0x2bd0   : > { %v2761_v36 = vmul.f32 %v2757_v12, %v4244_v10 }
0x2bd2   : > { %v2763_v25 = vsub.f32 %v5010_v30, %v2761_v36 }
0x2bd4   : > { %v2765_v38 = vmul.f32 %v2763_v25, %v2763_v25 }
0x2bd6   : > { %v2767_v39 = vsel %vm290_vm1, %v2765_v38, 0.0 }
0x2bd7   : > { %2768 = vadd.xlane.f32.xlu0 %v2767_v39  ;;  %v2760_v16 = vpop.xlane.xlu1 %2759 }
0x2bd8   : > { %v2762_v40 = vmul.f32 %v2760_v16, %v4244_v10 }
0x2bda   : > { %v2764_v24 = vsub.f32 %v5015_v34, %v2762_v40 }
0x2bdc   : > { %v2766_v41 = vmul.f32 %v2764_v24, %v2764_v24 }
0x2bde   : > { %v2770_v42 = vsel %vm294_vm0, %v2766_v41, 0.0 }
0x2bdf   : > { %2771 = vadd.xlane.f32.xlu2 %v2770_v42  ;;  %v2861_v42 = vperm.slane %v4953_v63, 5 }
0x2c4a   : > { %v2769_v47 = vpop.xlane.xlu0 %2768 }
0x2c4b   : > { %v2773_v48 = vmul.f32 %v2769_v47, %v4244_v10 }
0x2c4d   : > { %v2775_v49 = vadd.f32 1e-05, %v2773_v48 }
0x2c4f   : > { %4000 = vrsqrt.f32 %v2775_v49  ;;  %vm2783_vm13 = vweird.f32 %v2775_v49 }
0x2c52   : > { %v2772_v50 = vpop.xlane.xlu2 %2771 }
0x2c53   : > { %v2774_v51 = vmul.f32 %v2772_v50, %v4244_v10 }
0x2c55   : > { %v4001_v52 = vpop.eup %4000  ;;  %v2776_v53 = vadd.f32 1e-05, %v2774_v51 }
0x2c56   : > { %v2778_v54 = vmul.f32 %v4001_v52, %v2775_v49  ;;  %vm2784_vm8 = vweird.f32 %v4001_v52 }
0x2c57   : > { %4002 = vrsqrt.f32 %v2776_v53  ;;  %vm2785_vm14 = vmor %vm2783_vm13, %vm2784_vm8  ;;  %vm2793_vm2 = vweird.f32 %v2776_v53 }
0x2c58   : > { %v2779_v55 = vmul.f32 %v4001_v52, %v2778_v54 }
0x2c5a   : > { %v2780_v56 = vmul.f32 0.5, %v2779_v55 }
0x2c5c   : > { %v2781_v57 = vsub.f32 1.5, %v2780_v56 }
0x2c5d   : > { %v4003_v58 = vpop.eup %4002 }
0x2c5e   : > { %v2782_v61 = vmul.f32 %v4001_v52, %v2781_v57  ;;  %v2788_v59 = vmul.f32 %v4003_v58, %v2776_v53  ;;  %vm2794_vm15 = vweird.f32 %v4003_v58 }
0x2c5f   : > { %vm2795_vm3 = vmor %vm2793_vm2, %vm2794_vm15 }
0x2c60   : > { %v2786_v60 = vsel %vm2785_vm14, %v4001_v52, %v2782_v61  ;;  %v2789_v62 = vmul.f32 %v4003_v58, %v2788_v59  ;;  %v3735_v61 = vld [vmem:[%s5312_s2 + $0x190] sm:$0xff]  ;;  %v3736_v59 = vld [vmem:[%s5312_s2 + $0x198] sm:$0xff] }
0x2c61   : > { %v2797_v37 = vmul.f32 %v2786_v60, %v2763_v25  ;;  %2992 = vmatpush.msra.mxu3 %v3735_v61  ;;  %3015 = vmatpush.msra.mxu0 %v3736_v59  ;;  %v3732_v60 = vld [vmem:[%s5312_s2 + $0x158] sm:$0xff] }
0x2c62   : > { %v2790_v3 = vmul.f32 0.5, %v2789_v62  ;;  %v3733_v62 = vld [vmem:[%s5312_s2 + $0x160] sm:$0xff] }
0x2c63   : > { %v2800_v4 = vmul.f32 %v2799_v44, %v2797_v37  ;;  %2993 = vmatpush.msra.mxu3 %v3732_v60  ;;  %3016 = vmatpush.msra.mxu0 %v3733_v62  ;;  %v3728_v37 = vld [vmem:[%s5312_s2 + $0x118] sm:$0xff] }
0x2c64   : > { %v2791_v5 = vsub.f32 1.5, %v2790_v3  ;;  %v3730_v3 = vld [vmem:[%s5312_s2 + $0x128] sm:$0xff] }
0x2c65   : > { %v2803_v6 = vadd.f32 %v2802_v1, %v2800_v4  ;;  %3017 = vmatpush.msra.mxu0 %v3730_v3  ;;  %v3725_v4 = vld [vmem:[%s5312_s2 + $0xe0] sm:$0xff] }
0x2c66   : > { %v2792_v7 = vmul.f32 %v4003_v58, %v2791_v5  ;;  %v3726_v5 = vld [vmem:[%s5312_s2 + $0xe8] sm:$0xff] }
0x2c67   : > { %3722 = vmatmul.msk.f32.vlgmr.msrb.gmra.mxu0 %vm290_vm1, %v2803_v6  ;;  %v3727_v6 = vld [vmem:[%s5312_s2 + $0xf0] sm:$0xff] }
0x2c68   : > { %v2796_v8 = vsel %vm2795_vm3, %v4003_v58, %v2792_v7  ;;  %v3734_v58 = vld [vmem:[%s5312_s2 + $0x188] sm:$0xff]  ;;  %3018 = vmatpush.msra.mxu0 %v3727_v6 }
0x2c69   : > { %v2798_v9 = vmul.f32 %v2796_v8, %v2764_v24  ;;  %2969 = vmatpush.msra.mxu2 %v3734_v58 }
0x2c6b   : > { %v2801_v11 = vmul.f32 %v2799_v44, %v2798_v9  ;;  %v3731_v44 = vld [vmem:[%s5312_s2 + $0x150] sm:$0xff] }
0x2c6c   : > { %2970 = vmatpush.msra.mxu2 %v3731_v44 }
0x2c6d   : > { %v2804_v13 = vadd.f32 %v2802_v1, %v2801_v11  ;;  %v3729_v1 = vld [vmem:[%s5312_s2 + $0x120] sm:$0xff] }
0x2c6e   : > { %2971 = vmatpush.msra.mxu2 %v3728_v37  ;;  %2994 = vmatpush.msra.mxu3 %v3729_v1 }
0x2c6f   : > { %3723 = vmatmul.msk.f32.gmra.mxu0 %vm290_vm1, %v2804_v13 }
0x2c70   : > { %2972 = vmatpush.msra.mxu2 %v3725_v4  ;;  %2995 = vmatpush.msra.mxu3 %v3726_v5 }
0x2ce4   : > { %v2833_v2 = vpop.f32.mrf.mxu0 }
0x2ce5   : > { %v2834_v20 = vadd.f32 %v2833_v2, %v2809_v19  ;;  %v5118_v2 = vld [vmem:[%s5312_s2 + $0x110] sm:$0xff] }
0x2ce7   : > { %v2841_v21 = vmul.f32 0.044715, %v2834_v20  ;;  %v2839_v25 = vmul.f32 0.5, %v2834_v20 }
0x2ce9   : > { %v2843_v22 = vmul.f32 %v2841_v21, %v2834_v20 }
0x2ceb   : > { %v2845_v23 = vmul.f32 %v2843_v22, %v2834_v20 }
0x2cec   : > { %v2836_v0 = vpop.f32.mrf.mxu0 }
0x2ced   : > { %v2837_v26 = vadd.f32 %v2836_v0, %v2809_v19  ;;  %v2847_v27 = vadd.f32 %v2845_v23, %v2834_v20  ;;  %v2933_v0 = vperm.slane %v5118_v2, 0 }
0x2cef   : > { %v2849_v29 = vmul.f32 0.7978846, %v2847_v27  ;;  %v2842_v31 = vmul.f32 0.044715, %v2837_v26  ;;  %v2840_v40 = vmul.f32 0.5, %v2837_v26 }
0x2cf1   : > { %4004 = vtanh.f32 %v2849_v29  ;;  %v2844_v28 = vmul.f32 %v2842_v31, %v2837_v26  ;;  %v2936_v31 = vperm.slane %v5118_v2, 1 }
0x2cf3   : > { %v2846_v33 = vmul.f32 %v2844_v28, %v2837_v26 }
0x2cf5   : > { %v2848_v35 = vadd.f32 %v2846_v33, %v2837_v26 }
0x2cf7   : > { %v4005_v12 = vpop.eup %4004  ;;  %v2850_v36 = vmul.f32 0.7978846, %v2848_v35 }
0x2cf8   : > { %v2853_v38 = vadd.f32 1.0, %v4005_v12 }
0x2cf9   : > { %4006 = vtanh.f32 %v2850_v36 }
0x2cfa   : > { %v2855_v39 = vmul.f32 %v2853_v38, %v2839_v25 }
0x2cfc   : > { %2878 = vmatmul.f32.vlgmr.msrb.gmra.mxu1 %v2855_v39 }
0x2cff   : > { %v4007_v16 = vpop.eup %4006 }
0x2d00   : > { %v2854_v24 = vadd.f32 1.0, %v4007_v16 }
0x2d02   : > { %v2856_v41 = vmul.f32 %v2854_v24, %v2840_v40 }
0x2d04   : > { %2881 = vmatmul.f32.gmra.mxu1 %v2856_v41 }
0x2d79   : > { %v2879_v43 = vpop.f32.mrf.mxu1 }
0x2d7a   : > { %v2880_v32 = vadd.f32 %v2879_v43, %v2861_v42 }
0x2d7c   : > { %v5058_v45 = vadd.f32 %v2880_v32, %v5010_v30 }
0x2d7e   : > { %v2889_v46 = vsel %vm290_vm1, %v5058_v45, 0.0 }
0x2d7f   : > { %2890 = vadd.xlane.f32.xlu1 %v2889_v46 }
0x2d81   : > { %v2882_v47 = vpop.f32.mrf.mxu1 }
0x2d82   : > { %v2883_v48 = vadd.f32 %v2882_v47, %v2861_v42 }
0x2d84   : > { %v5063_v49 = vadd.f32 %v2883_v48, %v5015_v34 }
0x2d86   : > { %v2892_v50 = vsel %vm294_vm0, %v5063_v49, 0.0 }
0x2d87   : > { %2893 = vadd.xlane.f32.xlu2 %v2892_v50 }
0x2df2   : > { %v2891_v51 = vpop.xlane.xlu1 %2890 }
0x2df3   : > { %v2895_v63 = vmul.f32 %v2891_v51, %v4244_v10 }
0x2df5   : > { %v2897_v52 = vsub.f32 %v5058_v45, %v2895_v63 }
0x2df7   : > { %v2899_v30 = vmul.f32 %v2897_v52, %v2897_v52 }
0x2df9   : > { %v2901_v53 = vsel %vm290_vm1, %v2899_v30, 0.0 }
0x2dfa   : > { %v2894_v54 = vpop.xlane.xlu2 %2893  ;;  %2902 = vadd.xlane.f32.xlu1 %v2901_v53 }
0x2dfb   : > { %v2896_v55 = vmul.f32 %v2894_v54, %v4244_v10 }
0x2dfd   : > { %v5072_v56 = vsub.f32 %v5063_v49, %v2896_v55 }
0x2dff   : > { %v2900_v34 = vmul.f32 %v5072_v56, %v5072_v56 }
0x2e01   : > { %v2904_v57 = vsel %vm294_vm0, %v2900_v34, 0.0 }
0x2e02   : > { %2905 = vadd.xlane.f32.xlu2 %v2904_v57 }
0x2e6d   : > { %v2903_v7 = vpop.xlane.xlu1 %2902 }
0x2e6e   : > { %v2907_v8 = vmul.f32 %v2903_v7, %v4244_v10 }
0x2e70   : > { %v2909_v9 = vadd.f32 1e-05, %v2907_v8 }
0x2e72   : > { %4008 = vrsqrt.f32 %v2909_v9  ;;  %vm2917_vm7 = vweird.f32 %v2909_v9 }
0x2e75   : > { %v2906_v11 = vpop.xlane.xlu2 %2905 }
0x2e76   : > { %v2908_v13 = vmul.f32 %v2906_v11, %v4244_v10 }
0x2e78   : > { %v4009_v14 = vpop.eup %4008  ;;  %v2910_v15 = vadd.f32 1e-05, %v2908_v13 }
0x2e79   : > { %v2912_v17 = vmul.f32 %v4009_v14, %v2909_v9  ;;  %vm2918_vm4 = vweird.f32 %v4009_v14 }
0x2e7a   : > { %4010 = vrsqrt.f32 %v2910_v15  ;;  %vm2919_vm5 = vmor %vm2917_vm7, %vm2918_vm4  ;;  %vm2927_vm8 = vweird.f32 %v2910_v15 }
0x2e7b   : > { %v2913_v18 = vmul.f32 %v4009_v14, %v2912_v17 }
0x2e7d   : > { %v2914_v19 = vmul.f32 0.5, %v2913_v18 }
0x2e7f   : > { %v2915_v20 = vsub.f32 1.5, %v2914_v19 }
0x2e80   : > { %v4011_v21 = vpop.eup %4010 }
0x2e81   : > { %v2916_v22 = vmul.f32 %v4009_v14, %v2915_v20  ;;  %v2922_v23 = vmul.f32 %v4011_v21, %v2910_v15  ;;  %vm2928_vm6 = vweird.f32 %v4011_v21 }
0x2e82   : > { %vm2929_vm13 = vmor %vm2927_vm8, %vm2928_vm6 }
0x2e83   : > { %v2920_v26 = vsel %vm2919_vm5, %v4009_v14, %v2916_v22  ;;  %v2923_v27 = vmul.f32 %v4011_v21, %v2922_v23 }
0x2e84   : > { %v2931_v29 = vmul.f32 %v2920_v26, %v2897_v52 }
0x2e85   : > { %v2924_v28 = vmul.f32 0.5, %v2923_v27 }
0x2e86   : > { %v2934_v33 = vmul.f32 %v2933_v0, %v2931_v29 }
0x2e87   : > { %v2925_v35 = vsub.f32 1.5, %v2924_v28 }
0x2e88   : > { %v2937_v12 = vadd.f32 %v2936_v31, %v2934_v33 }
0x2e89   : > { %v2926_v36 = vmul.f32 %v4011_v21, %v2925_v35 }
0x2e8a   : > { %3737 = vmatmul.msk.f32.vlgmr.msra.gmra.mxu2 %vm290_vm1, %v2937_v12  ;;  %3739 = vmatmul.msk.f32.vlgmr.msra.gmra.mxu3 %vm290_vm1, %v2937_v12 }
0x2e8b   : > { %v2930_v25 = vsel %vm2929_vm13, %v4011_v21, %v2926_v36  ;;  %3741 = vmatmul.msk.f32.vlgmr.msra.gmra.mxu0 %vm290_vm1, %v2937_v12 }
0x2e8c   : > { %v2932_v38 = vmul.f32 %v2930_v25, %v5072_v56  ;;  %v3760_v25 = vld [vmem:[%s5312_s2 + $0x1a0] sm:$0xff] }
0x2e8e   : > { %v2935_v39 = vmul.f32 %v2933_v0, %v2932_v38  ;;  %v3759_v38 = vld [vmem:[%s5312_s2 + $0x168] sm:$0xff] }
0x2e90   : > { %v2938_v16 = vadd.f32 %v2936_v31, %v2935_v39  ;;  %v3758_v39 = vld [vmem:[%s5312_s2 + $0x130] sm:$0xff] }
0x2e92   : > { %3738 = vmatmul.msk.f32.gmra.mxu2 %vm290_vm1, %v2938_v16  ;;  %3740 = vmatmul.msk.f32.gmra.mxu3 %vm290_vm1, %v2938_v16 }
0x2e93   : > { %3742 = vmatmul.msk.f32.gmra.mxu0 %vm290_vm1, %v2938_v16  ;;  %v3757_v16 = vld [vmem:[%s5312_s2 + $0xf8] sm:$0xff] }
0x2f08   : > { %v5129_v40 = vpop.f32.mrf.mxu0 }
0x2f0d   : > { %v2974_v24 = vpop.f32.mrf.mxu2  ;;  %v2997_v41 = vpop.f32.mrf.mxu3 }
0x2f0e   : > { %3121 = vrot.lane.b32.xlu1 %v2997_v41, %s4137_s16  ;;  %3117 = vrot.lane.b32.xlu2 %v2974_v24, %s4137_s16 }
0x2f10   : > { %v3023_v42 = vpop.f32.mrf.mxu0 }
0x2f11   : > { %3747 = vmatpush.msk.msrb.mxu2 %vm504_vm10, %v3023_v42 }
0x2f13   : > { %3109 = vmatpush.msrb.mxu2 %v5129_v40 }
0x2f15   : > { %v3000_v43 = vpop.f32.mrf.mxu3  ;;  %v2977_v32 = vpop.f32.mrf.mxu2 }
0x2f16   : > { %3123 = vrot.lane.b32.xlu0 %v3000_v43, %s4137_s16  ;;  %3743 = vmatpush.xpose.msk.msra.mxu1 %vm436_vm9, %v3000_v43 }
0x2f1a   : > { %3744 = vmatpush.xpose.msk.msra.mxu1 %vm436_vm9, %v2997_v41 }
0x2f1d   : > { %3745 = vmatmul.msk.f32.vlgmr.msra.gmra.mxu1 %vm436_vm9, %v2974_v24 }
0x2f1e   : > { %3119 = vrot.lane.b32.xlu0 %v2977_v32, %s4137_s16  ;;  %3243 = vmatpush.xpose.msrb.mxu1 %v3760_v25 }
0x2f22   : > { %3244 = vmatpush.xpose.msrb.mxu1 %v3759_v38  ;;  %v3770_v38 = vld [vmem:[%s5312_s2 + $0x1b0] sm:$0xff] }
0x2f25   : > { %3746 = vmatmul.msk.f32.gmra.mxu1 %vm436_vm9, %v2977_v32 }
0x2f26   : > { %3245 = vmatpush.xpose.msrb.mxu1 %v3758_v39  ;;  %v3769_v39 = vld [vmem:[%s5312_s2 + $0x178] sm:$0xff] }
0x2f2a   : > { %3246 = vmatpush.xpose.msrb.mxu1 %v3757_v16  ;;  %v3768_v16 = vld [vmem:[%s5312_s2 + $0x140] sm:$0xff] }
0x2f68   : > { %v3118_v48 = vpop.permute.xlu2 %3117 }
0x2f80   : > { %v3122_v47 = vpop.permute.xlu1 %3121 }
0x2f88   : > { %v3124_v46 = vpop.permute.xlu0 %3123 }
0x2f89   : > { %3750 = vmatpush.xpose.msk.msrb.mxu3 %vm436_vm9, %v3124_v46 }
0x2f8d   : > { %3751 = vmatpush.xpose.msk.msrb.mxu3 %vm436_vm9, %v3122_v47 }
0x2f90   : > { %3752 = vmatmul.msk.f32.vlgmr.msrb.gmra.mxu3 %vm436_vm9, %v3118_v48  ;;  %v3120_v50 = vpop.permute.xlu0 %3119  ;;  %v3256_v48 = vperm.slane %v5118_v2, 2 }
0x2f91   : > { %3378 = vmatpush.xpose.msra.mxu3 %v3770_v38 }
0x2f95   : > { %3379 = vmatpush.xpose.msra.mxu3 %v3769_v39 }
0x2f98   : > { %3753 = vmatmul.msk.f32.gmra.mxu3 %vm436_vm9, %v3120_v50 }
0x2f99   : > { %3380 = vmatpush.xpose.msra.mxu3 %v3768_v16 }
0x2f9a   : > { %v3055_v51 = vpop.f32.mrf.mxu1 }
0x2f9b   : > { %v3061_v63 = vmul.f32 0.125, %v3055_v51 }
0x2f9d   : > { %v3063_v52 = vsel %vm474_vm11, %v3061_v63, -inf }
0x2f9e   : > { %3064 = vmax.xlane.f32.xlu2 %v3063_v52 }
0x2fa2   : > { %v3058_v56 = vpop.f32.mrf.mxu1 }
0x2fa3   : > { %v3062_v57 = vmul.f32 0.125, %v3058_v56 }
0x2fa5   : > { %v3066_v44 = vsel %vm478_vm12, %v3062_v57, -inf }
0x2fb6   : > { %3183 = vrot.lane.b32.xlu2 %v3023_v42, %s4137_s16 }
0x3011   : > { %v3065_v30 = vpop.xlane.xlu2 %3064 }
0x3012   : > { %v3069_v5 = vsub.f32 %v3061_v63, %v3065_v30 }
0x3013   : > { %v3150_v53 = vpop.f32.mrf.mxu3 }
0x3014   : > { %v3156_v54 = vmul.f32 0.125, %v3150_v53  ;;  %v3071_v8 = vmul.f32 1.442695, %v3069_v5 }
0x3016   : > { %v3158_v55 = vsel %vm474_vm11, %v3156_v54, -inf }
0x3017   : > { %3159 = vmax.xlane.f32.xlu1 %v3158_v55 }
0x3019   : > { %v3184_v34 = vpop.permute.xlu2 %3183 }
0x301a   : > { %3754 = vmatpush.msk.msrb.mxu0 %vm504_vm10, %v3184_v34 }
0x301b   : > { %v3153_v58 = vpop.f32.mrf.mxu3 }
0x301c   : > { %v3157_v61 = vmul.f32 0.125, %v3153_v58 }
0x301e   : > { %v3161_v59 = vsel %vm478_vm12, %v3157_v61, -inf }
0x301f   : > { %3162 = vmax.xlane.f32.xlu0 %v3161_v59  ;;  %3067 = vmax.xlane.f32.xlu1 %v3066_v44 }
0x308a   : > { %v3160_v60 = vpop.xlane.xlu1 %3159 }
0x308b   : > { %v3164_v62 = vsub.f32 %v3156_v54, %v3160_v60 }
0x308d   : > { %v3166_v37 = vmul.f32 1.442695, %v3164_v62  ;;  %v3764_v62 = vld [vmem:[%s5312_s2 + $0x1a8] sm:$0xff] }
0x308e   : > { %3332 = vmatpush.msra.mxu2 %v3764_v62 }
0x308f   : > { %4012 = vpow2.f32 %v3166_v37  ;;  %v3763_v37 = vld [vmem:[%s5312_s2 + $0x170] sm:$0xff] }
0x3090   : > { %3333 = vmatpush.msra.mxu2 %v3763_v37 }
0x3092   : > { %v3163_v1 = vpop.xlane.xlu0 %3162  ;;  %v3068_v9 = vpop.xlane.xlu1 %3067 }
0x3093   : > { %v3165_v3 = vsub.f32 %v3157_v61, %v3163_v1  ;;  %v3070_v13 = vsub.f32 %v3062_v57, %v3068_v9  ;;  %v3762_v1 = vld [vmem:[%s5312_s2 + $0x138] sm:$0xff] }
0x3094   : > { %3334 = vmatpush.msra.mxu2 %v3762_v1 }
0x3095   : > { %v4013_v4 = vpop.eup %4012  ;;  %v3168_v6 = vmul.f32 1.442695, %v3165_v3  ;;  %v3073_v15 = vmul.f32 1.442695, %v3070_v13  ;;  %v3761_v3 = vld [vmem:[%s5312_s2 + $0x100] sm:$0xff] }
0x3096   : > { %v3170_v7 = vsel %vm474_vm11, %v4013_v4, 0.0  ;;  %3335 = vmatpush.msra.mxu2 %v3761_v3 }
0x3097   : > { %4014 = vpow2.f32 %v3168_v6  ;;  %3171 = vadd.xlane.f32.xlu0 %v3170_v7 }
0x3098   : > { %4016 = vpow2.f32 %v3071_v8 }
0x3099   : > { %4018 = vpow2.f32 %v3073_v15  ;;  %v3303_v15 = vperm.slane %v5118_v2, 3 }
0x309d   : > { %v4015_v11 = vpop.eup %4014 }
0x309e   : > { %v3173_v14 = vsel %vm478_vm12, %v4015_v11, 0.0  ;;  %v4017_v17 = vpop.eup %4016 }
0x309f   : > { %3174 = vadd.xlane.f32.xlu1 %v3173_v14  ;;  %v3075_v18 = vsel %vm474_vm11, %v4017_v17, 0.0  ;;  %v4019_v19 = vpop.eup %4018 }
0x30a0   : > { %v3078_v20 = vsel %vm478_vm12, %v4019_v19, 0.0 }
0x30a7   : > { %3076 = vadd.xlane.f32.xlu1 %v3075_v18  ;;  %v3306_v18 = vperm.slane %v5118_v2, 4 }
0x30ab   : > { %3181 = vrot.lane.b32.xlu0 %v5129_v40, %s4137_s16 }
0x30af   : > { %3079 = vadd.xlane.f32.xlu1 %v3078_v20 }
0x310a   : > { %v3172_v21 = vpop.xlane.xlu0 %3171 }
0x310b   : > { %4020 = vrcp.f32 %v3172_v21 }
0x3111   : > { %v4021_v23 = vpop.eup %4020 }
0x3112   : > { %v3175_v22 = vpop.xlane.xlu1 %3174  ;;  %v3178_v26 = vmul.f32 %v4021_v23, %v4013_v4 }
0x311a   : > { %v3077_v0 = vpop.xlane.xlu1 %3076 }
0x311b   : > { %4022 = vrcp.f32 %v3077_v0 }
0x311c   : > { %4024 = vrcp.f32 %v3175_v22 }
0x311d   : > { %v3182_v27 = vpop.permute.xlu0 %3181 }
0x311e   : > { %3209 = vmatpush.msrb.mxu0 %v3182_v27 }
0x311f   : > { %3755 = vmatmul.msk.f32.vlgmr.msrb.gmra.mxu0 %vm474_vm11, %v3178_v26 }
0x3121   : > { %v4023_v29 = vpop.eup %4022 }
0x3122   : > { %v4025_v31 = vpop.eup %4024  ;;  %v3083_v28 = vmul.f32 %v4023_v29, %v4017_v17  ;;  %v3080_v33 = vpop.xlane.xlu1 %3079 }
0x3123   : > { %4026 = vrcp.f32 %v3080_v33  ;;  %v3179_v35 = vmul.f32 %v4025_v31, %v4015_v11 }
0x3124   : > { %3748 = vmatmul.msk.f32.vlgmr.msrb.gmra.mxu2 %vm474_vm11, %v3083_v28 }
0x3127   : > { %3756 = vmatmul.msk.f32.gmra.mxu0 %vm474_vm11, %v3179_v35 }
0x3129   : > { %v4027_v12 = vpop.eup %4026 }
0x312a   : > { %v3084_v36 = vmul.f32 %v4027_v12, %v4019_v19 }
0x312c   : > { %3749 = vmatmul.msk.f32.gmra.mxu2 %vm474_vm11, %v3084_v36 }
0x319c   : > { %v3211_v40 = vpop.f32.mrf.mxu0 }
0x319d   : > { %3219 = vrot.lane.b32.xlu2 %v3211_v40, %s4137_s16  ;;  %v3767_v40 = vld [vmem:[%s5312_s2 + $0x108] sm:$0xff] }
0x319e   : > { %3381 = vmatpush.xpose.msra.mxu3 %v3767_v40 }
0x31a4   : > { %v3214_v24 = vpop.f32.mrf.mxu0 }
0x31a5   : > { %3221 = vrot.lane.b32.xlu0 %v3214_v24, %s4137_s16  ;;  %v3313_v24 = vperm.slane %v5118_v2, 6 }
0x31a7   : > { %v3111_v41 = vpop.f32.mrf.mxu2 }
0x31af   : > { %v3114_v32 = vpop.f32.mrf.mxu2 }
0x31f7   : > { %v3220_v42 = vpop.permute.xlu2 %3219 }
0x31f8   : > { %v3225_v43 = vsel %vm436_vm9, %v3111_v41, %v3220_v42 }
0x31f9   : > { %3247 = vmatmul.f32.vlgmr.msrb.gmra.mxu1 %v3225_v43 }
0x3217   : > { %v3222_v46 = vpop.permute.xlu0 %3221 }
0x3218   : > { %v3226_v47 = vsel %vm436_vm9, %v3114_v32, %v3222_v46 }
0x3219   : > { %3250 = vmatmul.f32.gmra.mxu1 %v3226_v47 }
0x3276   : > { %v3248_v50 = vpop.f32.mrf.mxu1 }
0x3277   : > { %v3254_v51 = vadd.f32 %v3248_v50, %v5058_v45 }
0x3279   : > { %v5179_v63 = vadd.f32 %v3256_v48, %v3254_v51 }
0x327b   : > { %v3259_v52 = vsel %vm290_vm1, %v5179_v63, 0.0 }
0x327c   : > { %3260 = vadd.xlane.f32.xlu1 %v3259_v52 }
0x3296   : > { %v3251_v30 = vpop.f32.mrf.mxu1 }
0x3297   : > { %v3255_v53 = vadd.f32 %v3251_v30, %v5063_v49 }
0x3299   : > { %v5184_v54 = vadd.f32 %v3256_v48, %v3255_v53 }
0x329b   : > { %v3262_v55 = vsel %vm294_vm0, %v5184_v54, 0.0 }
0x329c   : > { %3263 = vadd.xlane.f32.xlu2 %v3262_v55 }
0x32ef   : > { %v3261_v56 = vpop.xlane.xlu1 %3260 }
0x32f0   : > { %v3265_v34 = vmul.f32 %v3261_v56, %v4244_v10 }
0x32f2   : > { %v3267_v45 = vsub.f32 %v5179_v63, %v3265_v34 }
0x32f4   : > { %v3269_v57 = vmul.f32 %v3267_v45, %v3267_v45 }
0x32f6   : > { %v3271_v58 = vsel %vm290_vm1, %v3269_v57, 0.0 }
0x32f7   : > { %3272 = vadd.xlane.f32.xlu0 %v3271_v58 }
0x330f   : > { %v3264_v61 = vpop.xlane.xlu2 %3263 }
0x3310   : > { %v3266_v59 = vmul.f32 %v3264_v61, %v4244_v10 }
0x3312   : > { %v3268_v49 = vsub.f32 %v5184_v54, %v3266_v59 }
0x3314   : > { %v3270_v44 = vmul.f32 %v3268_v49, %v3268_v49 }
0x3316   : > { %v3274_v60 = vsel %vm294_vm0, %v3270_v44, 0.0 }
0x3317   : > { %3275 = vadd.xlane.f32.xlu1 %v3274_v60  ;;  %v3365_v60 = vperm.slane %v5118_v2, 5 }
0x336a   : > { %v3273_v4 = vpop.xlane.xlu0 %3272 }
0x336b   : > { %v3277_v5 = vmul.f32 %v3273_v4, %v4244_v10 }
0x336d   : > { %v3279_v6 = vadd.f32 1e-05, %v3277_v5 }
0x336f   : > { %4028 = vrsqrt.f32 %v3279_v6  ;;  %vm3287_vm10 = vweird.f32 %v3279_v6 }
0x3375   : > { %v4029_v7 = vpop.eup %4028 }
0x3376   : > { %v3282_v8 = vmul.f32 %v4029_v7, %v3279_v6  ;;  %vm3288_vm9 = vweird.f32 %v4029_v7 }
0x3377   : > { %vm3289_vm11 = vmor %vm3287_vm10, %vm3288_vm9 }
0x3378   : > { %v3283_v9 = vmul.f32 %v4029_v7, %v3282_v8 }
0x337a   : > { %v3284_v11 = vmul.f32 0.5, %v3283_v9 }
0x337c   : > { %v3285_v13 = vsub.f32 1.5, %v3284_v11 }
0x337e   : > { %v3286_v14 = vmul.f32 %v4029_v7, %v3285_v13 }
0x3380   : > { %v3290_v17 = vsel %vm3289_vm11, %v4029_v7, %v3286_v14 }
0x3381   : > { %v3301_v19 = vmul.f32 %v3290_v17, %v3267_v45 }
0x3383   : > { %v3304_v20 = vmul.f32 %v3303_v15, %v3301_v19  ;;  %v3445_v19 = vld [vmem:[%s5315_s5 + $0x5d] sm:$0xff] }
0x3385   : > { %v3307_v21 = vadd.f32 %v3306_v18, %v3304_v20  ;;  %v3444_v20 = vld [vmem:[%s5315_s5 + $0x55] sm:$0xff] }
0x3387   : > { %3765 = vmatmul.msk.f32.vlgmr.msra.gmra.mxu2 %vm290_vm1, %v3307_v21  ;;  %v3443_v21 = vld [vmem:[%s5315_s5 + $0x4d] sm:$0xff] }
0x338a   : > { %v3276_v22 = vpop.xlane.xlu1 %3275 }
0x338b   : > { %v3278_v23 = vmul.f32 %v3276_v22, %v4244_v10 }
0x338d   : > { %v3280_v0 = vadd.f32 1e-05, %v3278_v23 }
0x338f   : > { %4030 = vrsqrt.f32 %v3280_v0  ;;  %vm3297_vm14 = vweird.f32 %v3280_v0 }
0x3395   : > { %v4031_v26 = vpop.eup %4030 }
0x3396   : > { %v3292_v27 = vmul.f32 %v4031_v26, %v3280_v0  ;;  %vm3298_vm12 = vweird.f32 %v4031_v26 }
0x3397   : > { %vm3299_vm15 = vmor %vm3297_vm14, %vm3298_vm12 }
0x3398   : > { %v3293_v29 = vmul.f32 %v4031_v26, %v3292_v27 }
0x339a   : > { %v3294_v31 = vmul.f32 0.5, %v3293_v29 }
0x339c   : > { %v3295_v28 = vsub.f32 1.5, %v3294_v31 }
0x339e   : > { %v3296_v33 = vmul.f32 %v4031_v26, %v3295_v28 }
0x33a0   : > { %v3300_v35 = vsel %vm3299_vm15, %v4031_v26, %v3296_v33 }
0x33a1   : > { %v3302_v12 = vmul.f32 %v3300_v35, %v3268_v49  ;;  %v3837_v35 = vld [vmem:[%s5315_s5 + $0x4b] ss:$0 sm:$0xff] }
0x33a3   : > { %v3305_v36 = vmul.f32 %v3303_v15, %v3302_v12 }
0x33a5   : > { %v3308_v25 = vadd.f32 %v3306_v18, %v3305_v36 }
0x33a7   : > { %3766 = vmatmul.msk.f32.gmra.mxu2 %vm290_vm1, %v3308_v25  ;;  %v3838_v25 = vld [vmem:[%s5315_s5 + $0x4c] ss:$0 sm:$0xff] }
0x340a   : > { %v3337_v41 = vpop.f32.mrf.mxu2 }
0x340b   : > { %v3338_v42 = vadd.f32 %v3337_v41, %v3313_v24 }
0x340d   : > { %v3345_v43 = vmul.f32 0.044715, %v3338_v42  ;;  %v3343_v51 = vmul.f32 0.5, %v3338_v42 }
0x340f   : > { %v3347_v32 = vmul.f32 %v3345_v43, %v3338_v42 }
0x3411   : > { %v3349_v46 = vmul.f32 %v3347_v32, %v3338_v42 }
0x3413   : > { %v3351_v47 = vadd.f32 %v3349_v46, %v3338_v42 }
0x3415   : > { %v3353_v48 = vmul.f32 0.7978846, %v3351_v47 }
0x3417   : > { %4032 = vtanh.f32 %v3353_v48 }
0x341d   : > { %v4033_v50 = vpop.eup %4032 }
0x341e   : > { %v3357_v52 = vadd.f32 1.0, %v4033_v50 }
0x3420   : > { %v3359_v30 = vmul.f32 %v3357_v52, %v3343_v51 }
0x3422   : > { %3382 = vmatmul.f32.vlgmr.msra.gmra.mxu3 %v3359_v30 }
0x342a   : > { %v3340_v53 = vpop.f32.mrf.mxu2 }
0x342b   : > { %v3341_v55 = vadd.f32 %v3340_v53, %v3313_v24 }
0x342d   : > { %v3346_v56 = vmul.f32 0.044715, %v3341_v55  ;;  %v3344_v59 = vmul.f32 0.5, %v3341_v55 }
0x342f   : > { %v3348_v34 = vmul.f32 %v3346_v56, %v3341_v55 }
0x3431   : > { %v3350_v45 = vmul.f32 %v3348_v34, %v3341_v55 }
0x3433   : > { %v3352_v57 = vadd.f32 %v3350_v45, %v3341_v55 }
0x3435   : > { %v3354_v58 = vmul.f32 0.7978846, %v3352_v57 }
0x3437   : > { %4034 = vtanh.f32 %v3354_v58 }
0x343d   : > { %v4035_v61 = vpop.eup %4034 }
0x343e   : > { %v3358_v49 = vadd.f32 1.0, %v4035_v61 }
0x3440   : > { %v3360_v44 = vmul.f32 %v3358_v49, %v3344_v59 }
0x3442   : > { %3385 = vmatmul.f32.gmra.mxu3 %v3360_v44 }
0x34a5   : > { %v3383_v62 = vpop.f32.mrf.mxu3 }
0x34a6   : > { %v3384_v37 = vadd.f32 %v3383_v62, %v3365_v60 }
0x34a8   : > { %v3389_v1 = vadd.f32 %v3384_v37, %v5179_v63 }
0x34aa   : > { %v3393_v3 = vsel %vm290_vm1, %v3389_v1, 0.0 }
0x34ab   : > { %3394 = vadd.xlane.f32.xlu1 %v3393_v3 }
0x34c5   : > { %v3386_v4 = vpop.f32.mrf.mxu3 }
0x34c6   : > { %v3387_v5 = vadd.f32 %v3386_v4, %v3365_v60 }
0x34c8   : > { %v3390_v6 = vadd.f32 %v3387_v5, %v5184_v54  ;;  %v3446_v54 = vld [vmem:[%s5315_s5 + $0x65] sm:$0xff] }
0x34c9   : > { %3467 = vmatpush.msra.mxu0 %v3446_v54 }
0x34ca   : > { %v3396_v7 = vsel %vm294_vm0, %v3390_v6, 0.0 }
0x34cb   : > { %3397 = vadd.xlane.f32.xlu1 %v3396_v7  ;;  %3468 = vmatpush.msra.mxu0 %v3445_v19 }
0x34cd   : > { %3469 = vmatpush.msra.mxu0 %v3444_v20 }
0x34cf   : > { %3470 = vmatpush.msra.mxu0 %v3443_v21 }
0x351e   : > { %v3395_v8 = vpop.xlane.xlu1 %3394 }
0x351f   : > { %v3399_v9 = vmul.f32 %v3395_v8, %v4244_v10 }
0x3521   : > { %v3401_v11 = vsub.f32 %v3389_v1, %v3399_v9 }
0x3523   : > { %v3403_v13 = vmul.f32 %v3401_v11, %v3401_v11 }
0x3525   : > { %v3405_v2 = vsel %vm290_vm1, %v3403_v13, 0.0 }
0x3526   : > { %3406 = vadd.xlane.f32.xlu1 %v3405_v2 }
0x353e   : > { %v3398_v14 = vpop.xlane.xlu1 %3397 }
0x353f   : > { %v3400_v63 = vmul.f32 %v3398_v14, %v4244_v10 }
0x3541   : > { %v3402_v15 = vsub.f32 %v3390_v6, %v3400_v63 }
0x3543   : > { %v3404_v17 = vmul.f32 %v3402_v15, %v3402_v15 }
0x3545   : > { %v3408_v18 = vsel %vm294_vm0, %v3404_v17, 0.0 }
0x3546   : > { %3409 = vadd.xlane.f32.xlu1 %v3408_v18 }
0x3599   : > { %v3407_v22 = vpop.xlane.xlu1 %3406 }
0x359a   : > { %v3411_v23 = vmul.f32 %v3407_v22, %v4244_v10 }
0x359c   : > { %v3413_v0 = vadd.f32 1e-05, %v3411_v23 }
0x359e   : > { %4036 = vrsqrt.f32 %v3413_v0  ;;  %vm3421_vm3 = vweird.f32 %v3413_v0 }
0x35a4   : > { %v4037_v26 = vpop.eup %4036 }
0x35a5   : > { %v3416_v27 = vmul.f32 %v4037_v26, %v3413_v0  ;;  %vm3422_vm2 = vweird.f32 %v4037_v26 }
0x35a6   : > { %vm3423_vm4 = vmor %vm3421_vm3, %vm3422_vm2 }
0x35a7   : > { %v3417_v29 = vmul.f32 %v4037_v26, %v3416_v27 }
0x35a9   : > { %v3418_v31 = vmul.f32 0.5, %v3417_v29 }
0x35ab   : > { %v3419_v28 = vsub.f32 1.5, %v3418_v31 }
0x35ad   : > { %v3420_v33 = vmul.f32 %v4037_v26, %v3419_v28 }
0x35af   : > { %v3424_v12 = vsel %vm3423_vm4, %v4037_v26, %v3420_v33 }
0x35b0   : > { %v3435_v36 = vmul.f32 %v3424_v12, %v3401_v11 }
0x35b2   : > { %v3438_v38 = vmul.f32 %v3837_v35, %v3435_v36 }
0x35b4   : > { %v3441_v39 = vadd.f32 %v3838_v25, %v3438_v38 }
0x35b6   : > { %3771 = vmatmul.msk.f32.vlgmr.msra.gmra.mxu0 %vm290_vm1, %v3441_v39 }
0x35b9   : > { %v3410_v16 = vpop.xlane.xlu1 %3409 }
0x35ba   : > { %v3412_v40 = vmul.f32 %v3410_v16, %v4244_v10 }
0x35bc   : > { %v3414_v24 = vadd.f32 1e-05, %v3412_v40 }
0x35be   : > { %4038 = vrsqrt.f32 %v3414_v24  ;;  %vm3431_vm5 = vweird.f32 %v3414_v24 }
0x35c4   : > { %v4039_v41 = vpop.eup %4038 }
0x35c5   : > { %v3426_v42 = vmul.f32 %v4039_v41, %v3414_v24  ;;  %vm3432_vm7 = vweird.f32 %v4039_v41 }
0x35c6   : > { %vm3433_vm6 = vmor %vm3431_vm5, %vm3432_vm7 }
0x35c7   : > { %v3427_v43 = vmul.f32 %v4039_v41, %v3426_v42 }
0x35c9   : > { %v3428_v32 = vmul.f32 0.5, %v3427_v43 }
0x35cb   : > { %v3429_v46 = vsub.f32 1.5, %v3428_v32 }
0x35cd   : > { %v3430_v47 = vmul.f32 %v4039_v41, %v3429_v46 }
0x35cf   : > { %v3434_v48 = vsel %vm3433_vm6, %v4039_v41, %v3430_v47 }
0x35d0   : > { %v3436_v50 = vmul.f32 %v3434_v48, %v3402_v15 }
0x35d2   : > { %v3439_v51 = vmul.f32 %v3837_v35, %v3436_v50 }
0x35d4   : > { %v3442_v52 = vadd.f32 %v3838_v25, %v3439_v51 }
0x35d6   : > { %3772 = vmatmul.msk.f32.gmra.mxu0 %vm290_vm1, %v3442_v52 }
0x35d7   : > { %4067 = shalt.err (!%p4064_p3)
}
0x35d8   : > { %3783 = dma.vmem_to_hbm [thread:$0]  (%p4221_p5), %s3512_s13, 16, %s3514_s18, %s3487_s14   ;;  %v3839_v10 = vld [vmem:[%s5315_s5 + $0x6d] ss:$0 sm:$0xff]  ;;  %vm3478_vm1 = vcmask 261121  }
0x35d9   : > { %s3605_s23 = sshll.u32 %s4750_s22, 3  ;;  %s3774_s15 = sshll.u32 %s4204_s28, 3 }
0x35da   : > { %s275_s16 = scalar_lea.vmem [#allocation2], %s3605_s23  ;;  %s3496_s21 = scalar_lea.hbm %s5316_s6, %s3774_s15 }
0x35db   : > { %s3498_s29 = sshll.u32 %s275_s16, 4  ;;  %s3500_s8 = sshll.u32 %s3496_s21, 4  ;;  %s3499_s29 = int_to_ptr.vmem [resolvable:$true] %s3498_s29  ;;  %s3501_s8 = int_to_ptr.hbm [resolvable:$true] %s3500_s8 }
0x35dc   : > { %s3482_s13 = scalar_lea.sflag [#allocation3], %s4750_s22  ;;  %s4082_s18 = sshra.s32 %s3501_s8, 4  ;;  %s4083_s18 = int_to_ptr.hbm [resolvable:$true] %s4082_s18 }
0x35dd   : > { %s4084_s14 = scalar_lea.hbm %s4083_s18, 8  ;;  %s4088_s9 = scalar_lea.hbm %s5316_s6, 16 }
0x35de   : > { %p4085_p4 = scmp.ne.s32.totalorder %s4083_s18, %s4084_s14  ;;  %p4089_p9 = scmp.lt.s32.totalorder %s4083_s18, %s5316_s6 }
0x35df   : > { %p4090_p10 = scmp.lt.s32.totalorder %s4088_s9, %s4084_s14 }
0x35e0   : > { %p4086_p7 = pnand %p4085_p4, %p4221_p5 }
0x35e1   : > { %p4091_p11 = por %p4090_p10, %p4089_p9 }
0x35e2   : > { %p4087_p8 = pneg %p4086_p7 }
0x35e4   : > { %p4092_p12 = pnand %p4091_p11, %p4087_p8 }
0x3633   : > { %v3472_v30 = vpop.f32.mrf.mxu0 }
0x3634   : > { %v3473_v53 = vadd.f32 %v3839_v10, %v3472_v30 }
0x3636   : > { %3479 = vst.msk [vmem:[%s275_s16 - $0x1] sm:$0xfe] %vm3478_vm1, %v3473_v53 }
0x3653   : > { %v3475_v55 = vpop.f32.mrf.mxu0 }
0x3654   : > { %v3476_v56 = vadd.f32 %v3839_v10, %v3475_v55 }
0x3656   : > { %3480 = vst.msk [vmem:[%s275_s16 + $0x7] sm:$0x1] %vm294_vm0, %v3476_v56 }
0x3657   : > { %4095 = shalt.err (!%p4092_p12)
}
0x3658   : > { %3782 = dma.vmem_to_hbm [thread:$0]  (%p4221_p5), %s3499_s29, 128, %s3501_s8, %s3482_s13  }
0x3659 PF: > { %p3793_p13 = scmp.ge.s32.totalorder %s4134_s27, 2  ;;  %s3525_s22 = sand.u32 1, %s4122_s24  }
0x365a   : > { %s3526_s16 = scalar_lea.sflag [#allocation3], %s3525_s22 }
0x365b   : > { %p3787_p0 = pnand %p3793_p13, %p4225_p6 }
0x365d   : > { %p3788_p1 = pneg %p3787_p0 }
0x365f   : > { %4113 = dma.done.wait (%p3788_p1), %s3526_s16, 128  }
0x3660   : > { %4115 = vsyncadd (%p3788_p1), %s3526_s16, 4294967168  ;;  %s3536_s17 = scalar_lea.sflag [#allocation5], %s3525_s22 }
0x3661   : > { %4117 = dma.done.wait (%p3788_p1), %s3536_s17, 16  }
0x3662   : > { %4119 = vsyncadd (%p3788_p1), %s3536_s17, 4294967280  ;;  %p21_p5 = scmp.ge.s32.totalorder %s4208_s30, 4   ;;  %s5320_s24 = smov %s4126_s25 }
0x3663   : > { %s5321_s25 = smov %s4130_s26  ;;  %s5322_s26 = smov %s4219_s10 }
0x3664   : > { %s5323_s27 = smov %s4208_s30  ;;  %23 = sbr.rel (!%p21_p5) target bundleno = 5 (0x5), region = 99 }
0x3669   :  { %3541 = vsyncpa [#allocation3], 1 }
0x366a   :  { %3543 = vsyncpa [#allocation3 + $0x1], 1 }
0x366b   :  { %3544 = vsyncpa [#allocation5], 1 }
0x366c   :  { %3546 = vsyncpa [#allocation5 + $0x1], 1 }

</bundles_post_ra>
